<compile_context>
chip_gen: v7x
topology: tpu7x:2x2x1
jax: 0.10.0
libtpu: 0.0.40
codegen_flags: <defaults>
</compile_context>

<pallas_src>
import jax
import jax.numpy as jnp
from jax.experimental import pallas as pl
from jax.experimental.pallas import tpu as pltpu


# -----------------------------------------------------------------------------
# In-kernel helpers
# -----------------------------------------------------------------------------

def _conv4x4s2_taps(a_ref, w_ref):
    """4x4/stride-2 conv expressed as a 2x2/stride-1 conv over a space-to-depth packed input.

    a_ref : (Bb, OH+1, OW+1, 4*Cin) bf16 packed, padded input for Bb images
    w_ref : (4, 4*Cin, Cout)        bf16 packed weight, tap index t = dt*2 + du
    returns (Bb*OH*OW, Cout) f32 accumulator (stays resident in VMEM).
    """
    Bb, Tp, Up, K4 = a_ref.shape
    OH, OW = Tp - 1, Up - 1
    M = Bb * OH * OW
    acc = None
    for t, (dt, du) in enumerate(((0, 0), (0, 1), (1, 0), (1, 1))):
        tap = a_ref[:, dt:dt + OH, du:du + OW, :]          # contiguous static window slice
        part = jnp.dot(tap.reshape(M, K4), w_ref[t],
                       preferred_element_type=jnp.float32)
        acc = part if acc is None else acc + part
    return acc


def _instancenorm_lrelu(acc, gamma, beta, Bb, Mb, Cout):
    """InstanceNorm(affine=True, eps=1e-5, biased var) + LeakyReLU(0.2) on the f32 accumulator.

    One-pass stats (sum, sum of squares), then one fused scale*x + shift sweep.
    acc: (Bb*Mb, Cout) f32, gamma/beta: (1, Cout) f32 -> (Bb, Mb, Cout) f32.
    """
    acc3 = acc.reshape(Bb, Mb, Cout)
    s1 = jnp.sum(acc3, axis=1, keepdims=True)
    s2 = jnp.sum(acc3 * acc3, axis=1, keepdims=True)
    inv_m = 1.0 / float(Mb)
    mean = s1 * inv_m
    var = jnp.maximum(s2 * inv_m - mean * mean, 0.0)       # biased var (PyTorch InstanceNorm)
    scale = gamma * jax.lax.rsqrt(var + 1e-5)              # (Bb, 1, Cout)
    shift = beta - mean * scale
    y = acc3 * scale + shift
    return jnp.maximum(y, 0.2 * y)                         # LeakyReLU(0.2)


# -----------------------------------------------------------------------------
# Pallas kernels (one fused kernel per discriminator block)
# -----------------------------------------------------------------------------

def _block_kernel(a_ref, w_ref, g_ref, bt_ref, o_ref):
    """Blocks 1/2: conv(4x4, s2, p1) + InstanceNorm(affine) + LeakyReLU(0.2) for Bb images.

    Conv bias is intentionally absent: InstanceNorm's mean subtraction cancels it exactly.
    """
    Bb, Tp, Up, _ = a_ref.shape
    OH, OW = Tp - 1, Up - 1
    Cout = w_ref.shape[-1]
    acc = _conv4x4s2_taps(a_ref, w_ref)
    y = _instancenorm_lrelu(acc, g_ref[...], bt_ref[...], Bb, OH * OW, Cout)
    o_ref[...] = y.astype(o_ref.dtype)


def _block_head_kernel(p_ref, w_ref, g_ref, bt_ref, w4_ref, b4_ref, o_ref):
    """Block 3 (im2col patches) + IN + LeakyReLU, fused with the output conv (256 -> 1).

    p_ref : (Bb, 16, 2048) bf16 im2col patches of the 8x8x128 block-2 activation
    w_ref : (2048, 256) bf16, g/bt : (1, 256) f32, w4 : (16, 256) f32, b4 : (1, 1) f32
    o_ref : (Bb, 1, 1) f32
    """
    Bb, Mb, K = p_ref.shape
    Cout = w_ref.shape[-1]
    acc = jnp.dot(p_ref[...].reshape(Bb * Mb, K), w_ref[...],
                  preferred_element_type=jnp.float32)
    y = _instancenorm_lrelu(acc, g_ref[...], bt_ref[...], Bb, Mb, Cout)
    # Final 4x4 conv over the 4x4x256 map -> scalar per image (VPU multiply-reduce).
    out = jnp.sum(y * w4_ref[...], axis=(1, 2), keepdims=True) + b4_ref[...]
    o_ref[...] = out


# -----------------------------------------------------------------------------
# pallas_call wrappers
# -----------------------------------------------------------------------------

def _pick_bb(batch, mb, target_m=256):
    """Images per grid step: fill the MXU M dim to ~target_m, keep >= 2 grid steps (v7x TCs)."""
    want = max(1, target_m // mb)
    if batch >= 2:
        want = min(want, batch // 2)
    want = max(1, min(want, batch))
    for bb in range(want, 0, -1):
        if batch % bb == 0:
            return bb
    return 1


def _fused_block(a, w2, gamma, beta, *, target_m=256):
    """a: (B, OH+1, OW+1, 4*Cin) bf16 packed input -> (B, OH*OW, Cout) bf16."""
    B, Tp, Up, K4 = a.shape
    OH, OW = Tp - 1, Up - 1
    Mb = OH * OW
    Cout = w2.shape[-1]
    Bb = _pick_bb(B, Mb, target_m)
    return pl.pallas_call(
        _block_kernel,
        out_shape=jax.ShapeDtypeStruct((B, Mb, Cout), jnp.bfloat16),
        grid=(B // Bb,),
        in_specs=[
            pl.BlockSpec((Bb, Tp, Up, K4), lambda s: (s, 0, 0, 0)),
            pl.BlockSpec((4, K4, Cout), lambda s: (0, 0, 0)),   # weight: VMEM-resident
            pl.BlockSpec((1, Cout), lambda s: (0, 0)),
            pl.BlockSpec((1, Cout), lambda s: (0, 0)),
        ],
        out_specs=pl.BlockSpec((Bb, Mb, Cout), lambda s: (s, 0, 0)),
        compiler_params=pltpu.CompilerParams(dimension_semantics=("parallel",)),
    )(a, w2, gamma, beta)


def _fused_block_head(p3, w2, gamma, beta, w4, b4, *, target_m=256):
    """Block 3 + output conv.  p3: (B, 16, 2048) bf16 -> (B, 1, 1) f32."""
    B, Mb, K = p3.shape
    Cout = w2.shape[-1]
    Bb = _pick_bb(B, Mb, target_m)
    return pl.pallas_call(
        _block_head_kernel,
        out_shape=jax.ShapeDtypeStruct((B, 1, 1), jnp.float32),
        grid=(B // Bb,),
        in_specs=[
            pl.BlockSpec((Bb, Mb, K), lambda s: (s, 0, 0)),
            pl.BlockSpec((K, Cout), lambda s: (0, 0)),
            pl.BlockSpec((1, Cout), lambda s: (0, 0)),
            pl.BlockSpec((1, Cout), lambda s: (0, 0)),
            pl.BlockSpec((Mb, Cout), lambda s: (0, 0)),
            pl.BlockSpec((1, 1), lambda s: (0, 0)),
        ],
        out_specs=pl.BlockSpec((Bb, 1, 1), lambda s: (s, 0, 0)),
        compiler_params=pltpu.CompilerParams(dimension_semantics=("parallel",)),
    )(p3, w2, gamma, beta, w4, b4)


# -----------------------------------------------------------------------------
# JAX glue: packing (no 4x im2col expansion for blocks 1/2), parameters, forward
# -----------------------------------------------------------------------------

def _space_to_depth_pad1(x_nhwc):
    """(B, H, W, C) -> (B, H/2+1, W/2+1, 4*C): pad=1, fold 2x2 pixel blocks into channels."""
    B, H, W, C = x_nhwc.shape
    xp = jnp.pad(x_nhwc, ((0, 0), (1, 1), (1, 1), (0, 0)))
    Tp, Up = (H + 2) // 2, (W + 2) // 2
    xp = xp.reshape(B, Tp, 2, Up, 2, C).transpose(0, 1, 3, 2, 4, 5)   # (B,Tp,Up,dr,dc,C)
    return xp.reshape(B, Tp, Up, 4 * C)


def _im2col_nhwc(x, kh, kw, stride, pad):
    """x: (B, H, W, C) -> patches (B, OH*OW, kh*kw*C), K ordered (kh, kw, C).  Block 3 only."""
    B, H, W, C = x.shape
    xp = jnp.pad(x, ((0, 0), (pad, pad), (pad, pad), (0, 0)))
    OH = (H + 2 * pad - kh) // stride + 1
    OW = (W + 2 * pad - kw) // stride + 1
    cols = []
    for i in range(kh):
        for j in range(kw):
            cols.append(xp[:, i:i + stride * (OH - 1) + 1:stride,
                           j:j + stride * (OW - 1) + 1:stride, :])
    patches = jnp.stack(cols, axis=3).reshape(B, OH * OW, kh * kw * C)
    return patches, OH, OW


def _pack_conv_weight_2x2(w):
    """PyTorch (Cout, Cin, 4, 4) -> (4 [dt*2+du], 4*Cin [(dr*2+dc)*Cin + c], Cout) bf16."""
    cout, cin, kh, kw = w.shape
    assert kh == 4 and kw == 4
    wt = w.transpose(2, 3, 1, 0)                 # (i, j, cin, cout)
    wt = wt.reshape(2, 2, 2, 2, cin, cout)       # (dt, dr, du, dc, cin, cout)
    wt = wt.transpose(0, 2, 1, 3, 4, 5)          # (dt, du, dr, dc, cin, cout)
    return wt.reshape(4, 4 * cin, cout).astype(jnp.bfloat16)


def _pack_conv_weight(w):
    """PyTorch (Cout, Cin, kh, kw) -> (kh*kw*Cin, Cout) bf16 matching _im2col_nhwc ordering."""
    cout, cin, kh, kw = w.shape
    return w.transpose(2, 3, 1, 0).reshape(kh * kw * cin, cout).astype(jnp.bfloat16)


def init_params(channels, key):
    """Raw parameters in PyTorch layout (conv biases kept to mirror the torch module)."""
    def conv_init(k, cout, cin, ksz):
        kw_, kb_ = jax.random.split(k)
        w = jax.random.normal(kw_, (cout, cin, ksz, ksz), jnp.float32) * 0.05
        b = jax.random.normal(kb_, (cout,), jnp.float32) * 0.05
        return w, b

    k1, k2, k3, k4 = jax.random.split(key, 4)
    p = {}
    p["conv1_w"], p["conv1_b"] = conv_init(k1, 64, channels, 4)
    p["conv2_w"], p["conv2_b"] = conv_init(k2, 128, 64, 4)
    p["conv3_w"], p["conv3_b"] = conv_init(k3, 256, 128, 4)
    p["conv4_w"], p["conv4_b"] = conv_init(k4, 1, 256, 4)
    for i, c in ((1, 64), (2, 128), (3, 256)):   # InstanceNorm2d(affine=True) default init
        p[f"in{i}_g"] = jnp.ones((c,), jnp.float32)
        p[f"in{i}_b"] = jnp.zeros((c,), jnp.float32)
    return p


def pack_params(p):
    """One-time packing into kernel-ready layouts (outside the jitted forward)."""
    q = {}
    for i in (1, 2):
        q[f"conv{i}_w2x2"] = _pack_conv_weight_2x2(p[f"conv{i}_w"])
    q["conv3_w2d"] = _pack_conv_weight(p["conv3_w"])
    # conv1-3 biases are dropped: InstanceNorm mean subtraction cancels them exactly.
    for i in (1, 2, 3):
        q[f"in{i}_g"] = p[f"in{i}_g"].reshape(1, -1)
        q[f"in{i}_b"] = p[f"in{i}_b"].reshape(1, -1)
    w4 = p["conv4_w"]                            # (1, 256, 4, 4)
    q["conv4_w2d"] = w4[0].transpose(1, 2, 0).reshape(16, w4.shape[1]).astype(jnp.float32)
    q["conv4_b"] = p["conv4_b"].reshape(1, 1)
    return q


@jax.jit
def cnn_dis_forward(packed, x_nchw):
    """x_nchw: (B, C, 32, 32) f32 -> (B, 1, 1, 1) f32 (matches the PyTorch module)."""
    B, C, H, W = x_nchw.shape
    h = jnp.transpose(x_nchw, (0, 2, 3, 1)).astype(jnp.bfloat16)      # NHWC, bf16 MXU inputs

    # Block 1: conv(C -> 64, k4, s2, p1) + IN + LeakyReLU(0.2)
    a1 = _space_to_depth_pad1(h)                                      # (B, 17, 17, 4C)
    h = _fused_block(a1, packed["conv1_w2x2"], packed["in1_g"], packed["in1_b"])
    h = h.reshape(B, H // 2, W // 2, 64)

    # Block 2: conv(64 -> 128, k4, s2, p1) + IN + LeakyReLU(0.2)
    a2 = _space_to_depth_pad1(h)                                      # (B, 9, 9, 256)
    h = _fused_block(a2, packed["conv2_w2x2"], packed["in2_g"], packed["in2_b"])
    h = h.reshape(B, H // 4, W // 4, 128)

    # Block 3: conv(128 -> 256, k4, s2, p1) + IN + LeakyReLU + output conv(256->1, k4, s1, p0)
    assert H // 8 == 4 and W // 8 == 4, "fused output head assumes a 4x4 block-3 map (32x32 input)"
    p3, _, _ = _im2col_nhwc(h, 4, 4, 2, 1)                            # (B, 16, 2048)
    out = _fused_block_head(p3, packed["conv3_w2d"], packed["in3_g"], packed["in3_b"],
                            packed["conv4_w2d"], packed["conv4_b"])
    return out.reshape(B, 1, 1, 1)


# -----------------------------------------------------------------------------
# Pure-JAX f32 reference (mirrors the PyTorch module, incl. conv biases)
# -----------------------------------------------------------------------------

def _reference_forward(p, x):
    def conv(t, w, b, stride, pad):
        y = jax.lax.conv_general_dilated(
            t, w, window_strides=(stride, stride),
            padding=((pad, pad), (pad, pad)),
            dimension_numbers=("NCHW", "OIHW", "NCHW"))
        return y + b.reshape(1, -1, 1, 1)

    def inorm(t, g, b):
        mu = t.mean(axis=(2, 3), keepdims=True)
        var = t.var(axis=(2, 3), keepdims=True)
        return (t - mu) * jax.lax.rsqrt(var + 1e-5) * g.reshape(1, -1, 1, 1) + b.reshape(1, -1, 1, 1)

    lrelu = lambda t: jnp.maximum(t, 0.2 * t)
    h = x
    for i in (1, 2, 3):
        h = conv(h, p[f"conv{i}_w"], p[f"conv{i}_b"], 2, 1)
        h = lrelu(inorm(h, p[f"in{i}_g"], p[f"in{i}_b"]))
    return conv(h, p["conv4_w"], p["conv4_b"], 1, 0)


if __name__ == "__main__":
    key = jax.random.PRNGKey(0)
    k_param, k_x = jax.random.split(key)

    B, C, H, W = 2, 4, 32, 32            # 32x32 -> 16 -> 8 -> 4 -> 1x1 (required by the 4x4 head)
    x = jax.random.normal(k_x, (B, C, H, W), jnp.float32)
    raw = init_params(C, k_param)
    packed = pack_params(raw)

    out = jax.block_until_ready(cnn_dis_forward(packed, x))
    assert out.shape == (B, 1, 1, 1), out.shape
    assert bool(jnp.all(jnp.isfinite(out)))

    # Sanity check against the f32 reference (loose tolerance: kernel runs bf16 activations).
    ref = _reference_forward(raw, x)
    max_err = float(jnp.max(jnp.abs(out - ref)))
    tol = 0.2 + 0.1 * float(jnp.max(jnp.abs(ref)))
    assert max_err <= tol, (max_err, tol)

    print("KERNEL_OK")
</pallas_src>

<mosaic_0001>
module attributes {stable_mosaic.version = 11 : i64} {
  func.func @_block_kernel(%arg0: i32, %arg1: memref<1x17x17x16xbf16, #tpu.memory_space<vmem>>, %arg2: memref<4x16x64xbf16, #tpu.memory_space<vmem>>, %arg3: memref<1x64xf32, #tpu.memory_space<vmem>>, %arg4: memref<1x64xf32, #tpu.memory_space<vmem>>, %arg5: memref<1x256x64xbf16, #tpu.memory_space<vmem>>) attributes {dimension_semantics = [#tpu.dimension_semantics<parallel>], iteration_bounds = array<i64: 2>, scalar_prefetch = 0 : i64, scratch_operands = 0 : i64, tpu.core_type = #tpu.core_type<tc>, window_params = [{transform_indices = @transform_0, window_bounds = array<i64: 1, 17, 17, 16>}, {pipeline_mode = #tpu.pipeline_mode<synchronous>, transform_indices = @transform_1, window_bounds = array<i64: 4, 16, 64>}, {pipeline_mode = #tpu.pipeline_mode<synchronous>, transform_indices = @transform_2, window_bounds = array<i64: 1, 64>}, {pipeline_mode = #tpu.pipeline_mode<synchronous>, transform_indices = @transform_3, window_bounds = array<i64: 1, 64>}, {transform_indices = @transform_4, window_bounds = array<i64: 1, 256, 64>}]} {
    %c0 = arith.constant 0 : index
    %c0_0 = arith.constant 0 : index
    %c0_1 = arith.constant 0 : index
    %c0_2 = arith.constant 0 : index
    %0 = vector.load %arg1[%c0, %c0_0, %c0_1, %c0_2] : memref<1x17x17x16xbf16, #tpu.memory_space<vmem>>, vector<1x16x16x16xbf16>
    %1 = vector.shape_cast %0 : vector<1x16x16x16xbf16> to vector<256x16xbf16>
    %c0_3 = arith.constant 0 : index
    %c0_4 = arith.constant 0 : index
    %c0_5 = arith.constant 0 : index
    %2 = vector.load %arg2[%c0_3, %c0_4, %c0_5] : memref<4x16x64xbf16, #tpu.memory_space<vmem>>, vector<1x16x64xbf16>
    %3 = vector.shape_cast %2 : vector<1x16x64xbf16> to vector<16x64xbf16>
    %cst = arith.constant dense<0.000000e+00> : vector<256x64xf32>
    %4 = tpu.matmul %1, %3, %cst {dimension_numbers = #tpu.dot_dimension_numbers<[1], [0], [0], [1], [0, 0, 1, 1], [], []>} : vector<256x16xbf16>, vector<16x64xbf16>, vector<256x64xf32> -> vector<256x64xf32>
    %c0_6 = arith.constant 0 : index
    %c0_7 = arith.constant 0 : index
    %c1 = arith.constant 1 : index
    %c0_8 = arith.constant 0 : index
    %5 = vector.load %arg1[%c0_6, %c0_7, %c1, %c0_8] : memref<1x17x17x16xbf16, #tpu.memory_space<vmem>>, vector<1x16x16x16xbf16>
    %6 = vector.shape_cast %5 : vector<1x16x16x16xbf16> to vector<256x16xbf16>
    %c1_9 = arith.constant 1 : index
    %c0_10 = arith.constant 0 : index
    %c0_11 = arith.constant 0 : index
    %7 = vector.load %arg2[%c1_9, %c0_10, %c0_11] : memref<4x16x64xbf16, #tpu.memory_space<vmem>>, vector<1x16x64xbf16>
    %8 = vector.shape_cast %7 : vector<1x16x64xbf16> to vector<16x64xbf16>
    %cst_12 = arith.constant dense<0.000000e+00> : vector<256x64xf32>
    %9 = tpu.matmul %6, %8, %cst_12 {dimension_numbers = #tpu.dot_dimension_numbers<[1], [0], [0], [1], [0, 0, 1, 1], [], []>} : vector<256x16xbf16>, vector<16x64xbf16>, vector<256x64xf32> -> vector<256x64xf32>
    %10 = arith.addf %4, %9 : vector<256x64xf32>
    %c0_13 = arith.constant 0 : index
    %c1_14 = arith.constant 1 : index
    %c0_15 = arith.constant 0 : index
    %c0_16 = arith.constant 0 : index
    %11 = vector.load %arg1[%c0_13, %c1_14, %c0_15, %c0_16] : memref<1x17x17x16xbf16, #tpu.memory_space<vmem>>, vector<1x16x16x16xbf16>
    %12 = vector.shape_cast %11 : vector<1x16x16x16xbf16> to vector<256x16xbf16>
    %c2 = arith.constant 2 : index
    %c0_17 = arith.constant 0 : index
    %c0_18 = arith.constant 0 : index
    %13 = vector.load %arg2[%c2, %c0_17, %c0_18] : memref<4x16x64xbf16, #tpu.memory_space<vmem>>, vector<1x16x64xbf16>
    %14 = vector.shape_cast %13 : vector<1x16x64xbf16> to vector<16x64xbf16>
    %cst_19 = arith.constant dense<0.000000e+00> : vector<256x64xf32>
    %15 = tpu.matmul %12, %14, %cst_19 {dimension_numbers = #tpu.dot_dimension_numbers<[1], [0], [0], [1], [0, 0, 1, 1], [], []>} : vector<256x16xbf16>, vector<16x64xbf16>, vector<256x64xf32> -> vector<256x64xf32>
    %16 = arith.addf %10, %15 : vector<256x64xf32>
    %c0_20 = arith.constant 0 : index
    %c1_21 = arith.constant 1 : index
    %c1_22 = arith.constant 1 : index
    %c0_23 = arith.constant 0 : index
    %17 = vector.load %arg1[%c0_20, %c1_21, %c1_22, %c0_23] : memref<1x17x17x16xbf16, #tpu.memory_space<vmem>>, vector<1x16x16x16xbf16>
    %18 = vector.shape_cast %17 : vector<1x16x16x16xbf16> to vector<256x16xbf16>
    %c3 = arith.constant 3 : index
    %c0_24 = arith.constant 0 : index
    %c0_25 = arith.constant 0 : index
    %19 = vector.load %arg2[%c3, %c0_24, %c0_25] : memref<4x16x64xbf16, #tpu.memory_space<vmem>>, vector<1x16x64xbf16>
    %20 = vector.shape_cast %19 : vector<1x16x64xbf16> to vector<16x64xbf16>
    %cst_26 = arith.constant dense<0.000000e+00> : vector<256x64xf32>
    %21 = tpu.matmul %18, %20, %cst_26 {dimension_numbers = #tpu.dot_dimension_numbers<[1], [0], [0], [1], [0, 0, 1, 1], [], []>} : vector<256x16xbf16>, vector<16x64xbf16>, vector<256x64xf32> -> vector<256x64xf32>
    %22 = arith.addf %16, %21 : vector<256x64xf32>
    %c0_27 = arith.constant 0 : index
    %c0_28 = arith.constant 0 : index
    %23 = vector.load %arg3[%c0_27, %c0_28] : memref<1x64xf32, #tpu.memory_space<vmem>>, vector<1x64xf32>
    %c0_29 = arith.constant 0 : index
    %c0_30 = arith.constant 0 : index
    %24 = vector.load %arg4[%c0_29, %c0_30] : memref<1x64xf32, #tpu.memory_space<vmem>>, vector<1x64xf32>
    %25 = vector.shape_cast %22 : vector<256x64xf32> to vector<1x256x64xf32>
    %cst_31 = arith.constant dense<0.000000e+00> : vector<1x64xf32>
    %26 = vector.multi_reduction <add>, %25, %cst_31 [1] : vector<1x256x64xf32> to vector<1x64xf32>
    %27 = vector.shape_cast %26 : vector<1x64xf32> to vector<1x1x64xf32>
    %28 = arith.mulf %25, %25 : vector<1x256x64xf32>
    %cst_32 = arith.constant dense<0.000000e+00> : vector<1x64xf32>
    %29 = vector.multi_reduction <add>, %28, %cst_32 [1] : vector<1x256x64xf32> to vector<1x64xf32>
    %30 = vector.shape_cast %29 : vector<1x64xf32> to vector<1x1x64xf32>
    %cst_33 = arith.constant 3.906250e-03 : f32
    %31 = vector.broadcast %cst_33 : f32 to vector<1x1x64xf32>
    %32 = arith.mulf %27, %31 : vector<1x1x64xf32>
    %cst_34 = arith.constant 3.906250e-03 : f32
    %33 = vector.broadcast %cst_34 : f32 to vector<1x1x64xf32>
    %34 = arith.mulf %30, %33 : vector<1x1x64xf32>
    %35 = arith.mulf %32, %32 : vector<1x1x64xf32>
    %36 = arith.subf %34, %35 : vector<1x1x64xf32>
    %cst_35 = arith.constant 0.000000e+00 : f32
    %37 = vector.broadcast %cst_35 : f32 to vector<1x1x64xf32>
    %38 = arith.maximumf %36, %37 : vector<1x1x64xf32>
    %cst_36 = arith.constant 9.99999974E-6 : f32
    %39 = vector.broadcast %cst_36 : f32 to vector<1x1x64xf32>
    %40 = arith.addf %38, %39 : vector<1x1x64xf32>
    %41 = math.rsqrt %40 : vector<1x1x64xf32>
    %42 = vector.shape_cast %23 : vector<1x64xf32> to vector<1x1x64xf32>
    %43 = arith.mulf %42, %41 : vector<1x1x64xf32>
    %44 = arith.mulf %32, %43 : vector<1x1x64xf32>
    %45 = vector.shape_cast %24 : vector<1x64xf32> to vector<1x1x64xf32>
    %46 = arith.subf %45, %44 : vector<1x1x64xf32>
    %47 = vector.broadcast %43 : vector<1x1x64xf32> to vector<1x256x64xf32>
    %48 = arith.mulf %25, %47 : vector<1x256x64xf32>
    %49 = vector.broadcast %46 : vector<1x1x64xf32> to vector<1x256x64xf32>
    %50 = arith.addf %48, %49 : vector<1x256x64xf32>
    %cst_37 = arith.constant 2.000000e-01 : f32
    %51 = vector.broadcast %cst_37 : f32 to vector<1x256x64xf32>
    %52 = arith.mulf %51, %50 : vector<1x256x64xf32>
    %53 = arith.maximumf %50, %52 : vector<1x256x64xf32>
    %54 = arith.truncf %53 : vector<1x256x64xf32> to vector<1x256x64xbf16>
    %c0_38 = arith.constant 0 : index
    %c0_39 = arith.constant 0 : index
    %c0_40 = arith.constant 0 : index
    %55 = vector.load %arg5[%c0_38, %c0_39, %c0_40] : memref<1x256x64xbf16, #tpu.memory_space<vmem>>, vector<1x256x64xbf16>
    tpu.vector_store %arg5[%c0_38, %c0_39, %c0_40], %54 {strides = array<i32>} : memref<1x256x64xbf16, #tpu.memory_space<vmem>>, vector<1x256x64xbf16>,
    return
  }
  func.func @transform_0(%arg0: i32) -> (i32, i32, i32, i32) {
    %c0_i32 = arith.constant 0 : i32
    %c0_i32_0 = arith.constant 0 : i32
    %c0_i32_1 = arith.constant 0 : i32
    %c0_i32_2 = arith.constant 0 : i32
    return %arg0, %c0_i32, %c0_i32_0, %c0_i32_1 : i32, i32, i32, i32
  }
  func.func @transform_1(%arg0: i32) -> (i32, i32, i32) {
    %c0_i32 = arith.constant 0 : i32
    %c0_i32_0 = arith.constant 0 : i32
    %c0_i32_1 = arith.constant 0 : i32
    %c0_i32_2 = arith.constant 0 : i32
    return %c0_i32, %c0_i32_0, %c0_i32_1 : i32, i32, i32
  }
  func.func @transform_2(%arg0: i32) -> (i32, i32) {
    %c0_i32 = arith.constant 0 : i32
    %c0_i32_0 = arith.constant 0 : i32
    %c0_i32_1 = arith.constant 0 : i32
    return %c0_i32, %c0_i32_0 : i32, i32
  }
  func.func @transform_3(%arg0: i32) -> (i32, i32) {
    %c0_i32 = arith.constant 0 : i32
    %c0_i32_0 = arith.constant 0 : i32
    %c0_i32_1 = arith.constant 0 : i32
    return %c0_i32, %c0_i32_0 : i32, i32
  }
  func.func @transform_4(%arg0: i32) -> (i32, i32, i32) {
    %c0_i32 = arith.constant 0 : i32
    %c0_i32_0 = arith.constant 0 : i32
    %c0_i32_1 = arith.constant 0 : i32
    return %arg0, %c0_i32, %c0_i32_0 : i32, i32, i32
  }
}

module attributes {stable_mosaic.version = 11 : i64} {
  func.func @_block_kernel(%arg0: i32, %arg1: memref<1x9x9x256xbf16, #tpu.memory_space<vmem>>, %arg2: memref<4x256x128xbf16, #tpu.memory_space<vmem>>, %arg3: memref<1x128xf32, #tpu.memory_space<vmem>>, %arg4: memref<1x128xf32, #tpu.memory_space<vmem>>, %arg5: memref<1x64x128xbf16, #tpu.memory_space<vmem>>) attributes {dimension_semantics = [#tpu.dimension_semantics<parallel>], iteration_bounds = array<i64: 2>, scalar_prefetch = 0 : i64, scratch_operands = 0 : i64, tpu.core_type = #tpu.core_type<tc>, window_params = [{transform_indices = @transform_0, window_bounds = array<i64: 1, 9, 9, 256>}, {pipeline_mode = #tpu.pipeline_mode<synchronous>, transform_indices = @transform_1, window_bounds = array<i64: 4, 256, 128>}, {pipeline_mode = #tpu.pipeline_mode<synchronous>, transform_indices = @transform_2, window_bounds = array<i64: 1, 128>}, {pipeline_mode = #tpu.pipeline_mode<synchronous>, transform_indices = @transform_3, window_bounds = array<i64: 1, 128>}, {transform_indices = @transform_4, window_bounds = array<i64: 1, 64, 128>}]} {
    %c0 = arith.constant 0 : index
    %c0_0 = arith.constant 0 : index
    %c0_1 = arith.constant 0 : index
    %c0_2 = arith.constant 0 : index
    %0 = vector.load %arg1[%c0, %c0_0, %c0_1, %c0_2] : memref<1x9x9x256xbf16, #tpu.memory_space<vmem>>, vector<1x8x8x256xbf16>
    %1 = vector.shape_cast %0 : vector<1x8x8x256xbf16> to vector<64x256xbf16>
    %c0_3 = arith.constant 0 : index
    %c0_4 = arith.constant 0 : index
    %c0_5 = arith.constant 0 : index
    %2 = vector.load %arg2[%c0_3, %c0_4, %c0_5] : memref<4x256x128xbf16, #tpu.memory_space<vmem>>, vector<1x256x128xbf16>
    %3 = vector.shape_cast %2 : vector<1x256x128xbf16> to vector<256x128xbf16>
    %cst = arith.constant dense<0.000000e+00> : vector<64x128xf32>
    %4 = tpu.matmul %1, %3, %cst {dimension_numbers = #tpu.dot_dimension_numbers<[1], [0], [0], [1], [0, 0, 1, 1], [], []>} : vector<64x256xbf16>, vector<256x128xbf16>, vector<64x128xf32> -> vector<64x128xf32>
    %c0_6 = arith.constant 0 : index
    %c0_7 = arith.constant 0 : index
    %c1 = arith.constant 1 : index
    %c0_8 = arith.constant 0 : index
    %5 = vector.load %arg1[%c0_6, %c0_7, %c1, %c0_8] : memref<1x9x9x256xbf16, #tpu.memory_space<vmem>>, vector<1x8x8x256xbf16>
    %6 = vector.shape_cast %5 : vector<1x8x8x256xbf16> to vector<64x256xbf16>
    %c1_9 = arith.constant 1 : index
    %c0_10 = arith.constant 0 : index
    %c0_11 = arith.constant 0 : index
    %7 = vector.load %arg2[%c1_9, %c0_10, %c0_11] : memref<4x256x128xbf16, #tpu.memory_space<vmem>>, vector<1x256x128xbf16>
    %8 = vector.shape_cast %7 : vector<1x256x128xbf16> to vector<256x128xbf16>
    %cst_12 = arith.constant dense<0.000000e+00> : vector<64x128xf32>
    %9 = tpu.matmul %6, %8, %cst_12 {dimension_numbers = #tpu.dot_dimension_numbers<[1], [0], [0], [1], [0, 0, 1, 1], [], []>} : vector<64x256xbf16>, vector<256x128xbf16>, vector<64x128xf32> -> vector<64x128xf32>
    %10 = arith.addf %4, %9 : vector<64x128xf32>
    %c0_13 = arith.constant 0 : index
    %c1_14 = arith.constant 1 : index
    %c0_15 = arith.constant 0 : index
    %c0_16 = arith.constant 0 : index
    %11 = vector.load %arg1[%c0_13, %c1_14, %c0_15, %c0_16] : memref<1x9x9x256xbf16, #tpu.memory_space<vmem>>, vector<1x8x8x256xbf16>
    %12 = vector.shape_cast %11 : vector<1x8x8x256xbf16> to vector<64x256xbf16>
    %c2 = arith.constant 2 : index
    %c0_17 = arith.constant 0 : index
    %c0_18 = arith.constant 0 : index
    %13 = vector.load %arg2[%c2, %c0_17, %c0_18] : memref<4x256x128xbf16, #tpu.memory_space<vmem>>, vector<1x256x128xbf16>
    %14 = vector.shape_cast %13 : vector<1x256x128xbf16> to vector<256x128xbf16>
    %cst_19 = arith.constant dense<0.000000e+00> : vector<64x128xf32>
    %15 = tpu.matmul %12, %14, %cst_19 {dimension_numbers = #tpu.dot_dimension_numbers<[1], [0], [0], [1], [0, 0, 1, 1], [], []>} : vector<64x256xbf16>, vector<256x128xbf16>, vector<64x128xf32> -> vector<64x128xf32>
    %16 = arith.addf %10, %15 : vector<64x128xf32>
    %c0_20 = arith.constant 0 : index
    %c1_21 = arith.constant 1 : index
    %c1_22 = arith.constant 1 : index
    %c0_23 = arith.constant 0 : index
    %17 = vector.load %arg1[%c0_20, %c1_21, %c1_22, %c0_23] : memref<1x9x9x256xbf16, #tpu.memory_space<vmem>>, vector<1x8x8x256xbf16>
    %18 = vector.shape_cast %17 : vector<1x8x8x256xbf16> to vector<64x256xbf16>
    %c3 = arith.constant 3 : index
    %c0_24 = arith.constant 0 : index
    %c0_25 = arith.constant 0 : index
    %19 = vector.load %arg2[%c3, %c0_24, %c0_25] : memref<4x256x128xbf16, #tpu.memory_space<vmem>>, vector<1x256x128xbf16>
    %20 = vector.shape_cast %19 : vector<1x256x128xbf16> to vector<256x128xbf16>
    %cst_26 = arith.constant dense<0.000000e+00> : vector<64x128xf32>
    %21 = tpu.matmul %18, %20, %cst_26 {dimension_numbers = #tpu.dot_dimension_numbers<[1], [0], [0], [1], [0, 0, 1, 1], [], []>} : vector<64x256xbf16>, vector<256x128xbf16>, vector<64x128xf32> -> vector<64x128xf32>
    %22 = arith.addf %16, %21 : vector<64x128xf32>
    %c0_27 = arith.constant 0 : index
    %c0_28 = arith.constant 0 : index
    %23 = vector.load %arg3[%c0_27, %c0_28] : memref<1x128xf32, #tpu.memory_space<vmem>>, vector<1x128xf32>
    %c0_29 = arith.constant 0 : index
    %c0_30 = arith.constant 0 : index
    %24 = vector.load %arg4[%c0_29, %c0_30] : memref<1x128xf32, #tpu.memory_space<vmem>>, vector<1x128xf32>
    %25 = vector.shape_cast %22 : vector<64x128xf32> to vector<1x64x128xf32>
    %cst_31 = arith.constant dense<0.000000e+00> : vector<1x128xf32>
    %26 = vector.multi_reduction <add>, %25, %cst_31 [1] : vector<1x64x128xf32> to vector<1x128xf32>
    %27 = vector.shape_cast %26 : vector<1x128xf32> to vector<1x1x128xf32>
    %28 = arith.mulf %25, %25 : vector<1x64x128xf32>
    %cst_32 = arith.constant dense<0.000000e+00> : vector<1x128xf32>
    %29 = vector.multi_reduction <add>, %28, %cst_32 [1] : vector<1x64x128xf32> to vector<1x128xf32>
    %30 = vector.shape_cast %29 : vector<1x128xf32> to vector<1x1x128xf32>
    %cst_33 = arith.constant 1.562500e-02 : f32
    %31 = vector.broadcast %cst_33 : f32 to vector<1x1x128xf32>
    %32 = arith.mulf %27, %31 : vector<1x1x128xf32>
    %cst_34 = arith.constant 1.562500e-02 : f32
    %33 = vector.broadcast %cst_34 : f32 to vector<1x1x128xf32>
    %34 = arith.mulf %30, %33 : vector<1x1x128xf32>
    %35 = arith.mulf %32, %32 : vector<1x1x128xf32>
    %36 = arith.subf %34, %35 : vector<1x1x128xf32>
    %cst_35 = arith.constant 0.000000e+00 : f32
    %37 = vector.broadcast %cst_35 : f32 to vector<1x1x128xf32>
    %38 = arith.maximumf %36, %37 : vector<1x1x128xf32>
    %cst_36 = arith.constant 9.99999974E-6 : f32
    %39 = vector.broadcast %cst_36 : f32 to vector<1x1x128xf32>
    %40 = arith.addf %38, %39 : vector<1x1x128xf32>
    %41 = math.rsqrt %40 : vector<1x1x128xf32>
    %42 = vector.shape_cast %23 : vector<1x128xf32> to vector<1x1x128xf32>
    %43 = arith.mulf %42, %41 : vector<1x1x128xf32>
    %44 = arith.mulf %32, %43 : vector<1x1x128xf32>
    %45 = vector.shape_cast %24 : vector<1x128xf32> to vector<1x1x128xf32>
    %46 = arith.subf %45, %44 : vector<1x1x128xf32>
    %47 = vector.broadcast %43 : vector<1x1x128xf32> to vector<1x64x128xf32>
    %48 = arith.mulf %25, %47 : vector<1x64x128xf32>
    %49 = vector.broadcast %46 : vector<1x1x128xf32> to vector<1x64x128xf32>
    %50 = arith.addf %48, %49 : vector<1x64x128xf32>
    %cst_37 = arith.constant 2.000000e-01 : f32
    %51 = vector.broadcast %cst_37 : f32 to vector<1x64x128xf32>
    %52 = arith.mulf %51, %50 : vector<1x64x128xf32>
    %53 = arith.maximumf %50, %52 : vector<1x64x128xf32>
    %54 = arith.truncf %53 : vector<1x64x128xf32> to vector<1x64x128xbf16>
    %c0_38 = arith.constant 0 : index
    %c0_39 = arith.constant 0 : index
    %c0_40 = arith.constant 0 : index
    %55 = vector.load %arg5[%c0_38, %c0_39, %c0_40] : memref<1x64x128xbf16, #tpu.memory_space<vmem>>, vector<1x64x128xbf16>
    tpu.vector_store %arg5[%c0_38, %c0_39, %c0_40], %54 {strides = array<i32>} : memref<1x64x128xbf16, #tpu.memory_space<vmem>>, vector<1x64x128xbf16>,
    return
  }
  func.func @transform_0(%arg0: i32) -> (i32, i32, i32, i32) {
    %c0_i32 = arith.constant 0 : i32
    %c0_i32_0 = arith.constant 0 : i32
    %c0_i32_1 = arith.constant 0 : i32
    %c0_i32_2 = arith.constant 0 : i32
    return %arg0, %c0_i32, %c0_i32_0, %c0_i32_1 : i32, i32, i32, i32
  }
  func.func @transform_1(%arg0: i32) -> (i32, i32, i32) {
    %c0_i32 = arith.constant 0 : i32
    %c0_i32_0 = arith.constant 0 : i32
    %c0_i32_1 = arith.constant 0 : i32
    %c0_i32_2 = arith.constant 0 : i32
    return %c0_i32, %c0_i32_0, %c0_i32_1 : i32, i32, i32
  }
  func.func @transform_2(%arg0: i32) -> (i32, i32) {
    %c0_i32 = arith.constant 0 : i32
    %c0_i32_0 = arith.constant 0 : i32
    %c0_i32_1 = arith.constant 0 : i32
    return %c0_i32, %c0_i32_0 : i32, i32
  }
  func.func @transform_3(%arg0: i32) -> (i32, i32) {
    %c0_i32 = arith.constant 0 : i32
    %c0_i32_0 = arith.constant 0 : i32
    %c0_i32_1 = arith.constant 0 : i32
    return %c0_i32, %c0_i32_0 : i32, i32
  }
  func.func @transform_4(%arg0: i32) -> (i32, i32, i32) {
    %c0_i32 = arith.constant 0 : i32
    %c0_i32_0 = arith.constant 0 : i32
    %c0_i32_1 = arith.constant 0 : i32
    return %arg0, %c0_i32, %c0_i32_0 : i32, i32, i32
  }
}

module attributes {stable_mosaic.version = 11 : i64} {
  func.func @_block_head_kernel(%arg0: i32, %arg1: memref<1x16x2048xbf16, #tpu.memory_space<vmem>>, %arg2: memref<2048x256xbf16, #tpu.memory_space<vmem>>, %arg3: memref<1x256xf32, #tpu.memory_space<vmem>>, %arg4: memref<1x256xf32, #tpu.memory_space<vmem>>, %arg5: memref<16x256xf32, #tpu.memory_space<vmem>>, %arg6: memref<1x1xf32, #tpu.memory_space<vmem>>, %arg7: memref<1x1x1xf32, #tpu.memory_space<vmem>>) attributes {dimension_semantics = [#tpu.dimension_semantics<parallel>], iteration_bounds = array<i64: 2>, scalar_prefetch = 0 : i64, scratch_operands = 0 : i64, tpu.core_type = #tpu.core_type<tc>, window_params = [{transform_indices = @transform_0, window_bounds = array<i64: 1, 16, 2048>}, {pipeline_mode = #tpu.pipeline_mode<synchronous>, transform_indices = @transform_1, window_bounds = array<i64: 2048, 256>}, {pipeline_mode = #tpu.pipeline_mode<synchronous>, transform_indices = @transform_2, window_bounds = array<i64: 1, 256>}, {pipeline_mode = #tpu.pipeline_mode<synchronous>, transform_indices = @transform_3, window_bounds = array<i64: 1, 256>}, {pipeline_mode = #tpu.pipeline_mode<synchronous>, transform_indices = @transform_4, window_bounds = array<i64: 16, 256>}, {pipeline_mode = #tpu.pipeline_mode<synchronous>, transform_indices = @transform_5, window_bounds = array<i64: 1, 1>}, {transform_indices = @transform_6, window_bounds = array<i64: 1, 1, 1>}]} {
    %c0 = arith.constant 0 : index
    %c0_0 = arith.constant 0 : index
    %c0_1 = arith.constant 0 : index
    %0 = vector.load %arg1[%c0, %c0_0, %c0_1] : memref<1x16x2048xbf16, #tpu.memory_space<vmem>>, vector<1x16x2048xbf16>
    %1 = vector.shape_cast %0 : vector<1x16x2048xbf16> to vector<16x2048xbf16>
    %c0_2 = arith.constant 0 : index
    %c0_3 = arith.constant 0 : index
    %2 = vector.load %arg2[%c0_2, %c0_3] : memref<2048x256xbf16, #tpu.memory_space<vmem>>, vector<2048x256xbf16>
    %cst = arith.constant dense<0.000000e+00> : vector<16x256xf32>
    %3 = tpu.matmul %1, %2, %cst {dimension_numbers = #tpu.dot_dimension_numbers<[1], [0], [0], [1], [0, 0, 1, 1], [], []>} : vector<16x2048xbf16>, vector<2048x256xbf16>, vector<16x256xf32> -> vector<16x256xf32>
    %c0_4 = arith.constant 0 : index
    %c0_5 = arith.constant 0 : index
    %4 = vector.load %arg3[%c0_4, %c0_5] : memref<1x256xf32, #tpu.memory_space<vmem>>, vector<1x256xf32>
    %c0_6 = arith.constant 0 : index
    %c0_7 = arith.constant 0 : index
    %5 = vector.load %arg4[%c0_6, %c0_7] : memref<1x256xf32, #tpu.memory_space<vmem>>, vector<1x256xf32>
    %6 = vector.shape_cast %3 : vector<16x256xf32> to vector<1x16x256xf32>
    %cst_8 = arith.constant dense<0.000000e+00> : vector<1x256xf32>
    %7 = vector.multi_reduction <add>, %6, %cst_8 [1] : vector<1x16x256xf32> to vector<1x256xf32>
    %8 = vector.shape_cast %7 : vector<1x256xf32> to vector<1x1x256xf32>
    %9 = arith.mulf %6, %6 : vector<1x16x256xf32>
    %cst_9 = arith.constant dense<0.000000e+00> : vector<1x256xf32>
    %10 = vector.multi_reduction <add>, %9, %cst_9 [1] : vector<1x16x256xf32> to vector<1x256xf32>
    %11 = vector.shape_cast %10 : vector<1x256xf32> to vector<1x1x256xf32>
    %cst_10 = arith.constant 6.250000e-02 : f32
    %12 = vector.broadcast %cst_10 : f32 to vector<1x1x256xf32>
    %13 = arith.mulf %8, %12 : vector<1x1x256xf32>
    %cst_11 = arith.constant 6.250000e-02 : f32
    %14 = vector.broadcast %cst_11 : f32 to vector<1x1x256xf32>
    %15 = arith.mulf %11, %14 : vector<1x1x256xf32>
    %16 = arith.mulf %13, %13 : vector<1x1x256xf32>
    %17 = arith.subf %15, %16 : vector<1x1x256xf32>
    %cst_12 = arith.constant 0.000000e+00 : f32
    %18 = vector.broadcast %cst_12 : f32 to vector<1x1x256xf32>
    %19 = arith.maximumf %17, %18 : vector<1x1x256xf32>
    %cst_13 = arith.constant 9.99999974E-6 : f32
    %20 = vector.broadcast %cst_13 : f32 to vector<1x1x256xf32>
    %21 = arith.addf %19, %20 : vector<1x1x256xf32>
    %22 = math.rsqrt %21 : vector<1x1x256xf32>
    %23 = vector.shape_cast %4 : vector<1x256xf32> to vector<1x1x256xf32>
    %24 = arith.mulf %23, %22 : vector<1x1x256xf32>
    %25 = arith.mulf %13, %24 : vector<1x1x256xf32>
    %26 = vector.shape_cast %5 : vector<1x256xf32> to vector<1x1x256xf32>
    %27 = arith.subf %26, %25 : vector<1x1x256xf32>
    %28 = vector.broadcast %24 : vector<1x1x256xf32> to vector<1x16x256xf32>
    %29 = arith.mulf %6, %28 : vector<1x16x256xf32>
    %30 = vector.broadcast %27 : vector<1x1x256xf32> to vector<1x16x256xf32>
    %31 = arith.addf %29, %30 : vector<1x16x256xf32>
    %cst_14 = arith.constant 2.000000e-01 : f32
    %32 = vector.broadcast %cst_14 : f32 to vector<1x16x256xf32>
    %33 = arith.mulf %32, %31 : vector<1x16x256xf32>
    %34 = arith.maximumf %31, %33 : vector<1x16x256xf32>
    %c0_15 = arith.constant 0 : index
    %c0_16 = arith.constant 0 : index
    %35 = vector.load %arg5[%c0_15, %c0_16] : memref<16x256xf32, #tpu.memory_space<vmem>>, vector<16x256xf32>
    %36 = vector.shape_cast %35 : vector<16x256xf32> to vector<1x16x256xf32>
    %37 = arith.mulf %34, %36 : vector<1x16x256xf32>
    %cst_17 = arith.constant dense<0.000000e+00> : vector<1xf32>
    %38 = vector.multi_reduction <add>, %37, %cst_17 [1, 2] : vector<1x16x256xf32> to vector<1xf32>
    %39 = vector.shape_cast %38 : vector<1xf32> to vector<1x1x1xf32>
    %c0_18 = arith.constant 0 : index
    %c0_19 = arith.constant 0 : index
    %40 = vector.load %arg6[%c0_18, %c0_19] : memref<1x1xf32, #tpu.memory_space<vmem>>, vector<1x1xf32>
    %41 = vector.shape_cast %40 : vector<1x1xf32> to vector<1x1x1xf32>
    %42 = arith.addf %39, %41 : vector<1x1x1xf32>
    %c0_20 = arith.constant 0 : index
    %c0_21 = arith.constant 0 : index
    %c0_22 = arith.constant 0 : index
    %43 = vector.load %arg7[%c0_20, %c0_21, %c0_22] : memref<1x1x1xf32, #tpu.memory_space<vmem>>, vector<1x1x1xf32>
    tpu.vector_store %arg7[%c0_20, %c0_21, %c0_22], %42 {strides = array<i32>} : memref<1x1x1xf32, #tpu.memory_space<vmem>>, vector<1x1x1xf32>,
    return
  }
  func.func @transform_0(%arg0: i32) -> (i32, i32, i32) {
    %c0_i32 = arith.constant 0 : i32
    %c0_i32_0 = arith.constant 0 : i32
    %c0_i32_1 = arith.constant 0 : i32
    return %arg0, %c0_i32, %c0_i32_0 : i32, i32, i32
  }
  func.func @transform_1(%arg0: i32) -> (i32, i32) {
    %c0_i32 = arith.constant 0 : i32
    %c0_i32_0 = arith.constant 0 : i32
    %c0_i32_1 = arith.constant 0 : i32
    return %c0_i32, %c0_i32_0 : i32, i32
  }
  func.func @transform_2(%arg0: i32) -> (i32, i32) {
    %c0_i32 = arith.constant 0 : i32
    %c0_i32_0 = arith.constant 0 : i32
    %c0_i32_1 = arith.constant 0 : i32
    return %c0_i32, %c0_i32_0 : i32, i32
  }
  func.func @transform_3(%arg0: i32) -> (i32, i32) {
    %c0_i32 = arith.constant 0 : i32
    %c0_i32_0 = arith.constant 0 : i32
    %c0_i32_1 = arith.constant 0 : i32
    return %c0_i32, %c0_i32_0 : i32, i32
  }
  func.func @transform_4(%arg0: i32) -> (i32, i32) {
    %c0_i32 = arith.constant 0 : i32
    %c0_i32_0 = arith.constant 0 : i32
    %c0_i32_1 = arith.constant 0 : i32
    return %c0_i32, %c0_i32_0 : i32, i32
  }
  func.func @transform_5(%arg0: i32) -> (i32, i32) {
    %c0_i32 = arith.constant 0 : i32
    %c0_i32_0 = arith.constant 0 : i32
    %c0_i32_1 = arith.constant 0 : i32
    return %c0_i32, %c0_i32_0 : i32, i32
  }
  func.func @transform_6(%arg0: i32) -> (i32, i32, i32) {
    %c0_i32 = arith.constant 0 : i32
    %c0_i32_0 = arith.constant 0 : i32
    %c0_i32_1 = arith.constant 0 : i32
    return %arg0, %c0_i32, %c0_i32_0 : i32, i32, i32
  }
}

</mosaic_0001>

<bundles_post_ra>
// kernel: cnn_dis_forward.3
= control target key start
LH: loop header
LB: loop body
LE: loop exit
PB: predicated region body
PF: predicated region fallthrough
CT: control target
= control target key end

     0   :  { %s3503_s15 = smov 0   ;;  %s4518_s0 = inlined_call_operand.vmem [shape: bf16[2,17,17,16], index: 0, kind: input, shape index: {}]   ;;  %s4519_s1 = inlined_call_operand.vmem [shape: bf16[4,16,64], index: 1, kind: input, shape index: {}]   ;;  %s4520_s2 = inlined_call_operand.vmem [shape: f32[1,64], index: 2, kind: input, shape index: {}]   ;;  %s4521_s3 = inlined_call_operand.vmem [shape: f32[1,64], index: 3, kind: input, shape index: {}]   ;;  %s4522_s4 = inlined_call_operand.vmem [shape: bf16[2,256,64], index: 4, kind: output, shape index: {}]  }
   0x1 LB: > { %s2830_s16 = sadd.s32 4294967295, %s3476_s15   ;;  %p2834_p0 = scmp.ge.s32.totalorder %s3476_s15, 1  ;;  %s3476_s15 = sphi %s3503_s15, %s14_s15  }
   0x2   : > { %p162_p1 = scmp.lt.s32.totalorder %s3476_s15, 3 }
   0x4   : > { %p163_p2 = pnand %p2834_p0, %p162_p1 }
   0x6   : > { %166 = sbr.rel (%p163_p2) target bundleno = 482 (0x1e2), region = 36 }
   0xd   : > { %v3432_v0 = vld [vmem:[%s4519_s1 + $0x10] sm:$0xff]   ;;  %p188_p3 = scmp.lt.s32.totalorder %s2830_s16, 1  ;;  %v3435_v1 = vld [vmem:[%s4519_s1 + $0x8] sm:$0xff]   ;;  %v3522_v2 = vld [vmem:[%s4519_s1] sm:$0xff]   ;;  %vm693_vm0 = vcmask 130048   ;;  %vm2293_vm4 = vcmask 523264  }
   0xe   : > { %3259 = vmatprep.subr.bf16.mxu0 %v3432_v0  ;;  %3191 = vmatprep.subr.bf16.mxu1 %v3435_v1  ;;  %v3439_v3 = vld [vmem:[%s4519_s1 + $0x18] sm:$0xff]   ;;  %vm249_vm1 = vsmask.f32 3328  ;;  %vm250_vm2 = vsmask.f32 7440  ;;  %vm2742_vm5 = vcmask 519168  }
   0xf   : > { %s4530_s16 = smov (!%p188_p3, %s2830_s16), 1  ;;  %3260 = vmatpush3.bf16.msra.mxu0 %v3432_v0  ;;  %3192 = vmatpush3.bf16.msra.mxu1 %v3435_v1  ;;  %vm3567_vm3 = vmor %vm249_vm1, %vm250_vm2 }
  0x10   : > { %s3423_s23 = smul.u32 204, %s4530_s16  ;;  %3225 = vmatprep.subr.bf16.mxu1 %v3522_v2  ;;  %3293 = vmatprep.subr.bf16.mxu0 %v3439_v3  ;;  %s3090_s7 = sshll.u32 %s4530_s16, 7 }
  0x11   : > { %s4395_s10 = scalar_lea.vmem %s4522_s4, %s3090_s7 }
  0x12   : > { %s3532_s28 = scalar_lea.vmem %s4518_s0, %s3423_s23 }
  0x13   : > { %v3433_v4 = vld [vmem:[%s3532_s28 + $0xc] sm:$0xff]   ;;  %v3434_v5 = vld [vmem:[%s3532_s28 + $0x18] sm:$0xff]   ;;  %v3436_v6 = vld [vmem:[%s3532_s28 + $0x24] sm:$0xff]  }
  0x14   : > { %3261 = vmatprep.mubr.msk.bf16.mxu0 %vm693_vm0, %v3433_v4  ;;  %v3540_v7 = vld [vmem:[%s3532_s28] sm:$0xf]  ;;  %v3543_v8 = vld [vmem:[%s3532_s28 + $0x4] sm:$0xf]  ;;  %v233_v9 = vld [vmem:[%s3532_s28 + $0x8] sm:$0x1] }
  0x15   : > { %3262 = vmatmul.mubr.msk.bf16.vlgmr.msra.gmra.mrb[0].mxu0 %vm693_vm0, %v3434_v5  ;;  %v253_v10 = vshrl.u32 %v3540_v7, 16  ;;  %v256_v11 = vshll.u32 %v3540_v7, 16  ;;  %v262_v12 = vshll.u32 %v3543_v8, 16  ;;  %v266_v13 = vshrl.u32 %v3543_v8, 16  ;;  %v3438_v15 = vld [vmem:[%s3532_s28 + $0x30] sm:$0xff]   ;;  %v3440_v36 = vld [vmem:[%s3532_s28 + $0x3c] sm:$0xff]  }
  0x16   : > { %3265 = vmatprep.mubr.msk.bf16.mxu0 %vm693_vm0, %v3436_v6  ;;  %3294 = vmatpush3.bf16.msra.mxu0 %v3439_v3  ;;  %v272_v14 = vshll.u32 %v233_v9, 16  ;;  %v3553_v16 = vld [vmem:[%s3532_s28 + $0xc] sm:$0xf]  ;;  %v2873_v17 = vcombine.low %v3540_v7, %v3543_v8  ;;  %v3558_v22 = vld [vmem:[%s3532_s28 + $0x10] sm:$0xf]  ;;  %v3442_v0 = vld [vmem:[%s3532_s28 + $0x54] sm:$0xff]  }
  0x17   : > { %v255_v18 = vrot.slane %v253_v10, 4  ;;  %v258_v19 = vrot.slane %v256_v11, 5  ;;  %v264_v20 = vrot.slane %v262_v12, 5  ;;  %v268_v21 = vrot.slane %v266_v13, 4  ;;  %v234_v24 = vld [vmem:[%s3532_s28 + $0x14] sm:$0x1] }
  0x18   : > { %v274_v23 = vrot.slane %v272_v14, 5  ;;  %v277_v25 = vshrl.u32 %v3553_v16, 16  ;;  %v280_v26 = vshll.u32 %v3553_v16, 16  ;;  %v286_v27 = vshll.u32 %v3558_v22, 16  ;;  %v3573_v37 = vld [vmem:[%s3532_s28 + $0x18] sm:$0xf] }
  0x19   : > { %v259_v28 = vor.u32 %v258_v19, %v255_v18  ;;  %v269_v29 = vor.u32 %v268_v21, %v264_v20  ;;  %v290_v30 = vshrl.u32 %v3558_v22, 16  ;;  %v296_v31 = vshll.u32 %v234_v24, 16  ;;  %v3578_v43 = vld [vmem:[%s3532_s28 + $0x1c] sm:$0xf]  ;;  %v235_v45 = vld [vmem:[%s3532_s28 + $0x20] sm:$0x1] }
  0x1a   : > { %v279_v33 = vrot.slane %v277_v25, 4  ;;  %v282_v34 = vrot.slane %v280_v26, 5  ;;  %v288_v35 = vrot.slane %v286_v27, 5  ;;  %v2874_v38 = vcombine.low %v3553_v16, %v3558_v22  ;;  %v3441_v57 = vld [vmem:[%s3532_s28 + $0x48] sm:$0xff]   ;;  %v3593_v58 = vld [vmem:[%s3532_s28 + $0x24] sm:$0xf] }
  0x1b   : > { %v260_v39 = vrot.slane %v259_v28, 4  ;;  %v270_v40 = vrot.slane %v269_v29, 4  ;;  %v292_v41 = vrot.slane %v290_v30, 4  ;;  %v298_v42 = vrot.slane %v296_v31, 5  ;;  %v3596_v63 = vld [vmem:[%s3532_s28 + $0x28] sm:$0xf] }
  0x1c   : > { %v283_v44 = vor.u32 %v282_v34, %v279_v33  ;;  %v301_v46 = vshrl.u32 %v3573_v37, 16  ;;  %v304_v47 = vshll.u32 %v3573_v37, 16  ;;  %v310_v48 = vshll.u32 %v3578_v43, 16  ;;  %v236_v4 = vld [vmem:[%s3532_s28 + $0x2c] sm:$0x1] }
  0x1d   : > { %3266 = vmatmul.mubr.msk.bf16.gmra.mrb[4].mxu0 %vm693_vm0, %v3438_v15  ;;  %v265_v49 = vsel %vm3567_vm3, %v260_v39, %v264_v20  ;;  %v275_v50 = vsel %vm3567_vm3, %v270_v40, %v274_v23  ;;  %v293_v51 = vor.u32 %v292_v41, %v288_v35  ;;  %v314_v52 = vshrl.u32 %v3578_v43, 16  ;;  %v3609_v13 = vld [vmem:[%s3532_s28 + $0x30] sm:$0xf]  ;;  %v3612_v20 = vld [vmem:[%s3532_s28 + $0x34] sm:$0xf] }
  0x1e   : > { %3269 = vmatprep.mubr.msk.bf16.mxu0 %vm693_vm0, %v3440_v36  ;;  %v2840_v53 = vcombine.low %v265_v49, %v275_v50  ;;  %v284_v54 = vrot.slane %v283_v44, 4  ;;  %v303_v55 = vrot.slane %v301_v46, 4  ;;  %v306_v56 = vrot.slane %v304_v47, 5  ;;  %v237_v26 = vld [vmem:[%s3532_s28 + $0x38] sm:$0x1] }
  0x1f   : > { %v294_v59 = vrot.slane %v293_v51, 4  ;;  %v312_v60 = vrot.slane %v310_v48, 5  ;;  %v316_v61 = vrot.slane %v314_v52, 4  ;;  %v320_v62 = vshll.u32 %v235_v45, 16  ;;  %v3628_v36 = vld [vmem:[%s3532_s28 + $0x3c] sm:$0xf] }
  0x20   : > { %3193 = vmatprep.mubr.msk.bf16.mxu1 %vm693_vm0, %v2840_v53  ;;  %v289_v1 = vsel %vm3567_vm3, %v284_v54, %v288_v35  ;;  %v307_v3 = vor.u32 %v306_v56, %v303_v55  ;;  %v325_v5 = vshrl.u32 %v3593_v58, 16  ;;  %v328_v6 = vshll.u32 %v3593_v58, 16  ;;  %v3631_v44 = vld [vmem:[%s3532_s28 + $0x40] sm:$0xf]  ;;  %v238_v49 = vld [vmem:[%s3532_s28 + $0x44] sm:$0x1] }
  0x21   : > { %v299_v9 = vsel %vm3567_vm3, %v294_v59, %v298_v42  ;;  %v317_v10 = vor.u32 %v316_v61, %v312_v60  ;;  %v322_v11 = vrot.slane %v320_v62, 5  ;;  %v334_v12 = vshll.u32 %v3596_v63, 16  ;;  %v3443_v48 = vld [vmem:[%s3532_s28 + $0x60] sm:$0xff]   ;;  %v3444_v59 = vld [vmem:[%s3532_s28 + $0x6c] sm:$0xff]  }
  0x22   : > { %v2841_v14 = vcombine.low %v289_v1, %v299_v9  ;;  %v308_v15 = vrot.slane %v307_v3, 4  ;;  %v327_v18 = vrot.slane %v325_v5, 4  ;;  %v330_v19 = vrot.slane %v328_v6, 5  ;;  %v3645_v1 = vld [vmem:[%s3532_s28 + $0x48] sm:$0xf] }
  0x23   : > { %v318_v21 = vrot.slane %v317_v10, 4  ;;  %v336_v23 = vrot.slane %v334_v12, 5  ;;  %v338_v24 = vshrl.u32 %v3596_v63, 16  ;;  %v344_v25 = vshll.u32 %v236_v4, 16  ;;  %v3650_v9 = vld [vmem:[%s3532_s28 + $0x4c] sm:$0xf] }
  0x24   : > { %3194 = vmatmul.mubr.msk.bf16.vlgmr.msra.gmra.mrb[0].mxu1 %vm693_vm0, %v2841_v14  ;;  %v313_v27 = vsel %vm3567_vm3, %v308_v15, %v312_v60  ;;  %v331_v28 = vor.u32 %v330_v19, %v327_v18  ;;  %v349_v29 = vshrl.u32 %v3609_v13, 16  ;;  %v352_v30 = vshll.u32 %v3609_v13, 16  ;;  %v239_v15 = vld [vmem:[%s3532_s28 + $0x50] sm:$0x1] }
  0x25   : > { %3270 = vmatmul.mubr.msk.bf16.gmra.mrb[8].mxu0 %vm693_vm0, %v3441_v57  ;;  %3226 = vmatpush3.bf16.msra.mxu1 %v3522_v2  ;;  %v323_v31 = vsel %vm3567_vm3, %v318_v21, %v322_v11  ;;  %v340_v33 = vrot.slane %v338_v24, 4  ;;  %v346_v34 = vrot.slane %v344_v25, 5  ;;  %v358_v35 = vshll.u32 %v3612_v20, 16  ;;  %v3660_v24 = vld [vmem:[%s3532_s28 + $0x54] sm:$0xf] }
  0x26   : > { %3273 = vmatprep.mubr.msk.bf16.mxu0 %vm693_vm0, %v3442_v0  ;;  %v2842_v39 = vcombine.low %v313_v27, %v323_v31  ;;  %v332_v40 = vrot.slane %v331_v28, 4  ;;  %v351_v41 = vrot.slane %v349_v29, 4  ;;  %v354_v42 = vrot.slane %v352_v30, 5  ;;  %v3666_v29 = vld [vmem:[%s3532_s28 + $0x58] sm:$0xf] }
  0x27   : > { %v341_v2 = vor.u32 %v340_v33, %v336_v23  ;;  %v360_v45 = vrot.slane %v358_v35, 5  ;;  %v362_v46 = vshrl.u32 %v3612_v20, 16  ;;  %v368_v47 = vshll.u32 %v237_v26, 16  ;;  %v3445_v35 = vld [vmem:[%s3532_s28 + $0x78] sm:$0xff]  }
  0x28   : > { %3197 = vmatprep.mubr.msk.bf16.mxu1 %vm693_vm0, %v2842_v39  ;;  %v337_v50 = vsel %vm3567_vm3, %v332_v40, %v336_v23  ;;  %v355_v51 = vor.u32 %v354_v42, %v351_v41  ;;  %v373_v52 = vshrl.u32 %v3628_v36, 16  ;;  %v376_v53 = vshll.u32 %v3628_v36, 16 }
  0x29   : > { %v342_v54 = vrot.slane %v341_v2, 4  ;;  %v364_v55 = vrot.slane %v362_v46, 4  ;;  %v370_v56 = vrot.slane %v368_v47, 5  ;;  %v382_v57 = vshll.u32 %v3631_v44, 16  ;;  %v240_v2 = vld [vmem:[%s3532_s28 + $0x5c] sm:$0x1] }
  0x2a   : > { %v356_v60 = vrot.slane %v355_v51, 4  ;;  %v375_v61 = vrot.slane %v373_v52, 4  ;;  %v378_v62 = vrot.slane %v376_v53, 5  ;;  %v386_v0 = vshrl.u32 %v3631_v44, 16 }
  0x2b   : > { %v347_v3 = vsel %vm3567_vm3, %v342_v54, %v346_v34  ;;  %v365_v4 = vor.u32 %v364_v55, %v360_v45  ;;  %v384_v5 = vrot.slane %v382_v57, 5  ;;  %v392_v6 = vshll.u32 %v238_v49, 16  ;;  %v3446_v49 = vld [vmem:[%s3532_s28 + $0x84] sm:$0xff]  }
  0x2c   : > { %v2843_v10 = vcombine.low %v337_v50, %v347_v3  ;;  %v361_v11 = vsel %vm3567_vm3, %v356_v60, %v360_v45  ;;  %v379_v12 = vor.u32 %v378_v62, %v375_v61  ;;  %v388_v14 = vrot.slane %v386_v0, 4  ;;  %v3677_v50 = vld [vmem:[%s3532_s28 + $0x60] sm:$0xf]  ;;  %v3686_v55 = vld [vmem:[%s3532_s28 + $0x64] sm:$0xf] }
  0x2d   : > { %3274 = vmatmul.mubr.msk.bf16.gmra.mrb[12].mxu0 %vm693_vm0, %v3443_v48  ;;  %v366_v18 = vrot.slane %v365_v4, 4  ;;  %v394_v19 = vrot.slane %v392_v6, 5  ;;  %v397_v21 = vshrl.u32 %v3645_v1, 16  ;;  %v400_v23 = vshll.u32 %v3645_v1, 16  ;;  %v241_v4 = vld [vmem:[%s3532_s28 + $0x68] sm:$0x1] }
  0x2e   : > { %3277 = vmatprep.mubr.msk.bf16.mxu0 %vm693_vm0, %v3444_v59  ;;  %3198 = vmatmul.mubr.msk.bf16.gmra.mrb[4].mxu1 %vm693_vm0, %v2843_v10  ;;  %v380_v25 = vrot.slane %v379_v12, 4  ;;  %v389_v26 = vor.u32 %v388_v14, %v384_v5  ;;  %v406_v27 = vshll.u32 %v3650_v9, 16  ;;  %v410_v28 = vshrl.u32 %v3650_v9, 16  ;;  %v3696_v12 = vld [vmem:[%s3532_s28 + $0x6c] sm:$0xf] }
  0x2f   : > { %v371_v30 = vsel %vm3567_vm3, %v366_v18, %v370_v56  ;;  %v399_v31 = vrot.slane %v397_v21, 4  ;;  %v402_v33 = vrot.slane %v400_v23, 5  ;;  %v416_v34 = vshll.u32 %v239_v15, 16  ;;  %v3701_v21 = vld [vmem:[%s3532_s28 + $0x70] sm:$0xf] }
  0x30   : > { %v2844_v39 = vcombine.low %v361_v11, %v371_v30  ;;  %v385_v40 = vsel %vm3567_vm3, %v380_v25, %v384_v5  ;;  %v390_v41 = vrot.slane %v389_v26, 4  ;;  %v408_v42 = vrot.slane %v406_v27, 5 }
  0x31   : > { %v403_v45 = vor.u32 %v402_v33, %v399_v31  ;;  %v412_v46 = vrot.slane %v410_v28, 4  ;;  %v418_v47 = vrot.slane %v416_v34, 5  ;;  %v421_v48 = vshrl.u32 %v3660_v24, 16  ;;  %v3447_v34 = vld [vmem:[%s3532_s28 + $0x90] sm:$0xff]  }
  0x32   : > { %3201 = vmatprep.mubr.msk.bf16.mxu1 %vm693_vm0, %v2844_v39  ;;  %v395_v51 = vsel %vm3567_vm3, %v390_v41, %v394_v19  ;;  %v424_v52 = vshll.u32 %v3660_v24, 16  ;;  %v430_v53 = vshll.u32 %v3666_v29, 16  ;;  %v434_v54 = vshrl.u32 %v3666_v29, 16  ;;  %v242_v41 = vld [vmem:[%s3532_s28 + $0x74] sm:$0x1] }
  0x33   : > { %v2845_v56 = vcombine.low %v385_v40, %v395_v51  ;;  %v404_v57 = vrot.slane %v403_v45, 4  ;;  %v413_v59 = vor.u32 %v412_v46, %v408_v42  ;;  %v423_v60 = vrot.slane %v421_v48, 4 }
  0x34   : > { %v426_v61 = vrot.slane %v424_v52, 5  ;;  %v432_v62 = vrot.slane %v430_v53, 5  ;;  %v436_v0 = vrot.slane %v434_v54, 4  ;;  %v440_v3 = vshll.u32 %v240_v2, 16  ;;  %v3448_v2 = vld [vmem:[%s3532_s28 + $0x9c] sm:$0xff]  }
  0x35   : > { %3278 = vmatmul.mubr.msk.bf16.gmra.mrb[16].mxu0 %vm693_vm0, %v3445_v35  ;;  %v409_v5 = vsel %vm3567_vm3, %v404_v57, %v408_v42  ;;  %v414_v6 = vrot.slane %v413_v59, 4  ;;  %v445_v10 = vshrl.u32 %v3677_v50, 16  ;;  %v448_v11 = vshll.u32 %v3677_v50, 16 }
  0x36   : > { %3281 = vmatprep.mubr.msk.bf16.mxu0 %vm693_vm0, %v3446_v49  ;;  %3202 = vmatmul.mubr.msk.bf16.gmra.mrb[8].mxu1 %vm693_vm0, %v2845_v56  ;;  %v427_v14 = vor.u32 %v426_v61, %v423_v60  ;;  %v437_v15 = vor.u32 %v436_v0, %v432_v62  ;;  %v442_v18 = vrot.slane %v440_v3, 5  ;;  %v454_v19 = vshll.u32 %v3686_v55, 16  ;;  %v3718_v49 = vld [vmem:[%s3532_s28 + $0x78] sm:$0xf]  ;;  %v3721_v56 = vld [vmem:[%s3532_s28 + $0x7c] sm:$0xf] }
  0x37   : > { %v419_v23 = vsel %vm3567_vm3, %v414_v6, %v418_v47  ;;  %v447_v25 = vrot.slane %v445_v10, 4  ;;  %v450_v26 = vrot.slane %v448_v11, 5  ;;  %v458_v27 = vshrl.u32 %v3686_v55, 16  ;;  %v3731_v6 = vld [vmem:[%s3532_s28 + $0x84] sm:$0xf] }
  0x38   : > { %v2846_v28 = vcombine.low %v409_v5, %v419_v23  ;;  %v428_v30 = vrot.slane %v427_v14, 4  ;;  %v438_v31 = vrot.slane %v437_v15, 4  ;;  %v456_v33 = vrot.slane %v454_v19, 5 }
  0x39   : > { %v451_v35 = vor.u32 %v450_v26, %v447_v25  ;;  %v460_v39 = vrot.slane %v458_v27, 4  ;;  %v464_v40 = vshll.u32 %v241_v4, 16  ;;  %v469_v42 = vshrl.u32 %v3696_v12, 16 }
  0x3a   : > { %3205 = vmatprep.mubr.msk.bf16.mxu1 %vm693_vm0, %v2846_v28  ;;  %v433_v45 = vsel %vm3567_vm3, %v428_v30, %v432_v62  ;;  %v443_v46 = vsel %vm3567_vm3, %v438_v31, %v442_v18  ;;  %v472_v47 = vshll.u32 %v3696_v12, 16  ;;  %v478_v48 = vshll.u32 %v3701_v21, 16  ;;  %v243_v62 = vld [vmem:[%s3532_s28 + $0x80] sm:$0x1]  ;;  %v3449_v31 = vld [vmem:[%s3532_s28 + $0xa8] sm:$0xff]  }
  0x3b   : > { %v2847_v51 = vcombine.low %v433_v45, %v443_v46  ;;  %v452_v52 = vrot.slane %v451_v35, 4  ;;  %v461_v53 = vor.u32 %v460_v39, %v456_v33  ;;  %v466_v54 = vrot.slane %v464_v40, 5 }
  0x3c   : > { %v471_v57 = vrot.slane %v469_v42, 4  ;;  %v474_v59 = vrot.slane %v472_v47, 5  ;;  %v480_v60 = vrot.slane %v478_v48, 5  ;;  %v482_v61 = vshrl.u32 %v3701_v21, 16 }
  0x3d   : > { %3282 = vmatmul.mubr.msk.bf16.gmra.mrb[20].mxu0 %vm693_vm0, %v3447_v34  ;;  %v457_v0 = vsel %vm3567_vm3, %v452_v52, %v456_v33  ;;  %v462_v3 = vrot.slane %v461_v53, 4  ;;  %v488_v4 = vshll.u32 %v242_v41, 16  ;;  %v493_v5 = vshrl.u32 %v3718_v49, 16  ;;  %v3741_v33 = vld [vmem:[%s3532_s28 + $0x88] sm:$0xf]  ;;  %v3450_v34 = vld [vmem:[%s3532_s28 + $0xb4] sm:$0xff]  }
  0x3e   : > { %3285 = vmatprep.mubr.msk.bf16.mxu0 %vm693_vm0, %v3448_v2  ;;  %3206 = vmatmul.mubr.msk.bf16.gmra.mrb[12].mxu1 %vm693_vm0, %v2847_v51  ;;  %v475_v10 = vor.u32 %v474_v59, %v471_v57  ;;  %v484_v11 = vrot.slane %v482_v61, 4  ;;  %v496_v14 = vshll.u32 %v3718_v49, 16  ;;  %v502_v15 = vshll.u32 %v3721_v56, 16  ;;  %v244_v41 = vld [vmem:[%s3532_s28 + $0x8c] sm:$0x1] }
  0x3f   : > { %v467_v18 = vsel %vm3567_vm3, %v462_v3, %v466_v54  ;;  %v490_v19 = vrot.slane %v488_v4, 5  ;;  %v495_v23 = vrot.slane %v493_v5, 4  ;;  %v506_v25 = vshrl.u32 %v3721_v56, 16  ;;  %v3752_v54 = vld [vmem:[%s3532_s28 + $0x90] sm:$0xf] }
  0x40   : > { %v2848_v26 = vcombine.low %v457_v0, %v467_v18  ;;  %v476_v27 = vrot.slane %v475_v10, 4  ;;  %v485_v28 = vor.u32 %v484_v11, %v480_v60  ;;  %v498_v30 = vrot.slane %v496_v14, 5 }
  0x41   : > { %v504_v35 = vrot.slane %v502_v15, 5  ;;  %v508_v39 = vrot.slane %v506_v25, 4  ;;  %v512_v40 = vshll.u32 %v243_v62, 16  ;;  %v517_v42 = vshrl.u32 %v3731_v6, 16  ;;  %v3759_v62 = vld [vmem:[%s3532_s28 + $0x94] sm:$0xf] }
  0x42   : > { %3209 = vmatprep.mubr.msk.bf16.mxu1 %vm693_vm0, %v2848_v26  ;;  %v481_v2 = vsel %vm3567_vm3, %v476_v27, %v480_v60  ;;  %v486_v45 = vrot.slane %v485_v28, 4  ;;  %v499_v46 = vor.u32 %v498_v30, %v495_v23  ;;  %v520_v47 = vshll.u32 %v3731_v6, 16  ;;  %v245_v15 = vld [vmem:[%s3532_s28 + $0x98] sm:$0x1]  ;;  %v3772_v27 = vld [vmem:[%s3532_s28 + $0x9c] sm:$0xf] }
  0x43   : > { %v509_v48 = vor.u32 %v508_v39, %v504_v35  ;;  %v514_v51 = vrot.slane %v512_v40, 5  ;;  %v519_v52 = vrot.slane %v517_v42, 4  ;;  %v526_v53 = vshll.u32 %v3741_v33, 16  ;;  %v3776_v39 = vld [vmem:[%s3532_s28 + $0xa0] sm:$0xf] }
  0x44   : > { %v491_v57 = vsel %vm3567_vm3, %v486_v45, %v490_v19  ;;  %v500_v59 = vrot.slane %v499_v46, 4  ;;  %v522_v61 = vrot.slane %v520_v47, 5  ;;  %v530_v60 = vshrl.u32 %v3741_v33, 16  ;;  %v246_v47 = vld [vmem:[%s3532_s28 + $0xa4] sm:$0x1] }
  0x45   : > { %3286 = vmatmul.mubr.msk.bf16.gmra.mrb[24].mxu0 %vm693_vm0, %v3449_v31  ;;  %v2849_v0 = vcombine.low %v481_v2, %v491_v57  ;;  %v510_v3 = vrot.slane %v509_v48, 4  ;;  %v528_v4 = vrot.slane %v526_v53, 5  ;;  %v536_v5 = vshll.u32 %v244_v41, 16 }
  0x46   : > { %3289 = vmatprep.mubr.msk.bf16.mxu0 %vm693_vm0, %v3450_v34  ;;  %v505_v10 = vsel %vm3567_vm3, %v500_v59, %v504_v35  ;;  %v523_v11 = vor.u32 %v522_v61, %v519_v52  ;;  %v532_v14 = vrot.slane %v530_v60, 4  ;;  %v541_v18 = vshrl.u32 %v3752_v54, 16  ;;  %v3451_v35 = vld [vmem:[%s3532_s28 + $0xc0] sm:$0xff]   ;;  %v2973_v61 = vld [vmem:[%s3532_s28 + $0xc] sm:$0xf] }
  0x47   : > { %3210 = vmatmul.mubr.msk.bf16.gmra.mrb[16].mxu1 %vm693_vm0, %v2849_v0  ;;  %v515_v19 = vsel %vm3567_vm3, %v510_v3, %v514_v51  ;;  %v538_v23 = vrot.slane %v536_v5, 5  ;;  %v544_v25 = vshll.u32 %v3752_v54, 16  ;;  %v550_v26 = vshll.u32 %v3759_v62, 16  ;;  %v2974_v5 = vld [vmem:[%s3532_s28 + $0x10] sm:$0xf] }
  0x48   : > { %v2850_v28 = vcombine.low %v505_v10, %v515_v19  ;;  %v524_v30 = vrot.slane %v523_v11, 4  ;;  %v533_v31 = vor.u32 %v532_v14, %v528_v4  ;;  %v543_v34 = vrot.slane %v541_v18, 4 }
  0x49   : > { %v546_v40 = vrot.slane %v544_v25, 5  ;;  %v552_v41 = vrot.slane %v550_v26, 5  ;;  %v554_v42 = vshrl.u32 %v3759_v62, 16  ;;  %v560_v2 = vshll.u32 %v245_v15, 16 }
  0x4a   : > { %3213 = vmatprep.mubr.msk.bf16.mxu1 %vm693_vm0, %v2850_v28  ;;  %v529_v45 = vsel %vm3567_vm3, %v524_v30, %v528_v4  ;;  %v534_v46 = vrot.slane %v533_v31, 4  ;;  %v565_v48 = vshrl.u32 %v3772_v27, 16  ;;  %v568_v51 = vshll.u32 %v3772_v27, 16  ;;  %v2975_v30 = vld [vmem:[%s3532_s28 + $0x14] sm:$0x1] }
  0x4b   : > { %v547_v52 = vor.u32 %v546_v40, %v543_v34  ;;  %v556_v53 = vrot.slane %v554_v42, 4  ;;  %v562_v57 = vrot.slane %v560_v2, 5  ;;  %v574_v59 = vshll.u32 %v3776_v39, 16 }
  0x4c   : > { %v539_v60 = vsel %vm3567_vm3, %v534_v46, %v538_v23  ;;  %v567_v0 = vrot.slane %v565_v48, 4  ;;  %v570_v3 = vrot.slane %v568_v51, 5  ;;  %v578_v4 = vshrl.u32 %v3776_v39, 16 }
  0x4d   : > { %3290 = vmatmul.mubr.msk.bf16.gmra.mrb[28].mxu0 %vm693_vm0, %v3451_v35  ;;  %v2851_v10 = vcombine.low %v529_v45, %v539_v60  ;;  %v548_v11 = vrot.slane %v547_v52, 4  ;;  %v557_v14 = vor.u32 %v556_v53, %v552_v41  ;;  %v576_v15 = vrot.slane %v574_v59, 5  ;;  %v3797_v45 = vld [vmem:[%s3532_s28 + $0xa8] sm:$0xf]  ;;  %v3802_v52 = vld [vmem:[%s3532_s28 + $0xac] sm:$0xf] }
  0x4e   : > { %v571_v18 = vor.u32 %v570_v3, %v567_v0  ;;  %v580_v19 = vrot.slane %v578_v4, 4  ;;  %v584_v25 = vshll.u32 %v246_v47, 16  ;;  %v1610_v26 = vshrl.u32 %v2973_v61, 16  ;;  %v247_v3 = vld [vmem:[%s3532_s28 + $0xb0] sm:$0x1] }
  0x4f   : > { %3214 = vmatmul.mubr.msk.bf16.gmra.mrb[20].mxu1 %vm693_vm0, %v2851_v10  ;;  %v553_v23 = vsel %vm3567_vm3, %v548_v11, %v552_v41  ;;  %v558_v28 = vrot.slane %v557_v14, 4  ;;  %v1613_v31 = vshll.u32 %v2973_v61, 16  ;;  %v1619_v34 = vshll.u32 %v2974_v5, 16 }
  0x50   : > { %v572_v35 = vrot.slane %v571_v18, 4  ;;  %v581_v40 = vor.u32 %v580_v19, %v576_v15  ;;  %v586_v42 = vrot.slane %v584_v25, 5  ;;  %v1612_v2 = vrot.slane %v1610_v26, 4 }
  0x51   : > { %v563_v46 = vsel %vm3567_vm3, %v558_v28, %v562_v57  ;;  %v1615_v47 = vrot.slane %v1613_v31, 5  ;;  %v1621_v48 = vrot.slane %v1619_v34, 5  ;;  %v1623_v51 = vshrl.u32 %v2974_v5, 16 }
  0x52   : > { %v2852_v41 = vcombine.low %v553_v23, %v563_v46  ;;  %v577_v53 = vsel %vm3567_vm3, %v572_v35, %v576_v15  ;;  %v582_v59 = vrot.slane %v581_v40, 4  ;;  %v1629_v61 = vshll.u32 %v2975_v30, 16  ;;  %v2976_v15 = vld [vmem:[%s3532_s28 + $0x18] sm:$0xf]  ;;  %v2977_v23 = vld [vmem:[%s3532_s28 + $0x1c] sm:$0xf] }
  0x53   : > { %v1616_v60 = vor.u32 %v1615_v47, %v1612_v2  ;;  %v1625_v0 = vrot.slane %v1623_v51, 4  ;;  %v589_v4 = vshrl.u32 %v3797_v45, 16  ;;  %v592_v57 = vshll.u32 %v3797_v45, 16 }
  0x54   : > { %3217 = vmatprep.mubr.msk.bf16.mxu1 %vm693_vm0, %v2852_v41  ;;  %v587_v5 = vsel %vm3567_vm3, %v582_v59, %v586_v42  ;;  %v1631_v10 = vrot.slane %v1629_v61, 5  ;;  %v598_v11 = vshll.u32 %v3802_v52, 16  ;;  %v602_v14 = vshrl.u32 %v3802_v52, 16  ;;  %v2978_v41 = vld [vmem:[%s3532_s28 + $0x20] sm:$0x1] }
  0x55   : > { %v2853_v18 = vcombine.low %v577_v53, %v587_v5  ;;  %v1617_v19 = vrot.slane %v1616_v60, 4  ;;  %v1626_v25 = vor.u32 %v1625_v0, %v1621_v48  ;;  %v591_v26 = vrot.slane %v589_v4, 4  ;;  %v3821_v59 = vld [vmem:[%s3532_s28 + $0xb4] sm:$0xf]  ;;  %v3826_v4 = vld [vmem:[%s3532_s28 + $0xb8] sm:$0xf] }
  0x56   : > { %v594_v28 = vrot.slane %v592_v57, 5  ;;  %v600_v30 = vrot.slane %v598_v11, 5  ;;  %v604_v31 = vrot.slane %v602_v14, 4  ;;  %v608_v34 = vshll.u32 %v247_v3, 16 }
  0x57   : > { %3218 = vmatmul.mubr.msk.bf16.gmra.mrb[24].mxu1 %vm693_vm0, %v2853_v18  ;;  %v1622_v35 = vsel %vm3567_vm3, %v1617_v19, %v1621_v48  ;;  %v1627_v40 = vrot.slane %v1626_v25, 4  ;;  %v1634_v42 = vshrl.u32 %v2976_v15, 16  ;;  %v1637_v2 = vshll.u32 %v2976_v15, 16 }
  0x58   : > { %v595_v46 = vor.u32 %v594_v28, %v591_v26  ;;  %v605_v47 = vor.u32 %v604_v31, %v600_v30  ;;  %v610_v51 = vrot.slane %v608_v34, 5  ;;  %v1643_v53 = vshll.u32 %v2977_v23, 16  ;;  %v248_v26 = vld [vmem:[%s3532_s28 + $0xbc] sm:$0x1]  ;;  %v2979_v31 = vld [vmem:[%s3532_s28 + $0x24] sm:$0xf] }
  0x59   : > { %v1632_v61 = vsel %vm3567_vm3, %v1627_v40, %v1631_v10  ;;  %v1636_v60 = vrot.slane %v1634_v42, 4  ;;  %v1639_v0 = vrot.slane %v1637_v2, 5  ;;  %v1647_v3 = vshrl.u32 %v2977_v23, 16  ;;  %v2980_v2 = vld [vmem:[%s3532_s28 + $0x28] sm:$0xf] }
  0x5a   : > { %v3023_v48 = vcombine.low %v1622_v35, %v1632_v61  ;;  %v596_v57 = vrot.slane %v595_v46, 4  ;;  %v606_v5 = vrot.slane %v605_v47, 4  ;;  %v1645_v11 = vrot.slane %v1643_v53, 5 }
  0x5b   : > { %v1640_v14 = vor.u32 %v1639_v0, %v1636_v60  ;;  %v1649_v15 = vrot.slane %v1647_v3, 4  ;;  %v1653_v18 = vshll.u32 %v2978_v41, 16  ;;  %v613_v19 = vshrl.u32 %v3821_v59, 16  ;;  %v2981_v60 = vld [vmem:[%s3532_s28 + $0x2c] sm:$0x1] }
  0x5c   : > { %3295 = vmatprep.mubr.msk.bf16.mxu0 %vm693_vm0, %v3023_v48  ;;  %v601_v10 = vsel %vm3567_vm3, %v596_v57, %v600_v30  ;;  %v611_v25 = vsel %vm3567_vm3, %v606_v5, %v610_v51  ;;  %v616_v23 = vshll.u32 %v3821_v59, 16  ;;  %v622_v28 = vshll.u32 %v3826_v4, 16 }
  0x5d   : > { %v2854_v34 = vcombine.low %v601_v10, %v611_v25  ;;  %v1641_v35 = vrot.slane %v1640_v14, 4  ;;  %v1650_v40 = vor.u32 %v1649_v15, %v1645_v11  ;;  %v1655_v42 = vrot.slane %v1653_v18, 5  ;;  %v2982_v14 = vld [vmem:[%s3532_s28 + $0x30] sm:$0xf] }
  0x5e   : > { %v615_v46 = vrot.slane %v613_v19, 4  ;;  %v618_v47 = vrot.slane %v616_v23, 5  ;;  %v624_v41 = vrot.slane %v622_v28, 5  ;;  %v626_v30 = vshrl.u32 %v3826_v4, 16 }
  0x5f   : > { %3221 = vmatprep.mubr.msk.bf16.mxu1 %vm693_vm0, %v2854_v34  ;;  %v1646_v51 = vsel %vm3567_vm3, %v1641_v35, %v1645_v11  ;;  %v1651_v53 = vrot.slane %v1650_v40, 4  ;;  %v632_v61 = vshll.u32 %v248_v26, 16  ;;  %v1658_v0 = vshrl.u32 %v2979_v31, 16  ;;  %v2983_v26 = vld [vmem:[%s3532_s28 + $0x34] sm:$0xf] }
  0x60   : > { %v619_v3 = vor.u32 %v618_v47, %v615_v46  ;;  %v628_v48 = vrot.slane %v626_v30, 4  ;;  %v1661_v57 = vshll.u32 %v2979_v31, 16  ;;  %v1667_v5 = vshll.u32 %v2980_v2, 16  ;;  %v2984_v30 = vld [vmem:[%s3532_s28 + $0x38] sm:$0x1] }
  0x61   : > { %v1656_v15 = vsel %vm3567_vm3, %v1651_v53, %v1655_v42  ;;  %v634_v18 = vrot.slane %v632_v61, 5  ;;  %v1660_v19 = vrot.slane %v1658_v0, 4  ;;  %v1671_v10 = vshrl.u32 %v2980_v2, 16 }
  0x62   : > { %v3024_v25 = vcombine.low %v1646_v51, %v1656_v15  ;;  %v620_v23 = vrot.slane %v619_v3, 4  ;;  %v629_v11 = vor.u32 %v628_v48, %v624_v41  ;;  %v1663_v28 = vrot.slane %v1661_v57, 5  ;;  %v2985_v3 = vld [vmem:[%s3532_s28 + $0x3c] sm:$0xf]  ;;  %v2986_v15 = vld [vmem:[%s3532_s28 + $0x40] sm:$0xf] }
  0x63   : > { %v1669_v34 = vrot.slane %v1667_v5, 5  ;;  %v1673_v35 = vrot.slane %v1671_v10, 4  ;;  %v1677_v40 = vshll.u32 %v2981_v60, 16  ;;  %v1682_v46 = vshrl.u32 %v2982_v14, 16 }
  0x64   : > { %3296 = vmatmul.mubr.msk.bf16.vlgmr.msra.gmra.mrb[0].mxu0 %vm693_vm0, %v3024_v25  ;;  %v625_v31 = vsel %vm3567_vm3, %v620_v23, %v624_v41  ;;  %v630_v42 = vrot.slane %v629_v11, 4  ;;  %v1664_v47 = vor.u32 %v1663_v28, %v1660_v19  ;;  %v1685_v2 = vshll.u32 %v2982_v14, 16  ;;  %v2987_v28 = vld [vmem:[%s3532_s28 + $0x44] sm:$0x1] }
  0x65   : > { %v1674_v51 = vor.u32 %v1673_v35, %v1669_v34  ;;  %v1679_v53 = vrot.slane %v1677_v40, 5  ;;  %v1684_v61 = vrot.slane %v1682_v46, 4  ;;  %v1691_v0 = vshll.u32 %v2983_v26, 16 }
  0x66   : > { %v635_v60 = vsel %vm3567_vm3, %v630_v42, %v634_v18  ;;  %v1665_v48 = vrot.slane %v1664_v47, 4  ;;  %v1687_v57 = vrot.slane %v1685_v2, 5  ;;  %v1695_v5 = vshrl.u32 %v2983_v26, 16 }
  0x67   : > { %v2855_v10 = vcombine.low %v625_v31, %v635_v60  ;;  %v1675_v41 = vrot.slane %v1674_v51, 4  ;;  %v1693_v25 = vrot.slane %v1691_v0, 5  ;;  %v1701_v19 = vshll.u32 %v2984_v30, 16  ;;  %v2988_v31 = vld [vmem:[%s3532_s28 + $0x48] sm:$0xf] }
  0x68   : > { %v1670_v14 = vsel %vm3567_vm3, %v1665_v48, %v1669_v34  ;;  %v1688_v23 = vor.u32 %v1687_v57, %v1684_v61  ;;  %v1697_v11 = vrot.slane %v1695_v5, 4  ;;  %v1706_v35 = vshrl.u32 %v2985_v3, 16  ;;  %v2990_v5 = vld [vmem:[%s3532_s28 + $0x50] sm:$0x1] }
  0x69   : > { %3222 = vmatmul.mubr.msk.bf16.gmra.mrb[28].mxu1 %vm693_vm0, %v2855_v10  ;;  %v1680_v18 = vsel %vm3567_vm3, %v1675_v41, %v1679_v53  ;;  %v1703_v26 = vrot.slane %v1701_v19, 5  ;;  %v1709_v40 = vshll.u32 %v2985_v3, 16  ;;  %v1715_v46 = vshll.u32 %v2986_v15, 16  ;;  %v2989_v53 = vld [vmem:[%s3532_s28 + $0x4c] sm:$0xf] }
  0x6a   : > { %v3025_v42 = vcombine.low %v1670_v14, %v1680_v18  ;;  %3227 = vmatprep.mubr.msk.bf16.mxu1 %vm693_vm0, %v2873_v17  ;;  %v1689_v34 = vrot.slane %v1688_v23, 4  ;;  %v1698_v47 = vor.u32 %v1697_v11, %v1693_v25  ;;  %v1708_v30 = vrot.slane %v1706_v35, 4  ;;  %v2991_v23 = vld [vmem:[%s3532_s28 + $0x54] sm:$0xf] }
  0x6b   : > { %v1711_v2 = vrot.slane %v1709_v40, 5  ;;  %v1717_v51 = vrot.slane %v1715_v46, 5  ;;  %v1719_v61 = vshrl.u32 %v2986_v15, 16  ;;  %v1725_v0 = vshll.u32 %v2987_v28, 16 }
  0x6c   : > { %3299 = vmatprep.mubr.msk.bf16.mxu0 %vm693_vm0, %v3025_v42  ;;  %v1694_v3 = vsel %vm3567_vm3, %v1689_v34, %v1693_v25  ;;  %v1699_v60 = vrot.slane %v1698_v47, 4  ;;  %v2875_v7 = vcombine.low %v3573_v37, %v3578_v43  ;;  %v1730_v8 = vshrl.u32 %v2988_v31, 16  ;;  %v2992_v37 = vld [vmem:[%s3532_s28 + $0x58] sm:$0xf] }
  0x6d   : > { %v1712_v17 = vor.u32 %v1711_v2, %v1708_v30  ;;  %v1721_v48 = vrot.slane %v1719_v61, 4  ;;  %v1727_v57 = vrot.slane %v1725_v0, 5  ;;  %v1733_v10 = vshll.u32 %v2988_v31, 16  ;;  %v2994_v0 = vld [vmem:[%s3532_s28 + $0x60] sm:$0xf] }
  0x6e   : > { %v1704_v15 = vsel %vm3567_vm3, %v1699_v60, %v1703_v26  ;;  %v1732_v41 = vrot.slane %v1730_v8, 4  ;;  %v1739_v19 = vshll.u32 %v2989_v53, 16  ;;  %v1743_v14 = vshrl.u32 %v2989_v53, 16  ;;  %v2995_v8 = vld [vmem:[%s3532_s28 + $0x64] sm:$0xf] }
  0x6f   : > { %v3026_v11 = vcombine.low %v1694_v3, %v1704_v15  ;;  %v1713_v25 = vrot.slane %v1712_v17, 4  ;;  %v1722_v28 = vor.u32 %v1721_v48, %v1717_v51  ;;  %v1735_v35 = vrot.slane %v1733_v10, 5  ;;  %v2996_v15 = vld [vmem:[%s3532_s28 + $0x68] sm:$0x1] }
  0x70   : > { %v1741_v43 = vrot.slane %v1739_v19, 5  ;;  %v1745_v18 = vrot.slane %v1743_v14, 4  ;;  %v1749_v40 = vshll.u32 %v2990_v5, 16  ;;  %v2876_v46 = vcombine.low %v3593_v58, %v3596_v63  ;;  %v2993_v58 = vld [vmem:[%s3532_s28 + $0x5c] sm:$0x1] }
  0x71   : > { %3300 = vmatmul.mubr.msk.bf16.gmra.mrb[4].mxu0 %vm693_vm0, %v3026_v11  ;;  %3228 = vmatmul.mubr.msk.bf16.vlgmr.msra.gmra.mrb[0].mxu1 %vm693_vm0, %v2874_v38  ;;  %v1718_v26 = vsel %vm3567_vm3, %v1713_v25, %v1717_v51  ;;  %v1723_v31 = vrot.slane %v1722_v28, 4  ;;  %v1736_v42 = vor.u32 %v1735_v35, %v1732_v41  ;;  %v1754_v34 = vshrl.u32 %v2991_v23, 16  ;;  %v2997_v28 = vld [vmem:[%s3532_s28 + $0x6c] sm:$0xf] }
  0x72   : > { %3231 = vmatprep.mubr.msk.bf16.mxu1 %vm693_vm0, %v2875_v7  ;;  %v1746_v47 = vor.u32 %v1745_v18, %v1741_v43  ;;  %v1751_v30 = vrot.slane %v1749_v40, 5  ;;  %v1757_v63 = vshll.u32 %v2991_v23, 16  ;;  %v1763_v2 = vshll.u32 %v2992_v37, 16 }
  0x73   : > { %v1728_v16 = vsel %vm3567_vm3, %v1723_v31, %v1727_v57  ;;  %v1737_v22 = vrot.slane %v1736_v42, 4  ;;  %v1756_v38 = vrot.slane %v1754_v34, 4  ;;  %v1767_v61 = vshrl.u32 %v2992_v37, 16 }
  0x74   : > { %v3027_v51 = vcombine.low %v1718_v26, %v1728_v16  ;;  %v1747_v53 = vrot.slane %v1746_v47, 4  ;;  %v1759_v3 = vrot.slane %v1757_v63, 5  ;;  %v1765_v60 = vrot.slane %v1763_v2, 5 }
  0x75   : > { %v1742_v7 = vsel %vm3567_vm3, %v1737_v22, %v1741_v43  ;;  %v1769_v17 = vrot.slane %v1767_v61, 4  ;;  %v1773_v48 = vshll.u32 %v2993_v58, 16  ;;  %v2877_v5 = vcombine.low %v3609_v13, %v3612_v20  ;;  %v2998_v20 = vld [vmem:[%s3532_s28 + $0x70] sm:$0xf]  ;;  %v3000_v22 = vld [vmem:[%s3532_s28 + $0x78] sm:$0xf] }
  0x76   : > { %3303 = vmatprep.mubr.msk.bf16.mxu0 %vm693_vm0, %v3027_v51  ;;  %v1752_v57 = vsel %vm3567_vm3, %v1747_v53, %v1751_v30  ;;  %v1760_v10 = vor.u32 %v1759_v3, %v1756_v38  ;;  %v1778_v41 = vshrl.u32 %v2994_v0, 16  ;;  %v1781_v19 = vshll.u32 %v2994_v0, 16  ;;  %v2999_v30 = vld [vmem:[%s3532_s28 + $0x74] sm:$0x1] }
  0x77   : > { %v3028_v14 = vcombine.low %v1742_v7, %v1752_v57  ;;  %v1770_v23 = vor.u32 %v1769_v17, %v1765_v60  ;;  %v1775_v11 = vrot.slane %v1773_v48, 5  ;;  %v1787_v25 = vshll.u32 %v2995_v8, 16 }
  0x78   : > { %v1761_v35 = vrot.slane %v1760_v10, 4  ;;  %v1780_v37 = vrot.slane %v1778_v41, 4  ;;  %v1783_v43 = vrot.slane %v1781_v19, 5  ;;  %v1791_v13 = vshrl.u32 %v2995_v8, 16 }
  0x79   : > { %3304 = vmatmul.mubr.msk.bf16.gmra.mrb[8].mxu0 %vm693_vm0, %v3028_v14  ;;  %3232 = vmatmul.mubr.msk.bf16.gmra.mrb[4].mxu1 %vm693_vm0, %v2876_v46  ;;  %v1771_v18 = vrot.slane %v1770_v23, 4  ;;  %v1789_v40 = vrot.slane %v1787_v25, 5  ;;  %v1797_v26 = vshll.u32 %v2996_v15, 16  ;;  %v2878_v31 = vcombine.low %v3628_v36, %v3631_v44  ;;  %v3002_v15 = vld [vmem:[%s3532_s28 + $0x80] sm:$0x1] }
  0x7a   : > { %v1766_v42 = vsel %vm3567_vm3, %v1761_v35, %v1765_v60  ;;  %3235 = vmatprep.mubr.msk.bf16.mxu1 %vm693_vm0, %v2877_v5  ;;  %v1784_v34 = vor.u32 %v1783_v43, %v1780_v37  ;;  %v1793_v47 = vrot.slane %v1791_v13, 4  ;;  %v1802_v58 = vshrl.u32 %v2997_v28, 16  ;;  %v3001_v60 = vld [vmem:[%s3532_s28 + $0x7c] sm:$0xf]  ;;  %v3003_v25 = vld [vmem:[%s3532_s28 + $0x84] sm:$0xf] }
  0x7b   : > { %v1776_v63 = vsel %vm3567_vm3, %v1771_v18, %v1775_v11  ;;  %v1799_v46 = vrot.slane %v1797_v26, 5  ;;  %v1805_v2 = vshll.u32 %v2997_v28, 16  ;;  %v1811_v16 = vshll.u32 %v2998_v20, 16  ;;  %v3004_v37 = vld [vmem:[%s3532_s28 + $0x88] sm:$0xf] }
  0x7c   : > { %v3029_v38 = vcombine.low %v1766_v42, %v1776_v63  ;;  %v1785_v61 = vrot.slane %v1784_v34, 4  ;;  %v1794_v36 = vor.u32 %v1793_v47, %v1789_v40  ;;  %v1804_v44 = vrot.slane %v1802_v58, 4 }
  0x7d   : > { %v1807_v0 = vrot.slane %v1805_v2, 5  ;;  %v1813_v51 = vrot.slane %v1811_v16, 5  ;;  %v1815_v53 = vshrl.u32 %v2998_v20, 16  ;;  %v1821_v3 = vshll.u32 %v2999_v30, 16  ;;  %v3005_v30 = vld [vmem:[%s3532_s28 + $0x8c] sm:$0x1] }
  0x7e   : > { %3307 = vmatprep.mubr.msk.bf16.mxu0 %vm693_vm0, %v3029_v38  ;;  %v1790_v8 = vsel %vm3567_vm3, %v1785_v61, %v1789_v40  ;;  %v1795_v7 = vrot.slane %v1794_v36, 4  ;;  %v2879_v17 = vcombine.low %v3645_v1, %v3650_v9  ;;  %v1826_v48 = vshrl.u32 %v3000_v22, 16  ;;  %v3006_v16 = vld [vmem:[%s3532_s28 + $0x90] sm:$0xf] }
  0x7f   : > { %v1808_v5 = vor.u32 %v1807_v0, %v1804_v44  ;;  %v1817_v57 = vrot.slane %v1815_v53, 4  ;;  %v1823_v10 = vrot.slane %v1821_v3, 5  ;;  %v1829_v41 = vshll.u32 %v3000_v22, 16  ;;  %v3007_v44 = vld [vmem:[%s3532_s28 + $0x94] sm:$0xf] }
  0x80   : > { %v1800_v19 = vsel %vm3567_vm3, %v1795_v7, %v1799_v46  ;;  %v1828_v14 = vrot.slane %v1826_v48, 4  ;;  %v1835_v23 = vshll.u32 %v3001_v60, 16  ;;  %v1839_v11 = vshrl.u32 %v3001_v60, 16  ;;  %v3008_v7 = vld [vmem:[%s3532_s28 + $0x98] sm:$0x1] }
  0x81   : > { %v3030_v28 = vcombine.low %v1790_v8, %v1800_v19  ;;  %3236 = vmatmul.mubr.msk.bf16.gmra.mrb[8].mxu1 %vm693_vm0, %v2878_v31  ;;  %v1809_v35 = vrot.slane %v1808_v5, 4  ;;  %v1818_v1 = vor.u32 %v1817_v57, %v1813_v51  ;;  %v1831_v9 = vrot.slane %v1829_v41, 5  ;;  %v3009_v41 = vld [vmem:[%s3532_s28 + $0x9c] sm:$0xf] }
  0x82   : > { %3239 = vmatprep.mubr.msk.bf16.mxu1 %vm693_vm0, %v2879_v17  ;;  %v1837_v43 = vrot.slane %v1835_v23, 5  ;;  %v1841_v13 = vrot.slane %v1839_v11, 4  ;;  %v1845_v20 = vshll.u32 %v3002_v15, 16  ;;  %v2880_v18 = vcombine.low %v3660_v24, %v3666_v29  ;;  %v3010_v23 = vld [vmem:[%s3532_s28 + $0xa0] sm:$0xf] }
  0x83   : > { %3308 = vmatmul.mubr.msk.bf16.gmra.mrb[12].mxu0 %vm693_vm0, %v3030_v28  ;;  %v1814_v40 = vsel %vm3567_vm3, %v1809_v35, %v1813_v51  ;;  %v1819_v26 = vrot.slane %v1818_v1, 4  ;;  %v1832_v31 = vor.u32 %v1831_v9, %v1828_v14  ;;  %v1850_v42 = vshrl.u32 %v3003_v25, 16 }
  0x84   : > { %v1842_v34 = vor.u32 %v1841_v13, %v1837_v43  ;;  %v1847_v47 = vrot.slane %v1845_v20, 5  ;;  %v1853_v58 = vshll.u32 %v3003_v25, 16  ;;  %v1859_v63 = vshll.u32 %v3004_v37, 16 }
  0x85   : > { %v1824_v46 = vsel %vm3567_vm3, %v1819_v26, %v1823_v10  ;;  %v1833_v2 = vrot.slane %v1832_v31, 4  ;;  %v1852_v24 = vrot.slane %v1850_v42, 4  ;;  %v1863_v29 = vshrl.u32 %v3004_v37, 16  ;;  %v3012_v31 = vld [vmem:[%s3532_s28 + $0xa8] sm:$0xf] }
  0x86   : > { %v3031_v22 = vcombine.low %v1814_v40, %v1824_v46  ;;  %v1843_v38 = vrot.slane %v1842_v34, 4  ;;  %v1855_v61 = vrot.slane %v1853_v58, 5  ;;  %v1861_v36 = vrot.slane %v1859_v63, 5  ;;  %v3013_v46 = vld [vmem:[%s3532_s28 + $0xac] sm:$0xf] }
  0x87   : > { %v1838_v0 = vsel %vm3567_vm3, %v1833_v2, %v1837_v43  ;;  %v1865_v51 = vrot.slane %v1863_v29, 4  ;;  %v1869_v53 = vshll.u32 %v3005_v30, 16  ;;  %v2881_v3 = vcombine.low %v3677_v50, %v3686_v55  ;;  %v3011_v43 = vld [vmem:[%s3532_s28 + $0xa4] sm:$0x1] }
  0x88   : > { %3311 = vmatprep.mubr.msk.bf16.mxu0 %vm693_vm0, %v3031_v22  ;;  %v1848_v60 = vsel %vm3567_vm3, %v1843_v38, %v1847_v47  ;;  %v1856_v8 = vor.u32 %v1855_v61, %v1852_v24  ;;  %v1874_v17 = vshrl.u32 %v3006_v16, 16  ;;  %v1877_v48 = vshll.u32 %v3006_v16, 16 }
  0x89   : > { %v3032_v5 = vcombine.low %v1838_v0, %v1848_v60  ;;  %3240 = vmatmul.mubr.msk.bf16.gmra.mrb[12].mxu1 %vm693_vm0, %v2880_v18  ;;  %v1866_v57 = vor.u32 %v1865_v51, %v1861_v36  ;;  %v1871_v10 = vrot.slane %v1869_v53, 5  ;;  %v1883_v15 = vshll.u32 %v3007_v44, 16  ;;  %v3015_v60 = vld [vmem:[%s3532_s28 + $0xb4] sm:$0xf] }
  0x8a   : > { %v1857_v19 = vrot.slane %v1856_v8, 4  ;;  %3243 = vmatprep.mubr.msk.bf16.mxu1 %vm693_vm0, %v2881_v3  ;;  %v1876_v50 = vrot.slane %v1874_v17, 4  ;;  %v1879_v55 = vrot.slane %v1877_v48, 5  ;;  %v1887_v14 = vshrl.u32 %v3007_v44, 16  ;;  %v3016_v17 = vld [vmem:[%s3532_s28 + $0xb8] sm:$0xf] }
  0x8b   : > { %3312 = vmatmul.mubr.msk.bf16.gmra.mrb[16].mxu0 %vm693_vm0, %v3032_v5  ;;  %v1867_v11 = vrot.slane %v1866_v57, 4  ;;  %v1885_v25 = vrot.slane %v1883_v15, 5  ;;  %v1893_v28 = vshll.u32 %v3008_v7, 16  ;;  %v2882_v35 = vcombine.low %v3696_v12, %v3701_v21 }
  0x8c   : > { %v1862_v1 = vsel %vm3567_vm3, %v1857_v19, %v1861_v36  ;;  %v1880_v9 = vor.u32 %v1879_v55, %v1876_v50  ;;  %v1889_v37 = vrot.slane %v1887_v14, 4  ;;  %v1898_v13 = vshrl.u32 %v3009_v41, 16  ;;  %v3014_v36 = vld [vmem:[%s3532_s28 + $0xb0] sm:$0x1] }
  0x8d   : > { %v1872_v20 = vsel %vm3567_vm3, %v1867_v11, %v1871_v10  ;;  %v1895_v18 = vrot.slane %v1893_v28, 5  ;;  %v1901_v40 = vshll.u32 %v3009_v41, 16  ;;  %v1907_v26 = vshll.u32 %v3010_v23, 16 }
  0x8e   : > { %v3033_v42 = vcombine.low %v1862_v1, %v1872_v20  ;;  %v1881_v34 = vrot.slane %v1880_v9, 4  ;;  %v1890_v47 = vor.u32 %v1889_v37, %v1885_v25  ;;  %v1900_v12 = vrot.slane %v1898_v13, 4  ;;  %v3019_v20 = vld [vmem:[%s3532_s28 + $0xc4] sm:$0xf] }
  0x8f   : > { %v1903_v21 = vrot.slane %v1901_v40, 5  ;;  %v1909_v30 = vrot.slane %v1907_v26, 5  ;;  %v1911_v58 = vshrl.u32 %v3010_v23, 16  ;;  %v1917_v63 = vshll.u32 %v3011_v43, 16  ;;  %v3017_v23 = vld [vmem:[%s3532_s28 + $0xbc] sm:$0x1] }
  0x90   : > { %3315 = vmatprep.mubr.msk.bf16.mxu0 %vm693_vm0, %v3033_v42  ;;  %v1886_v2 = vsel %vm3567_vm3, %v1881_v34, %v1885_v25  ;;  %v1891_v24 = vrot.slane %v1890_v47, 4  ;;  %v2883_v29 = vcombine.low %v3718_v49, %v3721_v56  ;;  %v1922_v16 = vshrl.u32 %v3012_v31, 16  ;;  %v3020_v47 = vld [vmem:[%s3532_s28 + $0xc8] sm:$0x1] }
  0x91   : > { %3244 = vmatmul.mubr.msk.bf16.gmra.mrb[16].mxu1 %vm693_vm0, %v2882_v35  ;;  %v1904_v22 = vor.u32 %v1903_v21, %v1900_v12  ;;  %v1913_v38 = vrot.slane %v1911_v58, 4  ;;  %v1919_v61 = vrot.slane %v1917_v63, 5  ;;  %v1925_v44 = vshll.u32 %v3012_v31, 16 }
  0x92   : > { %v1896_v0 = vsel %vm3567_vm3, %v1891_v24, %v1895_v18  ;;  %3247 = vmatprep.mubr.msk.bf16.mxu1 %vm693_vm0, %v2883_v29  ;;  %v1924_v51 = vrot.slane %v1922_v16, 4  ;;  %v1931_v53 = vshll.u32 %v3013_v46, 16  ;;  %v1935_v3 = vshrl.u32 %v3013_v46, 16 }
  0x93   : > { %v3034_v8 = vcombine.low %v1886_v2, %v1896_v0  ;;  %v1905_v49 = vrot.slane %v1904_v22, 4  ;;  %v1914_v56 = vor.u32 %v1913_v38, %v1909_v30  ;;  %v1927_v7 = vrot.slane %v1925_v44, 5 }
  0x94   : > { %v1933_v48 = vrot.slane %v1931_v53, 5  ;;  %v1937_v5 = vrot.slane %v1935_v3, 4  ;;  %v1941_v57 = vshll.u32 %v3014_v36, 16  ;;  %v2884_v10 = vcombine.low %v3731_v6, %v3741_v33  ;;  %v3018_v33 = vld [vmem:[%s3532_s28 + $0xc0] sm:$0xf] }
  0x95   : > { %3316 = vmatmul.mubr.msk.bf16.gmra.mrb[20].mxu0 %vm693_vm0, %v3034_v8  ;;  %v1910_v15 = vsel %vm3567_vm3, %v1905_v49, %v1909_v30  ;;  %v1915_v41 = vrot.slane %v1914_v56, 4  ;;  %v1928_v19 = vor.u32 %v1927_v7, %v1924_v51  ;;  %v1946_v50 = vshrl.u32 %v3015_v60, 16 }
  0x96   : > { %v1938_v55 = vor.u32 %v1937_v5, %v1933_v48  ;;  %v1943_v14 = vrot.slane %v1941_v57, 5  ;;  %v1949_v11 = vshll.u32 %v3015_v60, 16  ;;  %v1955_v25 = vshll.u32 %v3016_v17, 16 }
  0x97   : > { %v1920_v28 = vsel %vm3567_vm3, %v1915_v41, %v1919_v61  ;;  %v1929_v35 = vrot.slane %v1928_v19, 4  ;;  %v1948_v1 = vrot.slane %v1946_v50, 4  ;;  %v1959_v6 = vshrl.u32 %v3016_v17, 16 }
  0x98   : > { %v3035_v9 = vcombine.low %v1910_v15, %v1920_v28  ;;  %v1939_v37 = vrot.slane %v1938_v55, 4  ;;  %v1951_v43 = vrot.slane %v1949_v11, 5  ;;  %v1957_v13 = vrot.slane %v1955_v25, 5 }
  0x99   : > { %v1934_v18 = vsel %vm3567_vm3, %v1929_v35, %v1933_v48  ;;  %3248 = vmatmul.mubr.msk.bf16.gmra.mrb[20].mxu1 %vm693_vm0, %v2884_v10  ;;  %v1961_v40 = vrot.slane %v1959_v6, 4  ;;  %v1965_v26 = vshll.u32 %v3017_v23, 16  ;;  %v2885_v31 = vcombine.low %v3752_v54, %v3759_v62 }
  0x9a   : > { %3319 = vmatprep.mubr.msk.bf16.mxu0 %vm693_vm0, %v3035_v9  ;;  %v1944_v42 = vsel %vm3567_vm3, %v1939_v37, %v1943_v14  ;;  %v1952_v34 = vor.u32 %v1951_v43, %v1948_v1  ;;  %v1970_v12 = vshrl.u32 %v3018_v33, 16  ;;  %v1973_v21 = vshll.u32 %v3018_v33, 16 }
  0x9b   : > { %v3036_v30 = vcombine.low %v1934_v18, %v1944_v42  ;;  %v1962_v58 = vor.u32 %v1961_v40, %v1957_v13  ;;  %v1967_v63 = vrot.slane %v1965_v26, 5  ;;  %3251 = vmatprep.mubr.msk.bf16.mxu1 %vm693_vm0, %v2885_v31  ;;  %v1979_v46 = vshll.u32 %v3019_v20, 16 }
  0x9c   : > { %v1953_v2 = vrot.slane %v1952_v34, 4  ;;  %v1972_v24 = vrot.slane %v1970_v12, 4  ;;  %v1975_v29 = vrot.slane %v1973_v21, 5  ;;  %v1983_v16 = vshrl.u32 %v3019_v20, 16 }
  0x9d   : > { %3320 = vmatmul.mubr.msk.bf16.gmra.mrb[24].mxu0 %vm693_vm0, %v3036_v30  ;;  %v1963_v54 = vrot.slane %v1962_v58, 4  ;;  %v1981_v62 = vrot.slane %v1979_v46, 5  ;;  %v1989_v22 = vshll.u32 %v3020_v47, 16  ;;  %v2886_v38 = vcombine.low %v3772_v27, %v3776_v39 }
  0x9e   : > { %v1958_v61 = vsel %vm3567_vm3, %v1953_v2, %v1957_v13  ;;  %v1976_v36 = vor.u32 %v1975_v29, %v1972_v24  ;;  %v1985_v44 = vrot.slane %v1983_v16, 4  ;;  %v2887_v0 = vcombine.low %v3797_v45, %v3802_v52 }
  0x9f   : > { %v1968_v51 = vsel %vm3567_vm3, %v1963_v54, %v1967_v63  ;;  %v1991_v8 = vrot.slane %v1989_v22, 5  ;;  %v2888_v49 = vcombine.low %v3821_v59, %v3826_v4 }
  0xa0   : > { %v3037_v53 = vcombine.low %v1958_v61, %v1968_v51  ;;  %v1977_v3 = vrot.slane %v1976_v36, 4  ;;  %v1986_v60 = vor.u32 %v1985_v44, %v1981_v62 }
  0xa1   : > { %3252 = vmatmul.mubr.msk.bf16.gmra.mrb[24].mxu1 %vm693_vm0, %v2886_v38 }
  0xa2   : > { %3323 = vmatprep.mubr.msk.bf16.mxu0 %vm693_vm0, %v3037_v53  ;;  %v1982_v27 = vsel %vm3567_vm3, %v1977_v3, %v1981_v62  ;;  %v1987_v39 = vrot.slane %v1986_v60, 4  ;;  %3255 = vmatprep.mubr.msk.bf16.mxu1 %vm693_vm0, %v2887_v0 }
  0xa4   : > { %v1992_v45 = vsel %vm3567_vm3, %v1987_v39, %v1991_v8 }
  0xa5   : > { %v3038_v52 = vcombine.low %v1982_v27, %v1992_v45 }
  0xa7   : > { %3324 = vmatmul.mubr.msk.bf16.gmra.mrb[28].mxu0 %vm693_vm0, %v3038_v52 }
  0xa9   : > { %3256 = vmatmul.mubr.msk.bf16.gmra.mrb[28].mxu1 %vm693_vm0, %v2888_v49 }
 0x137   : > { %v3297_v56 = vpop.f32.mrb[0].mxu0 }
 0x138   : > { %v2132_v7 = vpop.f32.mrb[1].mxu0 }
 0x139   : > { %v3298_v17 = vpop.f32.mrb[2].mxu0 }
 0x13a   : > { %v2135_v48 = vpop.f32.mrb[3].mxu0 }
 0x144   : > { %v3301_v5 = vpop.f32.mrb[4].mxu0  ;;  %v3229_v57 = vpop.f32.mrb[0].mxu1 }
 0x145   : > { %v4011_v10 = vadd.f32 %v3297_v56, %v3229_v57  ;;  %v2148_v15 = vpop.f32.mrb[5].mxu0  ;;  %v1071_v41 = vpop.f32.mrb[1].mxu1 }
 0x146   : > { %v4013_v32 = vadd.f32 %v2132_v7, %v1071_v41  ;;  %v3302_v19 = vpop.f32.mrb[6].mxu0  ;;  %v3230_v50 = vpop.f32.mrb[2].mxu1 }
 0x147   : > { %v4015_v59 = vadd.f32 %v3298_v17, %v3230_v50  ;;  %v2151_v4 = vpop.f32.mrb[7].mxu0  ;;  %v1074_v55 = vpop.f32.mrb[3].mxu1  ;;  %v2365_v11 = vmul.f32 %v4011_v10, %v4011_v10  ;;  %v2297_v33 = vsel %vm2293_vm4, %v4011_v10, 0.0 }
 0x148   : > { %v2363_v14 = vmul.f32 %v4013_v32, %v4013_v32  ;;  %v4019_v23 = vadd.f32 %v2135_v48, %v1074_v55  ;;  %v2294_v25 = vsel %vm2293_vm4, %v4013_v32, 0.0 }
 0x149   : > { %v2366_v1 = vmul.f32 %v4015_v59, %v4015_v59  ;;  %v2398_v42 = vsel %vm2293_vm4, %v2365_v11, 0.0  ;;  %v2299_v34 = vsel %vm2293_vm4, %v4015_v59, 0.0 }
 0x14a   : > { %v2295_v28 = vsel %vm2293_vm4, %v4019_v23, 0.0  ;;  %v2364_v35 = vmul.f32 %v4019_v23, %v4019_v23  ;;  %v2395_v9 = vsel %vm2293_vm4, %v2363_v14, 0.0 }
 0x14b   : > { %v2296_v6 = vadd.f32 %v2295_v28, %v2294_v25  ;;  %v2400_v30 = vsel %vm2293_vm4, %v2366_v1, 0.0 }
 0x14c   : > { %v2396_v37 = vsel %vm2293_vm4, %v2364_v35, 0.0  ;;  %v3305_v43 = vpop.f32.mrb[8].mxu0  ;;  %v3233_v13 = vpop.f32.mrb[4].mxu1 }
 0x14d   : > { %v2298_v20 = vadd.f32 %v2297_v33, %v2296_v6  ;;  %v2397_v18 = vadd.f32 %v2396_v37, %v2395_v9  ;;  %v4035_v40 = vadd.f32 %v3301_v5, %v3233_v13  ;;  %v2164_v26 = vpop.f32.mrb[9].mxu0  ;;  %v1087_v31 = vpop.f32.mrb[5].mxu1 }
 0x14e   : > { %v4040_v47 = vadd.f32 %v2148_v15, %v1087_v31  ;;  %v3306_v12 = vpop.f32.mrb[10].mxu0  ;;  %v3234_v21 = vpop.f32.mrb[6].mxu1 }
 0x14f   : > { %v2399_v58 = vadd.f32 %v2398_v42, %v2397_v18  ;;  %v2300_v63 = vadd.f32 %v2299_v34, %v2298_v20  ;;  %v2167_v46 = vpop.f32.mrb[11].mxu0  ;;  %v1090_v2 = vpop.f32.mrb[7].mxu1  ;;  %v4047_v16 = vadd.f32 %v3302_v19, %v3234_v21  ;;  %v2369_v36 = vmul.f32 %v4035_v40, %v4035_v40 }
 0x150   : > { %v2301_v24 = vsel %vm2293_vm4, %v4040_v47, 0.0  ;;  %v2367_v29 = vmul.f32 %v4040_v47, %v4040_v47  ;;  %v4049_v54 = vadd.f32 %v2151_v4, %v1090_v2  ;;  %v2305_v53 = vsel %vm2293_vm4, %v4035_v40, 0.0 }
 0x151   : > { %v2302_v62 = vadd.f32 %v2301_v24, %v2300_v63  ;;  %v2401_v22 = vadd.f32 %v2400_v30, %v2399_v58  ;;  %v2370_v60 = vmul.f32 %v4047_v16, %v4047_v16  ;;  %v2307_v52 = vsel %vm2293_vm4, %v4047_v16, 0.0 }
 0x152   : > { %v2402_v38 = vsel %vm2293_vm4, %v2367_v29, 0.0  ;;  %v2303_v61 = vsel %vm2293_vm4, %v4049_v54, 0.0  ;;  %v2368_v51 = vmul.f32 %v4049_v54, %v4049_v54  ;;  %v2406_v48 = vsel %vm2293_vm4, %v2369_v36, 0.0 }
 0x153   : > { %v2403_v44 = vadd.f32 %v2402_v38, %v2401_v22  ;;  %v2304_v0 = vadd.f32 %v2303_v61, %v2302_v62  ;;  %v2408_v11 = vsel %vm2293_vm4, %v2370_v60, 0.0 }
 0x154   : > { %v3237_v3 = vpop.f32.mrb[8].mxu1  ;;  %v2404_v27 = vsel %vm2293_vm4, %v2368_v51, 0.0 }
 0x155   : > { %v2306_v8 = vadd.f32 %v2305_v53, %v2304_v0  ;;  %v4063_v39 = vadd.f32 %v3305_v43, %v3237_v3  ;;  %v1103_v45 = vpop.f32.mrb[9].mxu1  ;;  %v2405_v49 = vadd.f32 %v2404_v27, %v2403_v44 }
 0x156   : > { %v3309_v56 = vpop.f32.mrb[12].mxu0  ;;  %v4067_v7 = vadd.f32 %v2164_v26, %v1103_v45  ;;  %v3238_v17 = vpop.f32.mrb[10].mxu1 }
 0x157   : > { %v2180_v5 = vpop.f32.mrb[13].mxu0  ;;  %v2308_v57 = vadd.f32 %v2307_v52, %v2306_v8  ;;  %v4070_v15 = vadd.f32 %v3306_v12, %v3238_v17  ;;  %v1106_v41 = vpop.f32.mrb[11].mxu1  ;;  %v2407_v19 = vadd.f32 %v2406_v48, %v2405_v49  ;;  %v2373_v9 = vmul.f32 %v4063_v39, %v4063_v39 }
 0x158   : > { %v2309_v50 = vsel %vm2293_vm4, %v4067_v7, 0.0  ;;  %v2371_v4 = vmul.f32 %v4067_v7, %v4067_v7  ;;  %v3310_v55 = vpop.f32.mrb[14].mxu0  ;;  %v4076_v14 = vadd.f32 %v2167_v46, %v1106_v41  ;;  %v2313_v43 = vsel %vm2293_vm4, %v4063_v39, 0.0 }
 0x159   : > { %v2310_v25 = vadd.f32 %v2309_v50, %v2308_v57  ;;  %v2183_v28 = vpop.f32.mrb[15].mxu0  ;;  %v2409_v35 = vadd.f32 %v2408_v11, %v2407_v19  ;;  %v2374_v26 = vmul.f32 %v4070_v15, %v4070_v15  ;;  %v2315_v12 = vsel %vm2293_vm4, %v4070_v15, 0.0 }
 0x15a   : > { %v2410_v1 = vsel %vm2293_vm4, %v2371_v4, 0.0  ;;  %v2311_v6 = vsel %vm2293_vm4, %v4076_v14, 0.0  ;;  %v2372_v33 = vmul.f32 %v4076_v14, %v4076_v14  ;;  %v2414_v46 = vsel %vm2293_vm4, %v2373_v9, 0.0 }
 0x15b   : > { %v2312_v37 = vadd.f32 %v2311_v6, %v2310_v25  ;;  %v2411_v13 = vadd.f32 %v2410_v1, %v2409_v35  ;;  %v2416_v0 = vsel %vm2293_vm4, %v2374_v26, 0.0 }
 0x15c   : > { %v2412_v20 = vsel %vm2293_vm4, %v2372_v33, 0.0  ;;  %v3241_v18 = vpop.f32.mrb[12].mxu1 }
 0x15d   : > { %v2314_v31 = vadd.f32 %v2313_v43, %v2312_v37  ;;  %v4091_v42 = vadd.f32 %v3309_v56, %v3241_v18  ;;  %v1119_v34 = vpop.f32.mrb[13].mxu1  ;;  %v2413_v21 = vadd.f32 %v2412_v20, %v2411_v13 }
 0x15e   : > { %v3313_v30 = vpop.f32.mrb[16].mxu0  ;;  %v4095_v58 = vadd.f32 %v2180_v5, %v1119_v34  ;;  %v3242_v63 = vpop.f32.mrb[14].mxu1 }
 0x15f   : > { %v2196_v2 = vpop.f32.mrb[17].mxu0  ;;  %v2316_v24 = vadd.f32 %v2315_v12, %v2314_v31  ;;  %v4098_v29 = vadd.f32 %v3310_v55, %v3242_v63  ;;  %v1122_v62 = vpop.f32.mrb[15].mxu1  ;;  %v2415_v22 = vadd.f32 %v2414_v46, %v2413_v21  ;;  %v2377_v45 = vmul.f32 %v4091_v42, %v4091_v42 }
 0x160   : > { %v2317_v38 = vsel %vm2293_vm4, %v4095_v58, 0.0  ;;  %v2375_v61 = vmul.f32 %v4095_v58, %v4095_v58  ;;  %v3314_v36 = vpop.f32.mrb[18].mxu0  ;;  %v4104_v44 = vadd.f32 %v2183_v28, %v1122_v62  ;;  %v2321_v49 = vsel %vm2293_vm4, %v4091_v42, 0.0 }
 0x161   : > { %v2318_v51 = vadd.f32 %v2317_v38, %v2316_v24  ;;  %v2199_v53 = vpop.f32.mrb[19].mxu0  ;;  %v2417_v3 = vadd.f32 %v2416_v0, %v2415_v22  ;;  %v2378_v5 = vmul.f32 %v4098_v29, %v4098_v29  ;;  %v2323_v50 = vsel %vm2293_vm4, %v4098_v29, 0.0 }
 0x162   : > { %v2418_v60 = vsel %vm2293_vm4, %v2375_v61, 0.0  ;;  %v2319_v8 = vsel %vm2293_vm4, %v4104_v44, 0.0  ;;  %v2376_v27 = vmul.f32 %v4104_v44, %v4104_v44  ;;  %v2422_v25 = vsel %vm2293_vm4, %v2377_v45, 0.0 }
 0x163   : > { %v2320_v52 = vadd.f32 %v2319_v8, %v2318_v51  ;;  %v2419_v56 = vadd.f32 %v2418_v60, %v2417_v3  ;;  %v2424_v13 = vsel %vm2293_vm4, %v2378_v5, 0.0 }
 0x164   : > { %v2420_v17 = vsel %vm2293_vm4, %v2376_v27, 0.0  ;;  %v3245_v48 = vpop.f32.mrb[16].mxu1 }
 0x165   : > { %v2322_v57 = vadd.f32 %v2321_v49, %v2320_v52  ;;  %v4119_v41 = vadd.f32 %v3313_v30, %v3245_v48  ;;  %v1135_v19 = vpop.f32.mrb[17].mxu1  ;;  %v2421_v4 = vadd.f32 %v2420_v17, %v2419_v56 }
 0x166   : > { %v4123_v55 = vadd.f32 %v2196_v2, %v1135_v19  ;;  %v3246_v11 = vpop.f32.mrb[18].mxu1 }
 0x167   : > { %v2324_v28 = vadd.f32 %v2323_v50, %v2322_v57  ;;  %v4126_v35 = vadd.f32 %v3314_v36, %v3246_v11  ;;  %v1138_v1 = vpop.f32.mrb[19].mxu1  ;;  %v2423_v6 = vadd.f32 %v2422_v25, %v2421_v4  ;;  %v2381_v30 = vmul.f32 %v4119_v41, %v4119_v41 }
 0x168   : > { %v3317_v33 = vpop.f32.mrb[20].mxu0  ;;  %v2325_v9 = vsel %vm2293_vm4, %v4123_v55, 0.0  ;;  %v2379_v37 = vmul.f32 %v4123_v55, %v4123_v55  ;;  %v4132_v43 = vadd.f32 %v2199_v53, %v1138_v1  ;;  %v2329_v2 = vsel %vm2293_vm4, %v4119_v41, 0.0 }
 0x169   : > { %v2212_v20 = vpop.f32.mrb[21].mxu0  ;;  %v2326_v18 = vadd.f32 %v2325_v9, %v2324_v28  ;;  %v2425_v26 = vadd.f32 %v2424_v13, %v2423_v6  ;;  %v2382_v38 = vmul.f32 %v4126_v35, %v4126_v35  ;;  %v2331_v51 = vsel %vm2293_vm4, %v4126_v35, 0.0 }
 0x16a   : > { %v2426_v31 = vsel %vm2293_vm4, %v2379_v37, 0.0  ;;  %v3318_v34 = vpop.f32.mrb[22].mxu0  ;;  %v2327_v12 = vsel %vm2293_vm4, %v4132_v43, 0.0  ;;  %v2380_v21 = vmul.f32 %v4132_v43, %v4132_v43  ;;  %v2430_v8 = vsel %vm2293_vm4, %v2381_v30, 0.0 }
 0x16b   : > { %v2215_v63 = vpop.f32.mrb[23].mxu0  ;;  %v2328_v46 = vadd.f32 %v2327_v12, %v2326_v18  ;;  %v2427_v24 = vadd.f32 %v2426_v31, %v2425_v26  ;;  %v2432_v57 = vsel %vm2293_vm4, %v2382_v38, 0.0 }
 0x16c   : > { %v2428_v62 = vsel %vm2293_vm4, %v2380_v21, 0.0  ;;  %v3249_v22 = vpop.f32.mrb[20].mxu1 }
 0x16d   : > { %v2330_v61 = vadd.f32 %v2329_v2, %v2328_v46  ;;  %v4147_v36 = vadd.f32 %v3317_v33, %v3249_v22  ;;  %v1151_v0 = vpop.f32.mrb[21].mxu1  ;;  %v2429_v53 = vadd.f32 %v2428_v62, %v2427_v24 }
 0x16e   : > { %v4151_v3 = vadd.f32 %v2212_v20, %v1151_v0  ;;  %v3250_v60 = vpop.f32.mrb[22].mxu1 }
 0x16f   : > { %v2332_v27 = vadd.f32 %v2331_v51, %v2330_v61  ;;  %v4154_v45 = vadd.f32 %v3318_v34, %v3250_v60  ;;  %v1154_v52 = vpop.f32.mrb[23].mxu1  ;;  %v2431_v49 = vadd.f32 %v2430_v8, %v2429_v53  ;;  %v2385_v6 = vmul.f32 %v4147_v36, %v4147_v36 }
 0x170   : > { %v3321_v56 = vpop.f32.mrb[24].mxu0  ;;  %v2333_v17 = vsel %vm2293_vm4, %v4151_v3, 0.0  ;;  %v2383_v48 = vmul.f32 %v4151_v3, %v4151_v3  ;;  %v4160_v5 = vadd.f32 %v2215_v63, %v1154_v52  ;;  %v2337_v37 = vsel %vm2293_vm4, %v4147_v36, 0.0 }
 0x171   : > { %v2228_v19 = vpop.f32.mrb[25].mxu0  ;;  %v2334_v50 = vadd.f32 %v2333_v17, %v2332_v27  ;;  %v2433_v4 = vadd.f32 %v2432_v57, %v2431_v49  ;;  %v2386_v26 = vmul.f32 %v4154_v45, %v4154_v45  ;;  %v2339_v21 = vsel %vm2293_vm4, %v4154_v45, 0.0 }
 0x172   : > { %v2434_v11 = vsel %vm2293_vm4, %v2383_v48, 0.0  ;;  %v3322_v25 = vpop.f32.mrb[26].mxu0  ;;  %v2335_v28 = vsel %vm2293_vm4, %v4160_v5, 0.0  ;;  %v2384_v1 = vmul.f32 %v4160_v5, %v4160_v5  ;;  %v2438_v2 = vsel %vm2293_vm4, %v2385_v6, 0.0 }
 0x173   : > { %v2231_v33 = vpop.f32.mrb[27].mxu0  ;;  %v2336_v9 = vadd.f32 %v2335_v28, %v2334_v50  ;;  %v2435_v13 = vadd.f32 %v2434_v11, %v2433_v4  ;;  %v2440_v53 = vsel %vm2293_vm4, %v2386_v26, 0.0 }
 0x174   : > { %v2436_v20 = vsel %vm2293_vm4, %v2384_v1, 0.0  ;;  %v3253_v18 = vpop.f32.mrb[24].mxu1 }
 0x175   : > { %v2338_v31 = vadd.f32 %v2337_v37, %v2336_v9  ;;  %v4175_v34 = vadd.f32 %v3321_v56, %v3253_v18  ;;  %v1167_v12 = vpop.f32.mrb[25].mxu1  ;;  %v2437_v30 = vadd.f32 %v2436_v20, %v2435_v13 }
 0x176   : > { %v4179_v63 = vadd.f32 %v2228_v19, %v1167_v12  ;;  %v3254_v46 = vpop.f32.mrb[26].mxu1 }
 0x177   : > { %v2340_v24 = vadd.f32 %v2339_v21, %v2338_v31  ;;  %v4182_v62 = vadd.f32 %v3322_v25, %v3254_v46  ;;  %v1170_v22 = vpop.f32.mrb[27].mxu1  ;;  %v2439_v38 = vadd.f32 %v2438_v2, %v2437_v30  ;;  %v2389_v17 = vmul.f32 %v4175_v34, %v4175_v34 }
 0x178   : > { %v2341_v61 = vsel %vm2293_vm4, %v4179_v63, 0.0  ;;  %v2387_v0 = vmul.f32 %v4179_v63, %v4179_v63  ;;  %v4188_v51 = vadd.f32 %v2231_v33, %v1170_v22  ;;  %v2345_v19 = vsel %vm2293_vm4, %v4175_v34, 0.0 }
 0x179   : > { %v2342_v60 = vadd.f32 %v2341_v61, %v2340_v24  ;;  %v2441_v27 = vadd.f32 %v2440_v53, %v2439_v38  ;;  %v2390_v28 = vmul.f32 %v4182_v62, %v4182_v62  ;;  %v2347_v37 = vsel %vm2293_vm4, %v4182_v62, 0.0 }
 0x17a   : > { %v3325_v8 = vpop.f32.mrb[28].mxu0  ;;  %v2442_v52 = vsel %vm2293_vm4, %v2387_v0, 0.0  ;;  %v2343_v49 = vsel %vm2293_vm4, %v4188_v51, 0.0  ;;  %v2388_v56 = vmul.f32 %v4188_v51, %v4188_v51  ;;  %v2446_v26 = vsel %vm2293_vm4, %v2389_v17, 0.0 }
 0x17b   : > { %v2244_v48 = vpop.f32.mrb[29].mxu0  ;;  %v2344_v57 = vadd.f32 %v2343_v49, %v2342_v60  ;;  %v2443_v50 = vadd.f32 %v2442_v52, %v2441_v27  ;;  %v2448_v22 = vsel %vm2293_vm4, %v2390_v28, 0.0 }
 0x17c   : > { %v3326_v4 = vpop.f32.mrb[30].mxu0  ;;  %v2444_v11 = vsel %vm2293_vm4, %v2388_v56, 0.0  ;;  %v3257_v25 = vpop.f32.mrb[28].mxu1 }
 0x17d   : > { %v2247_v1 = vpop.f32.mrb[31].mxu0  ;;  %v2346_v6 = vadd.f32 %v2345_v19, %v2344_v57  ;;  %v4203_v33 = vadd.f32 %v3325_v8, %v3257_v25  ;;  %v1183_v9 = vpop.f32.mrb[29].mxu1  ;;  %v2445_v13 = vadd.f32 %v2444_v11, %v2443_v50 }
 0x17e   : > { %v4207_v20 = vadd.f32 %v2244_v48, %v1183_v9  ;;  %v3258_v18 = vpop.f32.mrb[30].mxu1 }
 0x17f   : > { %v2348_v31 = vadd.f32 %v2347_v37, %v2346_v6  ;;  %v4210_v12 = vadd.f32 %v3326_v4, %v3258_v18  ;;  %v1186_v21 = vpop.f32.mrb[31].mxu1  ;;  %v2447_v30 = vadd.f32 %v2446_v26, %v2445_v13  ;;  %v2393_v8 = vmul.f32 %v4203_v33, %v4203_v33 }
 0x180   : > { %v2349_v46 = vsel %vm2293_vm4, %v4207_v20, 0.0  ;;  %v2391_v2 = vmul.f32 %v4207_v20, %v4207_v20  ;;  %v4216_v24 = vadd.f32 %v2247_v1, %v1186_v21  ;;  %v2353_v52 = vsel %vm2293_vm4, %v4203_v33, 0.0 }
 0x181   : > { %v2350_v38 = vadd.f32 %v2349_v46, %v2348_v31  ;;  %v2449_v61 = vadd.f32 %v2448_v22, %v2447_v30  ;;  %v2394_v17 = vmul.f32 %v4210_v12, %v4210_v12  ;;  %v2355_v57 = vsel %vm2293_vm4, %v4210_v12, 0.0 }
 0x182   : > { %v2450_v0 = vsel %vm2293_vm4, %v2391_v2, 0.0  ;;  %v2351_v53 = vsel %vm2293_vm4, %v4216_v24, 0.0  ;;  %v2392_v60 = vmul.f32 %v4216_v24, %v4216_v24  ;;  %v2454_v50 = vsel %vm2293_vm4, %v2393_v8, 0.0 }
 0x183   : > { %v2352_v27 = vadd.f32 %v2351_v53, %v2350_v38  ;;  %v2451_v49 = vadd.f32 %v2450_v0, %v2449_v61  ;;  %v2456_v25 = vsel %vm2293_vm4, %v2394_v17, 0.0  ;;  %v2475_v8 = vlaneseq }
 0x184   : > { %v2452_v56 = vsel %vm2293_vm4, %v2392_v60, 0.0 }
 0x185   : > { %v2354_v48 = vadd.f32 %v2353_v52, %v2352_v27  ;;  %v2453_v19 = vadd.f32 %v2452_v56, %v2451_v49  ;;  %v2476_v27 = vshrl.u32 %v2475_v8, 7  ;;  %v2291_v52 = vld [vmem:[%s4520_s2] sm:$0x1] }
 0x187   : > { %v2356_v4 = vadd.f32 %v2355_v57, %v2354_v48  ;;  %v2455_v11 = vadd.f32 %v2454_v50, %v2453_v19  ;;  %v2477_v49 = vsub.s32 0, %v2476_v27  ;;  %v2292_v48 = vld [vmem:[%s4521_s3] sm:$0x1] }
 0x189   : > { %v2357_v28 = vrot.slane %v2356_v4, 4  ;;  %v2457_v1 = vadd.f32 %v2456_v25, %v2455_v11 }
 0x18b   : > { %v2358_v6 = vadd.f32 %v2357_v28, %v2356_v4  ;;  %v2458_v9 = vrot.slane %v2457_v1, 4 }
 0x18d   : > { %v2359_v37 = vrot.slane %v2358_v6, 2  ;;  %v2459_v13 = vadd.f32 %v2458_v9, %v2457_v1 }
 0x18f   : > { %v2360_v18 = vadd.f32 %v2359_v37, %v2358_v6  ;;  %v2460_v26 = vrot.slane %v2459_v13, 2 }
 0x191   : > { %v2361_v31 = vrot.slane %v2360_v18, 1  ;;  %v2461_v21 = vadd.f32 %v2460_v26, %v2459_v13 }
 0x193   : > { %v2362_v30 = vadd.f32 %v2361_v31, %v2360_v18  ;;  %v2462_v46 = vrot.slane %v2461_v21, 1 }
 0x195   : > { %v2464_v2 = vmul.f32 0.00390625, %v2362_v30  ;;  %v2463_v22 = vadd.f32 %v2462_v46, %v2461_v21 }
 0x197   : > { %v2466_v38 = vmul.f32 %v2464_v2, %v2464_v2  ;;  %v2465_v61 = vmul.f32 0.00390625, %v2463_v22 }
 0x199   : > { %v2467_v0 = vsub.f32 %v2465_v61, %v2466_v38 }
 0x19b   : > { %v2468_v53 = vmax.f32 %v2467_v0, 0.0 }
 0x19d   : > { %v2469_v60 = vadd.f32 1e-05, %v2468_v53 }
 0x19f   : > { %3468 = vrsqrt.f32 %v2469_v60 }
 0x1a9   : > { %v3469_v56 = vpop.eup %3468 }
 0x1aa   : > { %v2471_v17 = vmul.f32 %v3469_v56, %v2291_v52 }
 0x1ac   : > { %v2472_v57 = vmul.f32 %v2471_v17, %v2464_v2  ;;  %v2478_v19 = vrot.slane %v2471_v17, %v2477_v49 }
 0x1ae   : > { %v2473_v50 = vsub.f32 %v2292_v48, %v2472_v57  ;;  %v2480_v4 = vmul.f32 %v4013_v32, %v2478_v19  ;;  %v2481_v11 = vmul.f32 %v4019_v23, %v2478_v19  ;;  %v2482_v25 = vmul.f32 %v4011_v10, %v2478_v19 }
 0x1af   : > { %v2483_v28 = vmul.f32 %v4015_v59, %v2478_v19  ;;  %v2484_v1 = vmul.f32 %v4040_v47, %v2478_v19  ;;  %v2485_v6 = vmul.f32 %v4049_v54, %v2478_v19  ;;  %v2486_v9 = vmul.f32 %v4035_v40, %v2478_v19 }
 0x1b0   : > { %v2487_v37 = vmul.f32 %v4047_v16, %v2478_v19  ;;  %v2488_v13 = vmul.f32 %v4067_v7, %v2478_v19  ;;  %v2489_v18 = vmul.f32 %v4076_v14, %v2478_v19  ;;  %v2490_v32 = vmul.f32 %v4063_v39, %v2478_v19 }
 0x1b1   : > { %v2491_v23 = vmul.f32 %v4070_v15, %v2478_v19  ;;  %v2492_v10 = vmul.f32 %v4095_v58, %v2478_v19  ;;  %v2493_v59 = vmul.f32 %v4104_v44, %v2478_v19  ;;  %v2494_v47 = vmul.f32 %v4091_v42, %v2478_v19 }
 0x1b2   : > { %v2495_v54 = vmul.f32 %v4098_v29, %v2478_v19  ;;  %v2496_v40 = vmul.f32 %v4123_v55, %v2478_v19  ;;  %v2503_v16 = vmul.f32 %v4154_v45, %v2478_v19  ;;  %v2504_v7 = vmul.f32 %v4179_v63, %v2478_v19 }
 0x1b3   : > { %v2505_v14 = vmul.f32 %v4188_v51, %v2478_v19  ;;  %v2506_v39 = vmul.f32 %v4175_v34, %v2478_v19  ;;  %v2507_v15 = vmul.f32 %v4182_v62, %v2478_v19  ;;  %v2508_v58 = vmul.f32 %v4207_v20, %v2478_v19 }
 0x1b4   : > { %v2509_v44 = vmul.f32 %v4216_v24, %v2478_v19  ;;  %v2510_v42 = vmul.f32 %v4203_v33, %v2478_v19  ;;  %v2497_v29 = vmul.f32 %v4132_v43, %v2478_v19  ;;  %v2498_v55 = vmul.f32 %v4119_v41, %v2478_v19 }
 0x1b5   : > { %v2511_v45 = vmul.f32 %v4210_v12, %v2478_v19  ;;  %v2516_v26 = vrot.slane %v2473_v50, %v2477_v49  ;;  %v2499_v63 = vmul.f32 %v4126_v35, %v2478_v19  ;;  %v2500_v51 = vmul.f32 %v4151_v3, %v2478_v19 }
 0x1b6   : > { %v2501_v34 = vmul.f32 %v4160_v5, %v2478_v19  ;;  %v2502_v62 = vmul.f32 %v4147_v36, %v2478_v19 }
 0x1b7   : > { %v2518_v20 = vadd.f32 %v2516_v26, %v2480_v4  ;;  %v2519_v31 = vadd.f32 %v2516_v26, %v2481_v11  ;;  %v2520_v24 = vadd.f32 %v2516_v26, %v2482_v25  ;;  %v2521_v21 = vadd.f32 %v2516_v26, %v2483_v28 }
 0x1b8   : > { %v2522_v33 = vadd.f32 %v2516_v26, %v2484_v1  ;;  %v2523_v30 = vadd.f32 %v2516_v26, %v2485_v6  ;;  %v2524_v43 = vadd.f32 %v2516_v26, %v2486_v9  ;;  %v4273_v46 = vadd.f32 %v2516_v26, %v2487_v37 }
 0x1b9   : > { %v4275_v41 = vadd.f32 %v2516_v26, %v2488_v13  ;;  %v4277_v12 = vadd.f32 %v2516_v26, %v2489_v18  ;;  %v4279_v35 = vadd.f32 %v2516_v26, %v2490_v32  ;;  %v4281_v3 = vadd.f32 %v2516_v26, %v2491_v23 }
 0x1ba   : > { %v4283_v5 = vadd.f32 %v2516_v26, %v2492_v10  ;;  %v4285_v36 = vadd.f32 %v2516_v26, %v2493_v59  ;;  %v4287_v2 = vadd.f32 %v2516_v26, %v2494_v47  ;;  %v4289_v22 = vadd.f32 %v2516_v26, %v2495_v54 }
 0x1bb   : > { %v4291_v38 = vadd.f32 %v2516_v26, %v2496_v40  ;;  %v4293_v61 = vadd.f32 %v2516_v26, %v2497_v29  ;;  %v4295_v0 = vadd.f32 %v2516_v26, %v2498_v55  ;;  %v4297_v53 = vadd.f32 %v2516_v26, %v2499_v63 }
 0x1bc   : > { %v4299_v60 = vadd.f32 %v2516_v26, %v2500_v51  ;;  %v4301_v8 = vadd.f32 %v2516_v26, %v2501_v34  ;;  %v4303_v27 = vadd.f32 %v2516_v26, %v2502_v62  ;;  %v4305_v52 = vadd.f32 %v2516_v26, %v2503_v16 }
 0x1bd   : > { %v4307_v49 = vadd.f32 %v2516_v26, %v2504_v7  ;;  %v4309_v56 = vadd.f32 %v2516_v26, %v2505_v14  ;;  %v4311_v17 = vadd.f32 %v2516_v26, %v2506_v39  ;;  %v4313_v48 = vadd.f32 %v2516_v26, %v2507_v15 }
 0x1be   : > { %v4315_v57 = vadd.f32 %v2516_v26, %v2508_v58  ;;  %v4317_v19 = vadd.f32 %v2516_v26, %v2509_v44  ;;  %v4319_v50 = vadd.f32 %v2516_v26, %v2510_v42  ;;  %v4321_v4 = vadd.f32 %v2516_v26, %v2511_v45 }
 0x1bf   : > { %v2550_v11 = vmul.f32 0.2, %v2518_v20  ;;  %v2551_v25 = vmul.f32 0.2, %v2519_v31  ;;  %v2552_v28 = vmul.f32 0.2, %v2520_v24 }
 0x1c0   : > { %v2553_v1 = vmul.f32 0.2, %v2521_v21  ;;  %v2554_v6 = vmul.f32 0.2, %v2522_v33  ;;  %v2555_v9 = vmul.f32 0.2, %v2523_v30 }
 0x1c1   : > { %v2556_v37 = vmul.f32 0.2, %v2524_v43  ;;  %v2557_v13 = vmul.f32 0.2, %v4273_v46  ;;  %v2558_v18 = vmul.f32 0.2, %v4275_v41  ;;  %v4325_v32 = vmax.f32 %v2518_v20, %v2550_v11 }
 0x1c2   : > { %v2559_v23 = vmul.f32 0.2, %v4277_v12  ;;  %v2560_v10 = vmul.f32 0.2, %v4279_v35  ;;  %v2561_v59 = vmul.f32 0.2, %v4281_v3  ;;  %v4330_v47 = vmax.f32 %v2519_v31, %v2551_v25 }
 0x1c3   : > { %v2562_v54 = vmul.f32 0.2, %v4283_v5  ;;  %v2563_v40 = vmul.f32 0.2, %v4285_v36  ;;  %v2564_v16 = vmul.f32 0.2, %v4287_v2  ;;  %v4335_v7 = vmax.f32 %v2520_v24, %v2552_v28 }
 0x1c4   : > { %v2565_v14 = vmul.f32 0.2, %v4289_v22  ;;  %v2566_v39 = vmul.f32 0.2, %v4291_v38  ;;  %v2567_v15 = vmul.f32 0.2, %v4293_v61  ;;  %v4340_v58 = vmax.f32 %v2521_v21, %v2553_v1 }
 0x1c5   : > { %4525 = vst [vmem:[#allocation2_spill] sm:$0xff] %v4335_v7  ;;  %v2568_v44 = vmul.f32 0.2, %v4295_v0  ;;  %v2569_v42 = vmul.f32 0.2, %v4297_v53  ;;  %v2586_v55 = vmax.f32 %v2522_v33, %v2554_v6  ;;  %v2587_v51 = vmax.f32 %v2523_v30, %v2555_v9 }
 0x1c6   : > { %4526 = vst [vmem:[#allocation3_spill] sm:$0xff] %v4340_v58  ;;  %v2570_v29 = vmul.f32 0.2, %v4299_v60  ;;  %v2571_v45 = vmul.f32 0.2, %v4301_v8  ;;  %v2588_v31 = vmax.f32 %v2524_v43, %v2556_v37  ;;  %v2589_v11 = vmax.f32 %v4273_v46, %v2557_v13 }
 0x1c7   : > { %v2572_v26 = vmul.f32 0.2, %v4303_v27  ;;  %v2573_v63 = vmul.f32 0.2, %v4305_v52  ;;  %v2574_v34 = vmul.f32 0.2, %v4307_v49  ;;  %v2590_v28 = vmax.f32 %v4275_v41, %v2558_v18 }
 0x1c8   : > { %v2575_v62 = vmul.f32 0.2, %v4309_v56  ;;  %v2576_v20 = vmul.f32 0.2, %v4311_v17  ;;  %v2577_v24 = vmul.f32 0.2, %v4313_v48  ;;  %v2591_v1 = vmax.f32 %v4277_v12, %v2559_v23 }
 0x1c9   : > { %v2578_v21 = vmul.f32 0.2, %v4315_v57  ;;  %v2579_v33 = vmul.f32 0.2, %v4317_v19  ;;  %v2580_v25 = vmul.f32 0.2, %v4319_v50  ;;  %v2592_v6 = vmax.f32 %v4279_v35, %v2560_v10 }
 0x1ca   : > { %v2581_v30 = vmul.f32 0.2, %v4321_v4  ;;  %v2593_v43 = vmax.f32 %v4281_v3, %v2561_v59  ;;  %v2594_v9 = vmax.f32 %v4283_v5, %v2562_v54  ;;  %v2595_v37 = vmax.f32 %v4285_v36, %v2563_v40 }
 0x1cb   : > { %v2596_v58 = vmax.f32 %v4287_v2, %v2564_v16  ;;  %v2597_v46 = vmax.f32 %v4289_v22, %v2565_v14  ;;  %v2598_v13 = vmax.f32 %v4291_v38, %v2566_v39  ;;  %v2599_v7 = vmax.f32 %v4293_v61, %v2567_v15 }
 0x1cc   : > { %v4369_v41 = vmax.f32 %v4295_v0, %v2568_v44  ;;  %v4372_v12 = vmax.f32 %v4297_v53, %v2569_v42  ;;  %v4375_v35 = vmax.f32 %v4299_v60, %v2570_v29  ;;  %v4378_v3 = vmax.f32 %v4301_v8, %v2571_v45 }
 0x1cd   : > { %v4381_v5 = vmax.f32 %v4303_v27, %v2572_v26  ;;  %v4384_v36 = vmax.f32 %v4305_v52, %v2573_v63  ;;  %v4387_v2 = vmax.f32 %v4307_v49, %v2574_v34  ;;  %v4390_v22 = vmax.f32 %v4309_v56, %v2575_v62  ;;  %v4527_v49 = vld [vmem:[#allocation2_spill] sm:$0xff] }
 0x1ce   : > { %v4398_v38 = vmax.f32 %v4311_v17, %v2576_v20  ;;  %v4401_v61 = vmax.f32 %v4313_v48, %v2577_v24  ;;  %v4404_v0 = vmax.f32 %v4315_v57, %v2578_v21  ;;  %v4407_v53 = vmax.f32 %v4317_v19, %v2579_v33  ;;  %v4528_v17 = vld [vmem:[#allocation3_spill] sm:$0xff] }
 0x1cf   : > { %v4410_v60 = vmax.f32 %v4319_v50, %v2580_v25  ;;  %v4413_v8 = vmax.f32 %v4321_v4, %v2581_v30  ;;  %v3091_v27 = vpack.c.bf16 %v4325_v32, %v4325_v32  ;;  %v3092_v52 = vpack.c.bf16 %v4330_v47, %v4330_v47 }
 0x1d0   : > { %v3093_v56 = vpack.c.bf16 %v4527_v49, %v4527_v49  ;;  %v3094_v48 = vpack.c.bf16 %v4528_v17, %v4528_v17  ;;  %v3095_v57 = vpack.c.bf16 %v2586_v55, %v2586_v55  ;;  %v3096_v19 = vpack.c.bf16 %v2587_v51, %v2587_v51 }
 0x1d1   : > { %v3097_v50 = vpack.c.bf16 %v2588_v31, %v2588_v31  ;;  %v3098_v4 = vpack.c.bf16 %v2589_v11, %v2589_v11  ;;  %v3099_v18 = vpack.c.bf16 %v2590_v28, %v2590_v28  ;;  %v3100_v32 = vpack.c.bf16 %v2591_v1, %v2591_v1  ;;  %2743 = vst.msk [vmem:[%s4395_s10] sm:$0xf] %vm2742_vm5, %v3091_v27 }
 0x1d2   : > { %2744 = vst.msk [vmem:[%s4395_s10 + $0x4] sm:$0xf] %vm2742_vm5, %v3092_v52  ;;  %v3101_v23 = vpack.c.bf16 %v2592_v6, %v2592_v6  ;;  %v3102_v10 = vpack.c.bf16 %v2593_v43, %v2593_v43  ;;  %v3103_v59 = vpack.c.bf16 %v2594_v9, %v2594_v9  ;;  %v3104_v47 = vpack.c.bf16 %v2595_v37, %v2595_v37 }
 0x1d3   : > { %2745 = vst.msk [vmem:[%s4395_s10 + $0x8] sm:$0xf] %vm2742_vm5, %v3093_v56  ;;  %2746 = vst.msk [vmem:[%s4395_s10 + $0xc] sm:$0xf] %vm2742_vm5, %v3094_v48  ;;  %v3105_v54 = vpack.c.bf16 %v2596_v58, %v2596_v58  ;;  %v3106_v40 = vpack.c.bf16 %v2597_v46, %v2597_v46  ;;  %v3107_v16 = vpack.c.bf16 %v2598_v13, %v2598_v13 }
 0x1d4   : > { %2747 = vst.msk [vmem:[%s4395_s10 + $0x10] sm:$0xf] %vm2742_vm5, %v3095_v57  ;;  %2748 = vst.msk [vmem:[%s4395_s10 + $0x14] sm:$0xf] %vm2742_vm5, %v3096_v19  ;;  %v3108_v14 = vpack.c.bf16 %v2599_v7, %v2599_v7  ;;  %v3109_v39 = vpack.c.bf16 %v4369_v41, %v4369_v41  ;;  %v3110_v15 = vpack.c.bf16 %v4372_v12, %v4372_v12 }
 0x1d5   : > { %2749 = vst.msk [vmem:[%s4395_s10 + $0x18] sm:$0xf] %vm2742_vm5, %v3097_v50  ;;  %2750 = vst.msk [vmem:[%s4395_s10 + $0x1c] sm:$0xf] %vm2742_vm5, %v3098_v4  ;;  %v3111_v7 = vpack.c.bf16 %v4375_v35, %v4375_v35  ;;  %v3112_v58 = vpack.c.bf16 %v4378_v3, %v4378_v3  ;;  %v3113_v44 = vpack.c.bf16 %v4381_v5, %v4381_v5 }
 0x1d6   : > { %2751 = vst.msk [vmem:[%s4395_s10 + $0x20] sm:$0xf] %vm2742_vm5, %v3099_v18  ;;  %2752 = vst.msk [vmem:[%s4395_s10 + $0x24] sm:$0xf] %vm2742_vm5, %v3100_v32  ;;  %v3114_v42 = vpack.c.bf16 %v4384_v36, %v4384_v36  ;;  %v3115_v29 = vpack.c.bf16 %v4387_v2, %v4387_v2  ;;  %v3116_v55 = vpack.c.bf16 %v4390_v22, %v4390_v22 }
 0x1d7   : > { %2753 = vst.msk [vmem:[%s4395_s10 + $0x28] sm:$0xf] %vm2742_vm5, %v3101_v23  ;;  %2754 = vst.msk [vmem:[%s4395_s10 + $0x2c] sm:$0xf] %vm2742_vm5, %v3102_v10  ;;  %v3117_v45 = vpack.c.bf16 %v4398_v38, %v4398_v38  ;;  %v3118_v26 = vpack.c.bf16 %v4401_v61, %v4401_v61  ;;  %v3119_v63 = vpack.c.bf16 %v4404_v0, %v4404_v0 }
 0x1d8   : > { %2755 = vst.msk [vmem:[%s4395_s10 + $0x30] sm:$0xf] %vm2742_vm5, %v3103_v59  ;;  %2756 = vst.msk [vmem:[%s4395_s10 + $0x34] sm:$0xf] %vm2742_vm5, %v3104_v47  ;;  %v3120_v51 = vpack.c.bf16 %v4407_v53, %v4407_v53  ;;  %v3121_v34 = vpack.c.bf16 %v4410_v60, %v4410_v60  ;;  %v3122_v62 = vpack.c.bf16 %v4413_v8, %v4413_v8 }
 0x1d9   : > { %2757 = vst.msk [vmem:[%s4395_s10 + $0x38] sm:$0xf] %vm2742_vm5, %v3105_v54  ;;  %2758 = vst.msk [vmem:[%s4395_s10 + $0x3c] sm:$0xf] %vm2742_vm5, %v3106_v40 }
 0x1da   : > { %2759 = vst.msk [vmem:[%s4395_s10 + $0x40] sm:$0xf] %vm2742_vm5, %v3107_v16  ;;  %2760 = vst.msk [vmem:[%s4395_s10 + $0x44] sm:$0xf] %vm2742_vm5, %v3108_v14 }
 0x1db   : > { %2761 = vst.msk [vmem:[%s4395_s10 + $0x48] sm:$0xf] %vm2742_vm5, %v3109_v39  ;;  %2762 = vst.msk [vmem:[%s4395_s10 + $0x4c] sm:$0xf] %vm2742_vm5, %v3110_v15 }
 0x1dc   : > { %2763 = vst.msk [vmem:[%s4395_s10 + $0x50] sm:$0xf] %vm2742_vm5, %v3111_v7  ;;  %2764 = vst.msk [vmem:[%s4395_s10 + $0x54] sm:$0xf] %vm2742_vm5, %v3112_v58 }
 0x1dd   : > { %2765 = vst.msk [vmem:[%s4395_s10 + $0x58] sm:$0xf] %vm2742_vm5, %v3113_v44  ;;  %2766 = vst.msk [vmem:[%s4395_s10 + $0x5c] sm:$0xf] %vm2742_vm5, %v3114_v42 }
 0x1de   : > { %2767 = vst.msk [vmem:[%s4395_s10 + $0x60] sm:$0xf] %vm2742_vm5, %v3115_v29  ;;  %2768 = vst.msk [vmem:[%s4395_s10 + $0x64] sm:$0xf] %vm2742_vm5, %v3116_v55 }
 0x1df   : > { %2769 = vst.msk [vmem:[%s4395_s10 + $0x68] sm:$0xf] %vm2742_vm5, %v3117_v45  ;;  %2770 = vst.msk [vmem:[%s4395_s10 + $0x6c] sm:$0xf] %vm2742_vm5, %v3118_v26 }
 0x1e0   : > { %2771 = vst.msk [vmem:[%s4395_s10 + $0x70] sm:$0xf] %vm2742_vm5, %v3119_v63  ;;  %2772 = vst.msk [vmem:[%s4395_s10 + $0x74] sm:$0xf] %vm2742_vm5, %v3120_v51 }
 0x1e1   : > { %2773 = vst.msk [vmem:[%s4395_s10 + $0x78] sm:$0xf] %vm2742_vm5, %v3121_v34  ;;  %2774 = vst.msk [vmem:[%s4395_s10 + $0x7c] sm:$0xf] %vm2742_vm5, %v3122_v62 }
 0x1e2 PF: > { %s14_s15 = sadd.s32 1, %s3476_s15  }
 0x1e3   : > { %p11_p4 = scmp.ge.s32.totalorder %s14_s15, 4  }
 0x1e5   :  { %13 = sbr.rel (!%p11_p4) target bundleno = 1 (0x1), region = 70 }

// kernel: cnn_dis_forward.4
= control target key start
LH: loop header
LB: loop body
LE: loop exit
PB: predicated region body
PF: predicated region fallthrough
CT: control target
= control target key end

     0   :  { %s2137_s15 = smov 0   ;;  %s2547_s0 = inlined_call_operand.vmem [shape: bf16[2,9,9,256], index: 0, kind: input, shape index: {}]   ;;  %s2548_s1 = inlined_call_operand.vmem [shape: bf16[4,256,128], index: 1, kind: input, shape index: {}]   ;;  %s2549_s2 = inlined_call_operand.vmem [shape: f32[1,128], index: 2, kind: input, shape index: {}]   ;;  %s2550_s3 = inlined_call_operand.vmem [shape: f32[1,128], index: 3, kind: input, shape index: {}]   ;;  %s2551_s4 = inlined_call_operand.vmem [shape: bf16[2,64,128], index: 4, kind: output, shape index: {}]  }
   0x1 LB: > { %s1587_s16 = sadd.s32 4294967295, %s2110_s15   ;;  %p1591_p0 = scmp.ge.s32.totalorder %s2110_s15, 1  ;;  %s2110_s15 = sphi %s2137_s15, %s14_s15  }
   0x2   : > { %p162_p1 = scmp.lt.s32.totalorder %s2110_s15, 3 }
   0x4   : > { %p163_p2 = pnand %p1591_p0, %p162_p1 }
   0x5   : > { %v2022_v0 = vld [vmem:[%s2548_s1 + $0xc0] sm:$0xff] (!%p163_p2)   ;;  %v2026_v4 = vld [vmem:[%s2548_s1 + $0xc8] sm:$0xff] (!%p163_p2)   ;;  %v2030_v8 = vld [vmem:[%s2548_s1 + $0xd0] sm:$0xff] (!%p163_p2)   ;;  %p188_p3 = scmp.lt.s32.totalorder (!%p163_p2), %s1587_s16, 1  ;;  %vm247_vm0 = vsmask.f32 (!%p163_p2), 3328 }
   0x6   : > { %166 = sbr.rel (%p163_p2) target bundleno = 370 (0x172), region = 36  ;;  %v2023_v1 = vld [vmem:[%s2548_s1 + $0x40] sm:$0xff] (!%p163_p2)   ;;  %1853 = vmatprep.subr.bf16.mxu0 (!%p163_p2), %v2022_v0  ;;  %v2027_v5 = vld [vmem:[%s2548_s1 + $0x48] sm:$0xff] (!%p163_p2)   ;;  %v2031_v9 = vld [vmem:[%s2548_s1 + $0x50] sm:$0xff] (!%p163_p2)   ;;  %vm248_vm1 = vsmask.f32 (!%p163_p2), 7440 }
   0x7   : > { %v2024_v2 = vld [vmem:[%s2548_s1 + $0x80] sm:$0xff] (!%p163_p2)   ;;  %1893 = vmatprep.subr.bf16.mxu1 (!%p163_p2), %v2023_v1  ;;  %v2028_v6 = vld [vmem:[%s2548_s1 + $0x88] sm:$0xff] (!%p163_p2)   ;;  %v2032_v10 = vld [vmem:[%s2548_s1 + $0x90] sm:$0xff] (!%p163_p2)  }
   0x8   : > { %v2025_v3 = vld [vmem:[%s2548_s1] sm:$0xff] (!%p163_p2)   ;;  %1854 = vmatpush3.bf16.msra.mxu0 (!%p163_p2), %v2024_v2  ;;  %v2029_v7 = vld [vmem:[%s2548_s1 + $0x8] sm:$0xff] (!%p163_p2)   ;;  %v2033_v11 = vld [vmem:[%s2548_s1 + $0x10] sm:$0xff] (!%p163_p2)  }
   0x9   : > { %1894 = vmatpush3.bf16.msra.mxu1 (!%p163_p2), %v2025_v3  ;;  %1855 = vmatprep.subr.bf16.mxu0 (!%p163_p2), %v2026_v4  ;;  %v2034_v12 = vld [vmem:[%s2548_s1 + $0xd8] sm:$0xff] (!%p163_p2)   ;;  %v2038_v16 = vld [vmem:[%s2548_s1 + $0xe0] sm:$0xff] (!%p163_p2)   ;;  %v2042_v20 = vld [vmem:[%s2548_s1 + $0xe8] sm:$0xff] (!%p163_p2)  }
   0xa   : > { %1895 = vmatprep.subr.bf16.mxu1 (!%p163_p2), %v2027_v5  ;;  %v2035_v13 = vld [vmem:[%s2548_s1 + $0x58] sm:$0xff] (!%p163_p2)   ;;  %v2039_v17 = vld [vmem:[%s2548_s1 + $0x60] sm:$0xff] (!%p163_p2)   ;;  %v2043_v21 = vld [vmem:[%s2548_s1 + $0x68] sm:$0xff] (!%p163_p2)  }
   0xb   : > { %v2036_v14 = vld [vmem:[%s2548_s1 + $0x98] sm:$0xff] (!%p163_p2)   ;;  %v2040_v18 = vld [vmem:[%s2548_s1 + $0xa0] sm:$0xff] (!%p163_p2)   ;;  %v2044_v22 = vld [vmem:[%s2548_s1 + $0xa8] sm:$0xff] (!%p163_p2)  }
   0xc   : > { %1856 = vmatpush3.bf16.msra.mxu0 (!%p163_p2), %v2028_v6  ;;  %v2037_v15 = vld [vmem:[%s2548_s1 + $0x18] sm:$0xff] (!%p163_p2)   ;;  %v2041_v19 = vld [vmem:[%s2548_s1 + $0x20] sm:$0xff] (!%p163_p2)   ;;  %v2045_v23 = vld [vmem:[%s2548_s1 + $0x28] sm:$0xff] (!%p163_p2)  }
   0xd   : > { %1896 = vmatpush3.bf16.msra.mxu1 %v2029_v7  ;;  %1857 = vmatprep.subr.bf16.mxu0 %v2030_v8  ;;  %s2555_s16 = smov (!%p188_p3, %s1587_s16), 1  ;;  %v2046_v24 = vld [vmem:[%s2548_s1 + $0xf0] sm:$0xff]   ;;  %v2050_v28 = vld [vmem:[%s2548_s1 + $0xf8] sm:$0xff]   ;;  %v2056_v46 = vld [vmem:[%s2548_s1 + $0x140] sm:$0xff]  }
   0xe   : > { %1897 = vmatprep.subr.bf16.mxu1 %v2031_v9  ;;  %v2047_v25 = vld [vmem:[%s2548_s1 + $0x70] sm:$0xff]   ;;  %s2013_s21 = smul.u32 144, %s2555_s16  ;;  %v2051_v29 = vld [vmem:[%s2548_s1 + $0x78] sm:$0xff]   ;;  %v2057_v47 = vld [vmem:[%s2548_s1 + $0x1c0] sm:$0xff]   ;;  %s1821_s9 = sshll.u32 %s2555_s16, 5 }
   0xf   : > { %v2048_v26 = vld [vmem:[%s2548_s1 + $0xb0] sm:$0xff]   ;;  %v2052_v30 = vld [vmem:[%s2548_s1 + $0xb8] sm:$0xff]   ;;  %vm2271_vm2 = vmor %vm247_vm0, %vm248_vm1  ;;  %s197_s12 = scalar_lea.vmem %s2551_s4, %s1821_s9 }
  0x10   : > { %1858 = vmatpush3.bf16.msra.mxu0 %v2032_v10  ;;  %v2049_v27 = vld [vmem:[%s2548_s1 + $0x30] sm:$0xff]   ;;  %s2245_s6 = scalar_lea.vmem %s2547_s0, %s2013_s21  ;;  %v2053_v31 = vld [vmem:[%s2548_s1 + $0x38] sm:$0xff]   ;;  %v2059_v56 = vld [vmem:[%s2548_s1 + $0x180] sm:$0xff]  }
  0x11   : > { %1898 = vmatpush3.bf16.msra.mxu1 %v2033_v11  ;;  %1859 = vmatprep.subr.bf16.mxu0 %v2034_v12  ;;  %v199_v32 = vld [vmem:[%s2245_s6] sm:$0xff]  ;;  %v2255_v33 = vld [vmem:[%s2245_s6 + $0x10] sm:$0xff]  ;;  %v239_v34 = vld [vmem:[%s2245_s6 + $0x8] sm:$0x11] }
  0x12   : > { %1899 = vmatprep.subr.bf16.mxu1 %v2035_v13  ;;  %v240_v35 = vld [vmem:[%s2245_s6 + $0x18] sm:$0x11]  ;;  %v251_v36 = vshrl.u32 %v199_v32, 16  ;;  %v254_v37 = vshll.u32 %v199_v32, 16  ;;  %v1652_v38 = vcombine.high %v199_v32, %v2255_v33  ;;  %v260_v39 = vshll.u32 %v239_v34, 16  ;;  %v2058_v59 = vld [vmem:[%s2548_s1 + $0x100] sm:$0xff]  }
  0x13   : > { %v265_v40 = vshrl.u32 %v2255_v33, 16  ;;  %v268_v41 = vshll.u32 %v2255_v33, 16  ;;  %v274_v42 = vshll.u32 %v240_v35, 16  ;;  %v1651_v45 = vcombine.low %v199_v32, %v2255_v33  ;;  %v2061_v60 = vld [vmem:[%s2548_s1 + $0x1c8] sm:$0xff]   ;;  %v2298_v2 = vld [vmem:[%s2245_s6 + $0x20] sm:$0xff]  ;;  %v2301_v3 = vld [vmem:[%s2245_s6 + $0x30] sm:$0xff] }
  0x14   : > { %1860 = vmatpush3.bf16.msra.mxu0 %v2036_v14  ;;  %v253_v43 = vrot.slane %v251_v36, 4  ;;  %v256_v44 = vrot.slane %v254_v37, 5  ;;  %756 = vmatprep.mubr.bf16.mxu1 %v1652_v38  ;;  %v262_v48 = vrot.slane %v260_v39, 5  ;;  %v2060_v62 = vld [vmem:[%s2548_s1 + $0x148] sm:$0xff]   ;;  %v242_v5 = vld [vmem:[%s2245_s6 + $0x38] sm:$0x11]  ;;  %v1654_v8 = vcombine.high %v2298_v2, %v2301_v3 }
  0x15   : > { %1900 = vmatpush3.bf16.msra.mxu1 %v2037_v15  ;;  %1861 = vmatprep.subr.bf16.mxu0 %v2038_v16  ;;  %v267_v49 = vrot.slane %v265_v40, 4  ;;  %v270_v50 = vrot.slane %v268_v41, 5  ;;  %v276_v54 = vrot.slane %v274_v42, 5  ;;  %v2063_v1 = vld [vmem:[%s2548_s1 + $0x188] sm:$0xff]   ;;  %v279_v6 = vshrl.u32 %v2298_v2, 16  ;;  %v2072_v34 = vld [vmem:[%s2548_s1 + $0x118] sm:$0xff]  }
  0x16   : > { %1901 = vmatprep.subr.bf16.mxu1 %v2039_v17  ;;  %v257_v51 = vor.u32 %v256_v44, %v253_v43  ;;  %v241_v4 = vld [vmem:[%s2245_s6 + $0x28] sm:$0x11]  ;;  %v282_v7 = vshll.u32 %v2298_v2, 16  ;;  %v1653_v9 = vcombine.low %v2298_v2, %v2301_v3  ;;  %v293_v11 = vshrl.u32 %v2301_v3, 16  ;;  %v2067_v17 = vld [vmem:[%s2548_s1 + $0x1d0] sm:$0xff]   ;;  %v2073_v37 = vld [vmem:[%s2548_s1 + $0x198] sm:$0xff]  }
  0x17   : > { %v271_v53 = vor.u32 %v270_v50, %v267_v49  ;;  %v288_v10 = vshll.u32 %v241_v4, 16  ;;  %v296_v12 = vshll.u32 %v2301_v3, 16  ;;  %v302_v13 = vshll.u32 %v242_v5, 16  ;;  %v2062_v14 = vld [vmem:[%s2548_s1 + $0x108] sm:$0xff]   ;;  %v2351_v38 = vld [vmem:[%s2245_s6 + $0x40] sm:$0xff]  ;;  %v2354_v39 = vld [vmem:[%s2245_s6 + $0x50] sm:$0xff] }
  0x18   : > { %1862 = vmatpush3.bf16.msra.mxu0 %v2040_v18  ;;  %v258_v55 = vrot.slane %v257_v51, 4  ;;  %v281_v15 = vrot.slane %v279_v6, 4  ;;  %v284_v16 = vrot.slane %v282_v7, 5  ;;  %v243_v40 = vld [vmem:[%s2245_s6 + $0x48] sm:$0x11]  ;;  %v307_v42 = vshrl.u32 %v2351_v38, 16 }
  0x19   : > { %1902 = vmatpush3.bf16.msra.mxu1 %v2041_v19  ;;  %1863 = vmatprep.subr.bf16.mxu0 %v2042_v20  ;;  %v2278_v57 = vrot.slane %v271_v53, 4  ;;  %v290_v18 = vrot.slane %v288_v10, 5  ;;  %v295_v19 = vrot.slane %v293_v11, 4  ;;  %v298_v20 = vrot.slane %v296_v12, 5  ;;  %v244_v41 = vld [vmem:[%s2245_s6 + $0x58] sm:$0x11] }
  0x1a   : > { %1903 = vmatprep.subr.bf16.mxu1 %v2043_v21  ;;  %v263_v58 = vsel %vm2271_vm2, %v258_v55, %v262_v48  ;;  %v2066_v21 = vld [vmem:[%s2548_s1 + $0x150] sm:$0xff]   ;;  %v310_v43 = vshll.u32 %v2351_v38, 16  ;;  %v1656_v44 = vcombine.high %v2351_v38, %v2354_v39  ;;  %v324_v48 = vshll.u32 %v2354_v39, 16  ;;  %v2076_v53 = vld [vmem:[%s2548_s1 + $0x160] sm:$0xff]   ;;  %v2080_v4 = vld [vmem:[%s2548_s1 + $0x168] sm:$0xff]  }
  0x1b   : > { %v277_v61 = vsel %vm2271_vm2, %v2278_v57, %v276_v54  ;;  %v330_v49 = vshll.u32 %v244_v41, 16  ;;  %v309_v50 = vrot.slane %v307_v42, 4  ;;  %v2077_v54 = vld [vmem:[%s2548_s1 + $0x1e0] sm:$0xff]   ;;  %v2081_v6 = vld [vmem:[%s2548_s1 + $0x1e8] sm:$0xff]   ;;  %v2089_v41 = vld [vmem:[%s2548_s1 + $0x1b0] sm:$0xff]  }
  0x1c   : > { %1864 = vmatpush3.bf16.msra.mxu0 %v2044_v22  ;;  %v1627_v63 = vcombine.low %v263_v58, %v277_v61  ;;  %v1628_v0 = vcombine.high %v263_v58, %v277_v61  ;;  %v285_v22 = vor.u32 %v284_v16, %v281_v15  ;;  %v312_v51 = vrot.slane %v310_v43, 5  ;;  %v2083_v11 = vld [vmem:[%s2548_s1 + $0x1a8] sm:$0xff]   ;;  %v2401_v12 = vld [vmem:[%s2245_s6 + $0x60] sm:$0xff]  ;;  %v246_v15 = vld [vmem:[%s2245_s6 + $0x78] sm:$0x11] }
  0x1d   : > { %1904 = vmatpush3.bf16.msra.mxu1 %v2045_v23  ;;  %1865 = vmatprep.subr.bf16.mxu0 %v2046_v24  ;;  %v299_v23 = vor.u32 %v298_v20, %v295_v19  ;;  %v304_v24 = vrot.slane %v302_v13, 5  ;;  %v326_v58 = vrot.slane %v324_v48, 5  ;;  %v332_v61 = vrot.slane %v330_v49, 5  ;;  %v2404_v13 = vld [vmem:[%s2245_s6 + $0x70] sm:$0xff]  ;;  %v2090_v43 = vld [vmem:[%s2548_s1 + $0x178] sm:$0xff]  }
  0x1e   : > { %1905 = vmatprep.subr.bf16.mxu1 %v2047_v25  ;;  %555 = vmatprep.mubr.bf16.mxu0 %v1628_v0  ;;  %v2068_v25 = vld [vmem:[%s2548_s1 + $0x110] sm:$0xff]   ;;  %v2079_v0 = vld [vmem:[%s2548_s1 + $0x1a0] sm:$0xff]   ;;  %v335_v16 = vshrl.u32 %v2401_v12, 16  ;;  %v1657_v19 = vcombine.low %v2401_v12, %v2404_v13 }
  0x20   : > { %1866 = vmatpush3.bf16.msra.mxu0 %v2048_v26  ;;  %v2325_v26 = vrot.slane %v285_v22, 4  ;;  %v352_v22 = vshll.u32 %v2404_v13, 16 }
  0x21   : > { %1906 = vmatpush3.bf16.msra.mxu1 %v2049_v27  ;;  %1867 = vmatprep.subr.bf16.mxu0 %v2050_v28  ;;  %v2069_v27 = vld [vmem:[%s2548_s1 + $0x190] sm:$0xff]   ;;  %v2330_v28 = vrot.slane %v299_v23, 4  ;;  %v358_v23 = vshll.u32 %v246_v15, 16  ;;  %v1682_v15 = vld [vmem:[%s2245_s6 + $0x80] sm:$0xff] }
  0x22   : > { %1907 = vmatprep.subr.bf16.mxu1 %v2051_v29  ;;  %v2070_v29 = vld [vmem:[%s2548_s1 + $0x158] sm:$0xff]  }
  0x23   : > { %v305_v32 = vsel %vm2271_vm2, %v2330_v28, %v304_v24  ;;  %v337_v24 = vrot.slane %v335_v16, 4 }
  0x24   : > { %1868 = vmatpush3.bf16.msra.mxu0 %v2052_v30  ;;  %v291_v30 = vsel %vm2271_vm2, %v2325_v26, %v290_v18  ;;  %v1658_v18 = vcombine.high %v2401_v12, %v2404_v13 }
  0x25   : > { %1908 = vmatpush3.bf16.msra.mxu1 %v2053_v31  ;;  %1933 = vmatprep.subr.bf16.mxu0 %v2056_v46  ;;  %v2071_v31 = vld [vmem:[%s2548_s1 + $0x1d8] sm:$0xff]   ;;  %v1630_v35 = vcombine.high %v291_v30, %v305_v32  ;;  %v1629_v36 = vcombine.low %v291_v30, %v305_v32  ;;  %v316_v46 = vshll.u32 %v243_v40, 16  ;;  %v354_v32 = vrot.slane %v352_v22, 5 }
  0x26   : > { %1973 = vmatprep.subr.bf16.mxu1 %v2057_v47  ;;  %v321_v47 = vshrl.u32 %v2354_v39, 16  ;;  %v1752_v22 = vld [vmem:[%s2245_s6 + $0x78] sm:$0x11] }
  0x27   : > { %556 = vmatmul.mubr.bf16.vlgmr.msra.gmra.mrb[0].mxu0 %v1627_v63  ;;  %v318_v55 = vrot.slane %v316_v46, 5 }
  0x28   : > { %757 = vmatmul.mubr.bf16.vlgmr.msra.gmra.mrb[0].mxu1 %v1651_v45  ;;  %1934 = vmatpush3.bf16.msra.mxu0 %v2058_v59  ;;  %v1655_v45 = vcombine.low %v2351_v38, %v2354_v39  ;;  %v313_v59 = vor.u32 %v312_v51, %v309_v50  ;;  %v2093_v50 = vld [vmem:[%s2548_s1 + $0x1b8] sm:$0xff]   ;;  %v1716_v51 = vcombine.high %v2255_v33, %v2298_v2 }
  0x29   : > { %1974 = vmatpush3.bf16.msra.mxu1 %v2059_v56  ;;  %764 = vmatprep.mubr.bf16.mxu1 %v1654_v8  ;;  %v323_v56 = vrot.slane %v321_v47, 4  ;;  %v2082_v8 = vld [vmem:[%s2548_s1 + $0x128] sm:$0xff]   ;;  %v2092_v47 = vld [vmem:[%s2548_s1 + $0x138] sm:$0xff]  }
  0x2a   : > { %1975 = vmatprep.subr.bf16.mxu1 %v2061_v60  ;;  %1935 = vmatprep.subr.bf16.mxu0 %v2060_v62  ;;  %v2078_v62 = vld [vmem:[%s2548_s1 + $0x120] sm:$0xff]   ;;  %v2375_v63 = vrot.slane %v313_v59, 4  ;;  %v1746_v59 = vld [vmem:[%s2245_s6 + $0x48] sm:$0x11] }
  0x2b   : > { %563 = vmatprep.mubr.bf16.mxu0 %v1630_v35  ;;  %v327_v60 = vor.u32 %v326_v58, %v323_v56  ;;  %v1744_v58 = vld [vmem:[%s2245_s6 + $0x38] sm:$0x11] }
  0x2c   : > { %1936 = vmatpush3.bf16.msra.mxu0 %v2062_v14  ;;  %v319_v5 = vsel %vm2271_vm2, %v2375_v63, %v318_v55  ;;  %v245_v14 = vld [vmem:[%s2245_s6 + $0x68] sm:$0x11] }
  0x2d   : > { %1976 = vmatpush3.bf16.msra.mxu1 %v2063_v1  ;;  %1937 = vmatprep.subr.bf16.mxu0 %v2066_v21  ;;  %v2380_v1 = vrot.slane %v327_v60, 4  ;;  %v344_v20 = vshll.u32 %v245_v14, 16  ;;  %v349_v21 = vshrl.u32 %v2404_v13, 16  ;;  %v1094_v60 = vshll.u32 %v1744_v58, 16 }
  0x2e   : > { %1977 = vmatprep.subr.bf16.mxu1 %v2067_v17  ;;  %v338_v17 = vshll.u32 %v2401_v12, 16 }
  0x2f   : > { %564 = vmatmul.mubr.bf16.gmra.mrb[4].mxu0 %v1629_v36  ;;  %v333_v7 = vsel %vm2271_vm2, %v2380_v1, %v332_v61  ;;  %v346_v30 = vrot.slane %v344_v20, 5  ;;  %v360_v36 = vrot.slane %v358_v23, 5  ;;  %v1108_v61 = vshll.u32 %v1746_v59, 16  ;;  %v1754_v23 = vld [vmem:[%s2245_s6 + $0x88] sm:$0x11] }
  0x30   : > { %765 = vmatmul.mubr.bf16.gmra.mrb[4].mxu1 %v1653_v9  ;;  %1938 = vmatpush3.bf16.msra.mxu0 %v2068_v25  ;;  %v1632_v9 = vcombine.high %v319_v5, %v333_v7  ;;  %v1631_v10 = vcombine.low %v319_v5, %v333_v7  ;;  %v340_v25 = vrot.slane %v338_v17, 5  ;;  %v1715_v20 = vcombine.low %v2255_v33, %v2298_v2 }
  0x31   : > { %1978 = vmatpush3.bf16.msra.mxu1 %v2069_v27  ;;  %1939 = vmatprep.subr.bf16.mxu0 %v2070_v29  ;;  %v2086_v27 = vld [vmem:[%s2548_s1 + $0x170] sm:$0xff]   ;;  %v1150_v2 = vshll.u32 %v1752_v22, 16 }
  0x32   : > { %1979 = vmatprep.subr.bf16.mxu1 %v2071_v31  ;;  %772 = vmatprep.mubr.bf16.mxu1 %v1656_v44  ;;  %v2087_v29 = vld [vmem:[%s2548_s1 + $0x1f0] sm:$0xff]   ;;  %v351_v31 = vrot.slane %v349_v21, 4 }
  0x33   : > { %571 = vmatprep.mubr.bf16.mxu0 %v1632_v9  ;;  %v1110_v9 = vrot.slane %v1108_v61, 5 }
  0x34   : > { %1940 = vmatpush3.bf16.msra.mxu0 %v2072_v34  ;;  %v341_v34 = vor.u32 %v340_v25, %v337_v24  ;;  %v355_v35 = vor.u32 %v354_v32, %v351_v31  ;;  %v1155_v24 = vshrl.u32 %v1682_v15, 16  ;;  %v1158_v25 = vshll.u32 %v1682_v15, 16 }
  0x35   : > { %1980 = vmatpush3.bf16.msra.mxu1 %v2073_v37  ;;  %1941 = vmatprep.subr.bf16.mxu0 %v2076_v53  ;;  %v2088_v37 = vld [vmem:[%s2548_s1 + $0x130] sm:$0xff]   ;;  %v1740_v53 = vld [vmem:[%s2245_s6 + $0x18] sm:$0x11] }
  0x36   : > { %1981 = vmatprep.subr.bf16.mxu1 %v2077_v54  ;;  %v342_v40 = vrot.slane %v341_v34, 4  ;;  %v2428_v42 = vrot.slane %v355_v35, 4  ;;  %v1742_v54 = vld [vmem:[%s2245_s6 + $0x28] sm:$0x11]  ;;  %v1066_v55 = vshll.u32 %v1740_v53, 16  ;;  %v1717_v34 = vcombine.low %v2301_v3, %v2351_v38 }
  0x37   : > { %572 = vmatmul.mubr.bf16.gmra.mrb[8].mxu0 %v1631_v10  ;;  %v1080_v56 = vshll.u32 %v1742_v54, 16  ;;  %v1152_v35 = vrot.slane %v1150_v2, 5 }
  0x38   : > { %773 = vmatmul.mubr.bf16.gmra.mrb[8].mxu1 %v1655_v45  ;;  %1942 = vmatpush3.bf16.msra.mxu0 %v2078_v62  ;;  %v347_v44 = vsel %vm2271_vm2, %v342_v40, %v346_v30  ;;  %v2091_v45 = vld [vmem:[%s2548_s1 + $0x1f8] sm:$0xff]   ;;  %v361_v46 = vsel %vm2271_vm2, %v2428_v42, %v360_v36 }
  0x39   : > { %1982 = vmatpush3.bf16.msra.mxu1 %v2079_v0  ;;  %1943 = vmatprep.subr.bf16.mxu0 %v2080_v4  ;;  %v1634_v48 = vcombine.high %v347_v44, %v361_v46  ;;  %v1633_v49 = vcombine.low %v347_v44, %v361_v46  ;;  %v1748_v62 = vld [vmem:[%s2245_s6 + $0x58] sm:$0x11]  ;;  %v1750_v0 = vld [vmem:[%s2245_s6 + $0x68] sm:$0x11]  ;;  %v1068_v4 = vrot.slane %v1066_v55, 5  ;;  %v1082_v5 = vrot.slane %v1080_v56, 5 }
  0x3a   : > { %1983 = vmatprep.subr.bf16.mxu1 %v2081_v6  ;;  %780 = vmatprep.mubr.bf16.mxu1 %v1658_v18  ;;  %v1122_v6 = vshll.u32 %v1748_v62, 16  ;;  %v1136_v7 = vshll.u32 %v1750_v0, 16  ;;  %v1721_v46 = vcombine.low %v2404_v13, %v1682_v15 }
  0x3b   : > { %579 = vmatprep.mubr.bf16.mxu0 %v1634_v48  ;;  %v1069_v10 = vsel %vm2271_vm2, %v2278_v57, %v1068_v4 }
  0x3c   : > { %1944 = vmatpush3.bf16.msra.mxu0 %v2082_v8  ;;  %v1096_v8 = vrot.slane %v1094_v60, 5  ;;  %v1124_v14 = vrot.slane %v1122_v6, 5  ;;  %v1138_v21 = vrot.slane %v1136_v7, 5 }
  0x3d   : > { %1984 = vmatpush3.bf16.msra.mxu1 %v2083_v11  ;;  %1945 = vmatprep.subr.bf16.mxu0 %v2086_v27  ;;  %v1083_v11 = vsel %vm2271_vm2, %v2325_v26, %v1082_v5  ;;  %v1718_v26 = vcombine.high %v2301_v3, %v2351_v38  ;;  %v1160_v27 = vrot.slane %v1158_v25, 5  ;;  %v1719_v3 = vcombine.low %v2354_v39, %v2401_v12 }
  0x3e   : > { %1985 = vmatprep.subr.bf16.mxu1 %v2087_v29  ;;  %v1787_v16 = vcombine.low %v1069_v10, %v1083_v11  ;;  %v1788_v17 = vcombine.high %v1069_v10, %v1083_v11  ;;  %v1097_v18 = vsel %vm2271_vm2, %v2330_v28, %v1096_v8  ;;  %v1125_v28 = vsel %vm2271_vm2, %v2380_v1, %v1124_v14 }
  0x3f   : > { %580 = vmatmul.mubr.bf16.gmra.mrb[12].mxu0 %v1633_v49  ;;  %v1139_v33 = vsel %vm2271_vm2, %v342_v40, %v1138_v21  ;;  %v1164_v29 = vshll.u32 %v1754_v23, 16  ;;  %v1720_v1 = vcombine.high %v2354_v39, %v2401_v12  ;;  %v1153_v40 = vsel %vm2271_vm2, %v2428_v42, %v1152_v35 }
  0x40   : > { %781 = vmatmul.mubr.bf16.gmra.mrb[12].mxu1 %v1657_v19  ;;  %1946 = vmatpush3.bf16.msra.mxu0 %v2088_v37  ;;  %v1111_v19 = vsel %vm2271_vm2, %v2375_v63, %v1110_v9  ;;  %v1157_v63 = vrot.slane %v1155_v24, 4  ;;  %v1792_v32 = vcombine.high %v1125_v28, %v1139_v33  ;;  %v1722_v38 = vcombine.high %v2404_v13, %v1682_v15 }
  0x41   : > { %1986 = vmatpush3.bf16.msra.mxu1 %v2089_v41  ;;  %1947 = vmatprep.subr.bf16.mxu0 %v2090_v43  ;;  %v1790_v57 = vcombine.high %v1097_v18, %v1111_v19  ;;  %v1789_v30 = vcombine.low %v1097_v18, %v1111_v19  ;;  %v1166_v37 = vrot.slane %v1164_v29, 5  ;;  %v1791_v43 = vcombine.low %v1125_v28, %v1139_v33 }
  0x42   : > { %1987 = vmatprep.subr.bf16.mxu1 %v2091_v45  ;;  %999 = vmatprep.mubr.bf16.mxu0 %v1716_v51  ;;  %v1161_v31 = vor.u32 %v1160_v27, %v1157_v63 }
  0x43   : > { %1361 = vmatprep.mubr.bf16.mxu1 %v1788_v17 }
  0x44   : > { %1948 = vmatpush3.bf16.msra.mxu0 %v2092_v47  ;;  %v1162_v36 = vrot.slane %v1161_v31, 4 }
  0x45   : > { %1988 = vmatpush3.bf16.msra.mxu1 %v2093_v50 }
  0x46   : > { %v1167_v41 = vsel %vm2271_vm2, %v1162_v36, %v1166_v37 }
  0x47   : > { %1000 = vmatmul.mubr.bf16.vlgmr.msra.gmra.mrb[16].mxu0 %v1715_v20  ;;  %v1794_v44 = vcombine.high %v1153_v40, %v1167_v41  ;;  %v1793_v45 = vcombine.low %v1153_v40, %v1167_v41 }
  0x48   : > { %1362 = vmatmul.mubr.bf16.vlgmr.msra.gmra.mrb[16].mxu1 %v1787_v16  ;;  %1007 = vmatprep.mubr.bf16.mxu0 %v1718_v26 }
  0x49   : > { %1369 = vmatprep.mubr.bf16.mxu1 %v1790_v57 }
  0x4f   : > { %1008 = vmatmul.mubr.bf16.gmra.mrb[20].mxu0 %v1717_v34 }
  0x50   : > { %1370 = vmatmul.mubr.bf16.gmra.mrb[20].mxu1 %v1789_v30  ;;  %1015 = vmatprep.mubr.bf16.mxu0 %v1720_v1 }
  0x51   : > { %1377 = vmatprep.mubr.bf16.mxu1 %v1792_v32 }
  0x57   : > { %1016 = vmatmul.mubr.bf16.gmra.mrb[24].mxu0 %v1719_v3 }
  0x58   : > { %1378 = vmatmul.mubr.bf16.gmra.mrb[24].mxu1 %v1791_v43  ;;  %1023 = vmatprep.mubr.bf16.mxu0 %v1722_v38 }
  0x59   : > { %1385 = vmatprep.mubr.bf16.mxu1 %v1794_v44 }
  0x5f   : > { %1024 = vmatmul.mubr.bf16.gmra.mrb[28].mxu0 %v1721_v46 }
  0x60   : > { %1386 = vmatmul.mubr.bf16.gmra.mrb[28].mxu1 %v1793_v45 }
  0xfa   : > { %v1869_v51 = vpop.f32.mrb[0].mxu0 }
  0xfb   : > { %v1909_v42 = vpop.f32.mrb[0].mxu1  ;;  %v1870_v53 = vpop.f32.mrb[1].mxu0 }
  0xfc   : > { %v1910_v52 = vpop.f32.mrb[1].mxu1  ;;  %v1871_v12 = vadd.f32 %v1870_v53, %v1869_v51  ;;  %v1872_v54 = vpop.f32.mrb[2].mxu0 }
  0xfd   : > { %v1911_v47 = vadd.f32 %v1910_v52, %v1909_v42  ;;  %v1912_v48 = vpop.f32.mrb[2].mxu1  ;;  %v1873_v56 = vpop.f32.mrb[3].mxu0 }
  0xfe   : > { %v1913_v49 = vpop.f32.mrb[3].mxu1  ;;  %v1874_v61 = vadd.f32 %v1873_v56, %v1872_v54 }
  0xff   : > { %v1914_v50 = vadd.f32 %v1913_v49, %v1912_v48  ;;  %v759_v60 = vadd.f32 %v1911_v47, %v1871_v12 }
 0x101   : > { %v762_v0 = vadd.f32 %v1914_v50, %v1874_v61 }
 0x102   : > { %v1875_v4 = vpop.f32.mrb[4].mxu0 }
 0x103   : > { %v1915_v39 = vpop.f32.mrb[4].mxu1  ;;  %v1876_v5 = vpop.f32.mrb[5].mxu0 }
 0x104   : > { %v1916_v55 = vpop.f32.mrb[5].mxu1  ;;  %v1877_v6 = vadd.f32 %v1876_v5, %v1875_v4  ;;  %v1878_v7 = vpop.f32.mrb[6].mxu0 }
 0x105   : > { %v1917_v58 = vadd.f32 %v1916_v55, %v1915_v39  ;;  %v1918_v59 = vpop.f32.mrb[6].mxu1  ;;  %v1879_v9 = vpop.f32.mrb[7].mxu0 }
 0x106   : > { %v1919_v13 = vpop.f32.mrb[7].mxu1  ;;  %v1880_v14 = vadd.f32 %v1879_v9, %v1878_v7 }
 0x107   : > { %v1920_v62 = vadd.f32 %v1919_v13, %v1918_v59  ;;  %v767_v11 = vadd.f32 %v1917_v58, %v1877_v6 }
 0x109   : > { %v770_v18 = vadd.f32 %v1920_v62, %v1880_v14 }
 0x10a   : > { %v1881_v20 = vpop.f32.mrb[8].mxu0 }
 0x10b   : > { %v1921_v8 = vpop.f32.mrb[8].mxu1  ;;  %v1882_v57 = vpop.f32.mrb[9].mxu0 }
 0x10c   : > { %v1922_v10 = vpop.f32.mrb[9].mxu1  ;;  %v1883_v21 = vadd.f32 %v1882_v57, %v1881_v20  ;;  %v1884_v26 = vpop.f32.mrb[10].mxu0 }
 0x10d   : > { %v1923_v15 = vadd.f32 %v1922_v10, %v1921_v8  ;;  %v1924_v16 = vpop.f32.mrb[10].mxu1  ;;  %v1885_v23 = vpop.f32.mrb[11].mxu0 }
 0x10e   : > { %v1925_v17 = vpop.f32.mrb[11].mxu1  ;;  %v1886_v28 = vadd.f32 %v1885_v23, %v1884_v26 }
 0x10f   : > { %v1926_v19 = vadd.f32 %v1925_v17, %v1924_v16  ;;  %v2492_v25 = vadd.f32 %v1923_v15, %v1883_v21 }
 0x111   : > { %v2494_v27 = vadd.f32 %v1926_v19, %v1886_v28 }
 0x112   : > { %v1887_v30 = vpop.f32.mrb[12].mxu0 }
 0x113   : > { %v1927_v22 = vpop.f32.mrb[12].mxu1  ;;  %v1888_v31 = vpop.f32.mrb[13].mxu0 }
 0x114   : > { %v1928_v24 = vpop.f32.mrb[13].mxu1  ;;  %v1889_v32 = vadd.f32 %v1888_v31, %v1887_v30  ;;  %v1890_v34 = vpop.f32.mrb[14].mxu0 }
 0x115   : > { %v1929_v63 = vadd.f32 %v1928_v24, %v1927_v22  ;;  %v1930_v33 = vpop.f32.mrb[14].mxu1  ;;  %v1891_v35 = vpop.f32.mrb[15].mxu0 }
 0x116   : > { %v1931_v2 = vpop.f32.mrb[15].mxu1  ;;  %v1892_v37 = vadd.f32 %v1891_v35, %v1890_v34 }
 0x117   : > { %v1932_v29 = vadd.f32 %v1931_v2, %v1930_v33  ;;  %v2496_v36 = vadd.f32 %v1929_v63, %v1889_v32 }
 0x119   : > { %v2498_v1 = vadd.f32 %v1932_v29, %v1892_v37 }
 0x11a   : > { %v1949_v43 = vpop.f32.mrb[16].mxu0 }
 0x11b   : > { %v1989_v40 = vpop.f32.mrb[16].mxu1  ;;  %v1950_v38 = vpop.f32.mrb[17].mxu0 }
 0x11c   : > { %v1990_v41 = vpop.f32.mrb[17].mxu1  ;;  %v1951_v46 = vadd.f32 %v1950_v38, %v1949_v43  ;;  %v1952_v42 = vpop.f32.mrb[18].mxu0 }
 0x11d   : > { %v1991_v44 = vadd.f32 %v1990_v41, %v1989_v40  ;;  %v1992_v3 = vpop.f32.mrb[18].mxu1  ;;  %v1953_v47 = vpop.f32.mrb[19].mxu0 }
 0x11e   : > { %v1993_v45 = vpop.f32.mrb[19].mxu1  ;;  %v1032_v48 = vadd.f32 %v1951_v46, %v759_v60  ;;  %v1954_v49 = vadd.f32 %v1953_v47, %v1952_v42 }
 0x11f   : > { %v1994_v52 = vadd.f32 %v1993_v45, %v1992_v3 }
 0x120   : > { %v2500_v50 = vadd.f32 %v1991_v44, %v1032_v48  ;;  %v1033_v51 = vadd.f32 %v1954_v49, %v762_v0 }
 0x122   : > { %v2502_v12 = vadd.f32 %v1994_v52, %v1033_v51  ;;  %v1955_v54 = vpop.f32.mrb[20].mxu0  ;;  %v1417_v58 = vmul.f32 %v2500_v50, %v2500_v50 }
 0x123   : > { %v1995_v53 = vpop.f32.mrb[20].mxu1  ;;  %v1956_v59 = vpop.f32.mrb[21].mxu0 }
 0x124   : > { %v1996_v39 = vpop.f32.mrb[21].mxu1  ;;  %v1404_v13 = vadd.f32 %v2502_v12, %v2500_v50  ;;  %v1418_v60 = vmul.f32 %v2502_v12, %v2502_v12  ;;  %v1957_v62 = vadd.f32 %v1956_v59, %v1955_v54  ;;  %v1958_v0 = vpop.f32.mrb[22].mxu0 }
 0x125   : > { %v1997_v55 = vadd.f32 %v1996_v39, %v1995_v53  ;;  %v1998_v56 = vpop.f32.mrb[22].mxu1  ;;  %v1959_v5 = vpop.f32.mrb[23].mxu0 }
 0x126   : > { %v1999_v61 = vpop.f32.mrb[23].mxu1  ;;  %v1425_v6 = vadd.f32 %v1418_v60, %v1417_v58  ;;  %v1034_v7 = vadd.f32 %v1957_v62, %v767_v11  ;;  %v1960_v8 = vadd.f32 %v1959_v5, %v1958_v0 }
 0x127   : > { %v2000_v4 = vadd.f32 %v1999_v61, %v1998_v56 }
 0x128   : > { %v2510_v9 = vadd.f32 %v1997_v55, %v1034_v7  ;;  %v1035_v10 = vadd.f32 %v1960_v8, %v770_v18 }
 0x12a   : > { %v1405_v16 = vadd.f32 %v1404_v13, %v2510_v9  ;;  %v1419_v17 = vmul.f32 %v2510_v9, %v2510_v9  ;;  %v2515_v19 = vadd.f32 %v2000_v4, %v1035_v10  ;;  %v1961_v20 = vpop.f32.mrb[24].mxu0 }
 0x12b   : > { %v2001_v14 = vpop.f32.mrb[24].mxu1  ;;  %v1962_v26 = vpop.f32.mrb[25].mxu0 }
 0x12c   : > { %v2002_v15 = vpop.f32.mrb[25].mxu1  ;;  %v1426_v23 = vadd.f32 %v1425_v6, %v1419_v17  ;;  %v1406_v11 = vadd.f32 %v1405_v16, %v2515_v19  ;;  %v1420_v18 = vmul.f32 %v2515_v19, %v2515_v19  ;;  %v1963_v24 = vadd.f32 %v1962_v26, %v1961_v20  ;;  %v1964_v28 = vpop.f32.mrb[26].mxu0 }
 0x12d   : > { %v2003_v57 = vadd.f32 %v2002_v15, %v2001_v14  ;;  %v2004_v21 = vpop.f32.mrb[26].mxu1  ;;  %v1965_v63 = vpop.f32.mrb[27].mxu0 }
 0x12e   : > { %v2005_v22 = vpop.f32.mrb[27].mxu1  ;;  %v1427_v2 = vadd.f32 %v1426_v23, %v1420_v18  ;;  %v1036_v29 = vadd.f32 %v1963_v24, %v2492_v25  ;;  %v1966_v30 = vadd.f32 %v1965_v63, %v1964_v28  ;;  %v1403_v63 = vld [vmem:[%s2550_s3] sm:$0x1] }
 0x12f   : > { %v2006_v33 = vadd.f32 %v2005_v22, %v2004_v21  ;;  %v1449_v22 = vlaneseq }
 0x130   : > { %v2521_v31 = vadd.f32 %v2003_v57, %v1036_v29  ;;  %v1037_v32 = vadd.f32 %v1966_v30, %v2494_v27 }
 0x131   : > { %v1450_v23 = vshrl.u32 %v1449_v22, 7 }
 0x132   : > { %v1407_v37 = vadd.f32 %v1406_v11, %v2521_v31  ;;  %v1421_v40 = vmul.f32 %v2521_v31, %v2521_v31  ;;  %v1399_v41 = vadd.f32 %v2006_v33, %v1037_v32  ;;  %v1967_v43 = vpop.f32.mrb[28].mxu0  ;;  %v1402_v11 = vld [vmem:[%s2549_s2] sm:$0x1] }
 0x133   : > { %v2007_v34 = vpop.f32.mrb[28].mxu1  ;;  %v1968_v38 = vpop.f32.mrb[29].mxu0  ;;  %v1451_v18 = vsub.s32 0, %v1450_v23 }
 0x134   : > { %v2008_v35 = vpop.f32.mrb[29].mxu1  ;;  %v1428_v46 = vadd.f32 %v1427_v2, %v1421_v40  ;;  %v1408_v25 = vadd.f32 %v1407_v37, %v1399_v41  ;;  %v1422_v42 = vmul.f32 %v1399_v41, %v1399_v41  ;;  %v1969_v52 = vadd.f32 %v1968_v38, %v1967_v43  ;;  %v1970_v47 = vpop.f32.mrb[30].mxu0 }
 0x135   : > { %v2009_v44 = vadd.f32 %v2008_v35, %v2007_v34  ;;  %v2010_v3 = vpop.f32.mrb[30].mxu1  ;;  %v1971_v48 = vpop.f32.mrb[31].mxu0 }
 0x136   : > { %v2011_v45 = vpop.f32.mrb[31].mxu1  ;;  %v1429_v49 = vadd.f32 %v1428_v46, %v1422_v42  ;;  %v1038_v51 = vadd.f32 %v1969_v52, %v2496_v36  ;;  %v1972_v53 = vadd.f32 %v1971_v48, %v1970_v47 }
 0x137   : > { %v2012_v27 = vadd.f32 %v2011_v45, %v2010_v3 }
 0x138   : > { %v1400_v39 = vadd.f32 %v2009_v44, %v1038_v51  ;;  %v1039_v54 = vadd.f32 %v1972_v53, %v2498_v1 }
 0x13a   : > { %v1409_v55 = vadd.f32 %v1408_v25, %v1400_v39  ;;  %v1423_v56 = vmul.f32 %v1400_v39, %v1400_v39  ;;  %v1401_v58 = vadd.f32 %v2012_v27, %v1039_v54 }
 0x13c   : > { %v1430_v59 = vadd.f32 %v1429_v49, %v1423_v56  ;;  %v1410_v61 = vadd.f32 %v1409_v55, %v1401_v58  ;;  %v1424_v13 = vmul.f32 %v1401_v58, %v1401_v58 }
 0x13e   : > { %v1411_v60 = vrot.slane %v1410_v61, 4  ;;  %v1431_v62 = vadd.f32 %v1430_v59, %v1424_v13 }
 0x140   : > { %v1412_v0 = vadd.f32 %v1411_v60, %v1410_v61  ;;  %v1432_v4 = vrot.slane %v1431_v62, 4 }
 0x142   : > { %v1413_v5 = vrot.slane %v1412_v0, 2  ;;  %v1433_v6 = vadd.f32 %v1432_v4, %v1431_v62 }
 0x144   : > { %v1414_v7 = vadd.f32 %v1413_v5, %v1412_v0  ;;  %v1434_v8 = vrot.slane %v1433_v6, 2 }
 0x146   : > { %v1415_v10 = vrot.slane %v1414_v7, 1  ;;  %v1435_v36 = vadd.f32 %v1434_v8, %v1433_v6 }
 0x148   : > { %v1416_v14 = vadd.f32 %v1415_v10, %v1414_v7  ;;  %v1436_v15 = vrot.slane %v1435_v36, 1 }
 0x14a   : > { %v1437_v16 = vadd.f32 %v1436_v15, %v1435_v36  ;;  %v1438_v1 = vmul.f32 0.015625, %v1416_v14 }
 0x14c   : > { %v1439_v17 = vmul.f32 0.015625, %v1437_v16  ;;  %v1440_v20 = vmul.f32 %v1438_v1, %v1438_v1 }
 0x14e   : > { %v1441_v57 = vsub.f32 %v1439_v17, %v1440_v20 }
 0x150   : > { %v1442_v21 = vmax.f32 %v1441_v57, 0.0 }
 0x152   : > { %v1443_v26 = vadd.f32 1e-05, %v1442_v21 }
 0x154   : > { %2102 = vrsqrt.f32 %v1443_v26 }
 0x15e   : > { %v2103_v24 = vpop.eup %2102 }
 0x15f   : > { %v1445_v28 = vmul.f32 %v2103_v24, %v1402_v11 }
 0x161   : > { %v1446_v33 = vmul.f32 %v1445_v28, %v1438_v1  ;;  %v1452_v2 = vrot.slane %v1445_v28, %v1451_v18 }
 0x163   : > { %v1447_v29 = vsub.f32 %v1403_v63, %v1446_v33  ;;  %v1454_v30 = vmul.f32 %v1452_v2, %v2500_v50  ;;  %v1455_v32 = vmul.f32 %v1452_v2, %v2502_v12  ;;  %v1456_v34 = vmul.f32 %v1452_v2, %v2510_v9 }
 0x164   : > { %v1457_v35 = vmul.f32 %v1452_v2, %v2515_v19  ;;  %v1458_v37 = vmul.f32 %v1452_v2, %v2521_v31  ;;  %v1459_v40 = vmul.f32 %v1452_v2, %v1399_v41  ;;  %v1460_v43 = vmul.f32 %v1452_v2, %v1400_v39 }
 0x165   : > { %v1461_v44 = vmul.f32 %v1452_v2, %v1401_v58  ;;  %v1466_v3 = vrot.slane %v1447_v29, %v1451_v18 }
 0x167   : > { %v1468_v38 = vadd.f32 %v1466_v3, %v1454_v30  ;;  %v1469_v45 = vadd.f32 %v1466_v3, %v1455_v32  ;;  %v1470_v46 = vadd.f32 %v1466_v3, %v1456_v34  ;;  %v1471_v25 = vadd.f32 %v1466_v3, %v1457_v35 }
 0x168   : > { %v1472_v42 = vadd.f32 %v1466_v3, %v1458_v37  ;;  %v1473_v52 = vadd.f32 %v1466_v3, %v1459_v40  ;;  %v1474_v50 = vadd.f32 %v1466_v3, %v1460_v43  ;;  %v1475_v47 = vadd.f32 %v1466_v3, %v1461_v44 }
 0x169   : > { %v1476_v12 = vmul.f32 0.2, %v1468_v38  ;;  %v1477_v48 = vmul.f32 0.2, %v1469_v45  ;;  %v1478_v9 = vmul.f32 0.2, %v1470_v46 }
 0x16a   : > { %v1479_v27 = vmul.f32 0.2, %v1471_v25  ;;  %v1480_v19 = vmul.f32 0.2, %v1472_v42  ;;  %v1481_v49 = vmul.f32 0.2, %v1473_v52 }
 0x16b   : > { %v1482_v31 = vmul.f32 0.2, %v1474_v50  ;;  %v1483_v41 = vmul.f32 0.2, %v1475_v47  ;;  %v1484_v51 = vmax.f32 %v1468_v38, %v1476_v12  ;;  %v1485_v53 = vmax.f32 %v1469_v45, %v1477_v48 }
 0x16c   : > { %v1486_v39 = vmax.f32 %v1470_v46, %v1478_v9  ;;  %v1487_v54 = vmax.f32 %v1471_v25, %v1479_v27  ;;  %v1488_v55 = vmax.f32 %v1472_v42, %v1480_v19  ;;  %v1489_v56 = vmax.f32 %v1473_v52, %v1481_v49 }
 0x16d   : > { %v1490_v58 = vmax.f32 %v1474_v50, %v1482_v31  ;;  %v1491_v59 = vmax.f32 %v1475_v47, %v1483_v41  ;;  %v1833_v61 = vpack.c.bf16 %v1485_v53, %v1484_v51 }
 0x16e   : > { %v1838_v13 = vpack.c.bf16 %v1487_v54, %v1486_v39  ;;  %v1843_v60 = vpack.c.bf16 %v1489_v56, %v1488_v55 }
 0x16f   : > { %1834 = vst [vmem:[%s197_s12] sm:$0xff] %v1833_v61   ;;  %v1848_v62 = vpack.c.bf16 %v1491_v59, %v1490_v58 }
 0x170   : > { %1850 = vst [vmem:[%s197_s12 + $0x8] sm:$0xff] %v1838_v13   ;;  %1851 = vst [vmem:[%s197_s12 + $0x10] sm:$0xff] %v1843_v60  }
 0x171   : > { %1852 = vst [vmem:[%s197_s12 + $0x18] sm:$0xff] %v1848_v62  }
 0x172 PF: > { %s14_s15 = sadd.s32 1, %s2110_s15  }
 0x173   : > { %p11_p4 = scmp.ge.s32.totalorder %s14_s15, 4  }
 0x175   :  { %13 = sbr.rel (!%p11_p4) target bundleno = 1 (0x1), region = 70 }

// kernel: cnn_dis_forward.5
= control target key start
LH: loop header
LB: loop body
LE: loop exit
PB: predicated region body
PF: predicated region fallthrough
CT: control target
= control target key end

     0   :  { %s3176_s23 = smov 0   ;;  %s4077_s0 = inlined_call_operand.vmem [shape: bf16[2,16,2048], index: 0, kind: input, shape index: {}]   ;;  %s4078_s1 = inlined_call_operand.vmem [shape: bf16[2048,256], index: 1, kind: input, shape index: {}]   ;;  %s4079_s2 = inlined_call_operand.vmem [shape: f32[1,256], index: 2, kind: input, shape index: {}]   ;;  %s4080_s3 = inlined_call_operand.vmem [shape: f32[1,256], index: 3, kind: input, shape index: {}]   ;;  %s4081_s4 = inlined_call_operand.vmem [shape: f32[16,256], index: 4, kind: input, shape index: {}]   ;;  %s4082_s5 = inlined_call_operand.<no memory space> [shape: f32[1,1], index: 5, kind: input, shape index: {}]   ;;  %s4083_s6 = inlined_call_operand.vmem [shape: f32[2,1,1], index: 6, kind: output, shape index: {}]  }
   0x1   :  { %v11_v0 = vstv %s4082_s5 }
   0x2   :  { %12 = vst [vmem:[#allocation2] sm:$0x1] %v11_v0 }
   0x3 LB: > { %s2422_s24 = sadd.s32 4294967295, %s3135_s23   ;;  %p2426_p0 = scmp.ge.s32.totalorder %s3135_s23, 1  ;;  %s3135_s23 = sphi %s3176_s23, %s18_s23  }
   0x4   : > { %p214_p1 = scmp.lt.s32.totalorder %s3135_s23, 3 }
   0x6   : > { %p215_p2 = pnand %p2426_p0, %p214_p1 }
   0x7   : > { %v2741_v1 = vld [vmem:[%s4078_s1 + $0x4] ss:$8 sps:$4 sm:$0xff] (!%p215_p2)   ;;  %v2745_v3 = vld [vmem:[%s4078_s1] ss:$8 sps:$4 sm:$0xff] (!%p215_p2)   ;;  %v2747_v5 = vld [vmem:[%s4078_s1 + $0x14] ss:$8 sps:$4 sm:$0xff] (!%p215_p2)  }
   0x8   : > { %218 = sbr.rel (%p215_p2) target bundleno = 710 (0x2c6), region = 44  ;;  %v2743_v2 = vld [vmem:[%s4078_s1 + $0x404] ss:$8 sps:$4 sm:$0xff] (!%p215_p2)   ;;  %1882 = vmatprep.subr.bf16.mxu1 (!%p215_p2), %v2741_v1  ;;  %v2746_v4 = vld [vmem:[%s4078_s1 + $0x400] ss:$8 sps:$4 sm:$0xff] (!%p215_p2)   ;;  %p242_p3 = scmp.lt.s32.totalorder (!%p215_p2), %s2422_s24, 1 }
   0x9   : > { %2054 = vmatprep.subr.bf16.mxu0 (!%p215_p2), %v2743_v2  ;;  %1883 = vmatpush1.bf16.msra.mxu1 (!%p215_p2), %v2745_v3  ;;  %v2749_v6 = vld [vmem:[%s4078_s1 + $0x414] ss:$8 sps:$4 sm:$0xff] (!%p215_p2)   ;;  %v2751_v7 = vld [vmem:[%s4078_s1 + $0x10] ss:$8 sps:$4 sm:$0xff] (!%p215_p2)   ;;  %v2753_v9 = vld [vmem:[%s4078_s1 + $0x24] ss:$8 sps:$4 sm:$0xff] (!%p215_p2)  }
   0xa   : > { %2055 = vmatpush1.bf16.msra.mxu0 (!%p215_p2), %v2746_v4  ;;  %1884 = vmatprep.subr.bf16.mxu1 (!%p215_p2), %v2747_v5  ;;  %v2752_v8 = vld [vmem:[%s4078_s1 + $0x410] ss:$8 sps:$4 sm:$0xff] (!%p215_p2)   ;;  %v2755_v10 = vld [vmem:[%s4078_s1 + $0x424] ss:$8 sps:$4 sm:$0xff] (!%p215_p2)   ;;  %v2757_v11 = vld [vmem:[%s4078_s1 + $0x20] ss:$8 sps:$4 sm:$0xff] (!%p215_p2)  }
   0xb   : > { %2056 = vmatprep.subr.bf16.mxu0 (!%p215_p2), %v2749_v6  ;;  %v2758_v12 = vld [vmem:[%s4078_s1 + $0x420] ss:$8 sps:$4 sm:$0xff] (!%p215_p2)   ;;  %v2759_v13 = vld [vmem:[%s4078_s1 + $0x34] ss:$8 sps:$4 sm:$0xff] (!%p215_p2)   ;;  %v2763_v15 = vld [vmem:[%s4078_s1 + $0x30] ss:$8 sps:$4 sm:$0xff] (!%p215_p2)  }
   0xc   : > { %v2761_v14 = vld [vmem:[%s4078_s1 + $0x434] ss:$8 sps:$4 sm:$0xff] (!%p215_p2)   ;;  %v2764_v16 = vld [vmem:[%s4078_s1 + $0x430] ss:$8 sps:$4 sm:$0xff] (!%p215_p2)   ;;  %v2765_v17 = vld [vmem:[%s4078_s1 + $0x44] ss:$8 sps:$4 sm:$0xff] (!%p215_p2)  }
   0xd   : > { %1885 = vmatpush1.bf16.msra.mxu1 (!%p215_p2), %v2751_v7  ;;  %v2767_v18 = vld [vmem:[%s4078_s1 + $0x444] ss:$8 sps:$4 sm:$0xff] (!%p215_p2)   ;;  %v2769_v19 = vld [vmem:[%s4078_s1 + $0x40] ss:$8 sps:$4 sm:$0xff] (!%p215_p2)   ;;  %v2771_v21 = vld [vmem:[%s4078_s1 + $0x54] ss:$8 sps:$4 sm:$0xff] (!%p215_p2)  }
   0xe   : > { %2057 = vmatpush1.bf16.msra.mxu0 (!%p215_p2), %v2752_v8  ;;  %1886 = vmatprep.subr.bf16.mxu1 (!%p215_p2), %v2753_v9  ;;  %v2770_v20 = vld [vmem:[%s4078_s1 + $0x440] ss:$8 sps:$4 sm:$0xff] (!%p215_p2)   ;;  %v2773_v22 = vld [vmem:[%s4078_s1 + $0x454] ss:$8 sps:$4 sm:$0xff] (!%p215_p2)   ;;  %v2775_v23 = vld [vmem:[%s4078_s1 + $0x50] ss:$8 sps:$4 sm:$0xff] (!%p215_p2)  }
   0xf   : > { %2058 = vmatprep.subr.bf16.mxu0 %v2755_v10  ;;  %v2776_v24 = vld [vmem:[%s4078_s1 + $0x450] ss:$8 sps:$4 sm:$0xff]   ;;  %v2777_v25 = vld [vmem:[%s4078_s1 + $0x64] ss:$8 sps:$4 sm:$0xff]   ;;  %v2781_v27 = vld [vmem:[%s4078_s1 + $0x60] ss:$8 sps:$4 sm:$0xff]  }
  0x10   : > { %v2779_v26 = vld [vmem:[%s4078_s1 + $0x464] ss:$8 sps:$4 sm:$0xff]   ;;  %v2782_v28 = vld [vmem:[%s4078_s1 + $0x460] ss:$8 sps:$4 sm:$0xff]   ;;  %v2783_v29 = vld [vmem:[%s4078_s1 + $0x74] ss:$8 sps:$4 sm:$0xff]  }
  0x11   : > { %1887 = vmatpush1.bf16.msra.mxu1 %v2757_v11  ;;  %v2785_v30 = vld [vmem:[%s4078_s1 + $0x474] ss:$8 sps:$4 sm:$0xff]   ;;  %v2787_v31 = vld [vmem:[%s4078_s1 + $0x70] ss:$8 sps:$4 sm:$0xff]   ;;  %v2789_v33 = vld [vmem:[%s4078_s1 + $0x84] ss:$8 sps:$4 sm:$0xff]  }
  0x12   : > { %2059 = vmatpush1.bf16.msra.mxu0 %v2758_v12  ;;  %1888 = vmatprep.subr.bf16.mxu1 %v2759_v13  ;;  %v2788_v32 = vld [vmem:[%s4078_s1 + $0x470] ss:$8 sps:$4 sm:$0xff]   ;;  %v2791_v34 = vld [vmem:[%s4078_s1 + $0x484] ss:$8 sps:$4 sm:$0xff]   ;;  %v2793_v35 = vld [vmem:[%s4078_s1 + $0x80] ss:$8 sps:$4 sm:$0xff]  }
  0x13   : > { %2060 = vmatprep.subr.bf16.mxu0 %v2761_v14  ;;  %v2794_v36 = vld [vmem:[%s4078_s1 + $0x480] ss:$8 sps:$4 sm:$0xff]   ;;  %v2795_v37 = vld [vmem:[%s4078_s1 + $0x94] ss:$8 sps:$4 sm:$0xff]   ;;  %s4085_s24 = smov (!%p242_p3, %s2422_s24), 1  ;;  %vm2373_vm0 = vcmask 0  }
  0x14   : > { %v2797_v38 = vld [vmem:[%s4078_s1 + $0x494] ss:$8 sps:$4 sm:$0xff]   ;;  %v2799_v39 = vld [vmem:[%s4078_s1 + $0x90] ss:$8 sps:$4 sm:$0xff]   ;;  %v2801_v41 = vld [vmem:[%s4078_s1 + $0xa4] ss:$8 sps:$4 sm:$0xff]   ;;  %s249_s14 = scalar_lea.vmem %s4083_s6, %s4085_s24 }
  0x15   : > { %1889 = vmatpush1.bf16.msra.mxu1 %v2763_v15  ;;  %v2800_v40 = vld [vmem:[%s4078_s1 + $0x490] ss:$8 sps:$4 sm:$0xff]   ;;  %s2703_s13 = sshll.u32 %s4085_s24, 7  ;;  %v2803_v42 = vld [vmem:[%s4078_s1 + $0x4a4] ss:$8 sps:$4 sm:$0xff]  }
  0x16   : > { %2061 = vmatpush1.bf16.msra.mxu0 %v2764_v16  ;;  %1890 = vmatprep.subr.bf16.mxu1 %v2765_v17  ;;  %v2805_v43 = vld [vmem:[%s4078_s1 + $0xa0] ss:$8 sps:$4 sm:$0xff]   ;;  %s3326_s22 = scalar_lea.vmem %s4077_s0, %s2703_s13  ;;  %v2807_v45 = vld [vmem:[%s4078_s1 + $0xb4] ss:$8 sps:$4 sm:$0xff]   ;;  %v2811_v47 = vld [vmem:[%s4078_s1 + $0xb0] ss:$8 sps:$4 sm:$0xff]  }
  0x17   : > { %2062 = vmatprep.subr.bf16.mxu0 %v2767_v18  ;;  %v2806_v44 = vld [vmem:[%s4078_s1 + $0x4a0] ss:$8 sps:$4 sm:$0xff]   ;;  %v2809_v46 = vld [vmem:[%s4078_s1 + $0x4b4] ss:$8 sps:$4 sm:$0xff]   ;;  %v2812_v48 = vld [vmem:[%s4078_s1 + $0x4b0] ss:$8 sps:$4 sm:$0xff]  }
  0x18   : > { %v250_v49 = vld [vmem:[%s3326_s22] sm:$0xff]  ;;  %v2819_v59 = vld [vmem:[%s4078_s1 + $0xd4] ss:$8 sps:$4 sm:$0xff]   ;;  %v2823_v61 = vld [vmem:[%s4078_s1 + $0xd0] ss:$8 sps:$4 sm:$0xff]  }
  0x19   : > { %1891 = vmatpush1.bf16.msra.mxu1 %v2769_v19  ;;  %v258_v50 = vld [vmem:[%s3326_s22 + $0x40] sm:$0xff]  ;;  %v2821_v60 = vld [vmem:[%s4078_s1 + $0x4d4] ss:$8 sps:$4 sm:$0xff]   ;;  %v2824_v62 = vld [vmem:[%s4078_s1 + $0x4d0] ss:$8 sps:$4 sm:$0xff]  }
  0x1a   : > { %2063 = vmatpush1.bf16.msra.mxu0 %v2770_v20  ;;  %1892 = vmatprep.subr.bf16.mxu1 %v2771_v21  ;;  %v2813_v51 = vld [vmem:[%s4078_s1 + $0xc4] ss:$8 sps:$4 sm:$0xff]   ;;  %v2430_v53 = vcombine.high %v250_v49, %v258_v50  ;;  %v2817_v57 = vld [vmem:[%s4078_s1 + $0xc0] ss:$8 sps:$4 sm:$0xff]   ;;  %v2831_v3 = vld [vmem:[%s4078_s1 + $0xf4] ss:$8 sps:$4 sm:$0xff]   ;;  %v2429_v9 = vcombine.low %v250_v49, %v258_v50 }
  0x1b   : > { %2064 = vmatprep.subr.bf16.mxu0 %v2773_v22  ;;  %v2815_v52 = vld [vmem:[%s4078_s1 + $0x4c4] ss:$8 sps:$4 sm:$0xff]   ;;  %v2818_v58 = vld [vmem:[%s4078_s1 + $0x4c0] ss:$8 sps:$4 sm:$0xff]   ;;  %v2833_v4 = vld [vmem:[%s4078_s1 + $0x4f4] ss:$8 sps:$4 sm:$0xff]  }
  0x1c   : > { %v254_v54 = vld [vmem:[%s3326_s22 + $0x20] sm:$0xff]  ;;  %1914 = vmatprep.mubr.bf16.mxu1 %v2430_v53  ;;  %v2835_v5 = vld [vmem:[%s4078_s1 + $0xf0] ss:$8 sps:$4 sm:$0xff]   ;;  %v2845_v13 = vld [vmem:[%s4078_s1 + $0x114] ss:$8 sps:$4 sm:$0xff]  }
  0x1d   : > { %1893 = vmatpush1.bf16.msra.mxu1 %v2775_v23  ;;  %v262_v55 = vld [vmem:[%s3326_s22 + $0x60] sm:$0xff]  ;;  %v2836_v6 = vld [vmem:[%s4078_s1 + $0x4f0] ss:$8 sps:$4 sm:$0xff]   ;;  %v2848_v14 = vld [vmem:[%s4078_s1 + $0x514] ss:$8 sps:$4 sm:$0xff]  }
  0x1e   : > { %2065 = vmatpush1.bf16.msra.mxu0 %v2776_v24  ;;  %1894 = vmatprep.subr.bf16.mxu1 %v2777_v25  ;;  %v2438_v56 = vcombine.high %v254_v54, %v262_v55  ;;  %v2825_v63 = vld [vmem:[%s4078_s1 + $0xe4] ss:$8 sps:$4 sm:$0xff]   ;;  %v2829_v1 = vld [vmem:[%s4078_s1 + $0xe0] ss:$8 sps:$4 sm:$0xff]   ;;  %v2437_v11 = vcombine.low %v254_v54, %v262_v55  ;;  %v2843_v15 = vld [vmem:[%s4078_s1 + $0x110] ss:$8 sps:$4 sm:$0xff]  }
  0x1f   : > { %2066 = vmatprep.subr.bf16.mxu0 %v2779_v26  ;;  %v2827_v0 = vld [vmem:[%s4078_s1 + $0x4e4] ss:$8 sps:$4 sm:$0xff]   ;;  %v2830_v2 = vld [vmem:[%s4078_s1 + $0x4e0] ss:$8 sps:$4 sm:$0xff]   ;;  %v2846_v16 = vld [vmem:[%s4078_s1 + $0x510] ss:$8 sps:$4 sm:$0xff]  }
  0x20   : > { %2086 = vmatprep.mubr.bf16.mxu0 %v2438_v56  ;;  %v2839_v7 = vld [vmem:[%s4078_s1 + $0x104] ss:$8 sps:$4 sm:$0xff]   ;;  %v2837_v10 = vld [vmem:[%s4078_s1 + $0x100] ss:$8 sps:$4 sm:$0xff]   ;;  %v2857_v21 = vld [vmem:[%s4078_s1 + $0x134] ss:$8 sps:$4 sm:$0xff]  }
  0x21   : > { %1895 = vmatpush1.bf16.msra.mxu1 %v2781_v27  ;;  %v2842_v8 = vld [vmem:[%s4078_s1 + $0x504] ss:$8 sps:$4 sm:$0xff]   ;;  %v2840_v12 = vld [vmem:[%s4078_s1 + $0x500] ss:$8 sps:$4 sm:$0xff]   ;;  %v2860_v22 = vld [vmem:[%s4078_s1 + $0x534] ss:$8 sps:$4 sm:$0xff]  }
  0x22   : > { %2067 = vmatpush1.bf16.msra.mxu0 %v2782_v28  ;;  %1896 = vmatprep.subr.bf16.mxu1 %v2783_v29  ;;  %v2851_v17 = vld [vmem:[%s4078_s1 + $0x124] ss:$8 sps:$4 sm:$0xff]   ;;  %v2849_v19 = vld [vmem:[%s4078_s1 + $0x120] ss:$8 sps:$4 sm:$0xff]   ;;  %v2855_v23 = vld [vmem:[%s4078_s1 + $0x130] ss:$8 sps:$4 sm:$0xff]  }
  0x23   : > { %2068 = vmatprep.subr.bf16.mxu0 %v2785_v30  ;;  %v2854_v18 = vld [vmem:[%s4078_s1 + $0x524] ss:$8 sps:$4 sm:$0xff]   ;;  %v2852_v20 = vld [vmem:[%s4078_s1 + $0x520] ss:$8 sps:$4 sm:$0xff]   ;;  %v2858_v24 = vld [vmem:[%s4078_s1 + $0x530] ss:$8 sps:$4 sm:$0xff]  }
  0x24   : > { %v2863_v25 = vld [vmem:[%s4078_s1 + $0x144] ss:$8 sps:$4 sm:$0xff]   ;;  %v2861_v27 = vld [vmem:[%s4078_s1 + $0x140] ss:$8 sps:$4 sm:$0xff]   ;;  %v2869_v29 = vld [vmem:[%s4078_s1 + $0x154] ss:$8 sps:$4 sm:$0xff]  }
  0x25   : > { %1897 = vmatpush1.bf16.msra.mxu1 %v2787_v31  ;;  %v2866_v26 = vld [vmem:[%s4078_s1 + $0x544] ss:$8 sps:$4 sm:$0xff]   ;;  %v2864_v28 = vld [vmem:[%s4078_s1 + $0x540] ss:$8 sps:$4 sm:$0xff]   ;;  %v2872_v30 = vld [vmem:[%s4078_s1 + $0x554] ss:$8 sps:$4 sm:$0xff]  }
  0x26   : > { %2069 = vmatpush1.bf16.msra.mxu0 %v2788_v32  ;;  %1898 = vmatprep.subr.bf16.mxu1 %v2789_v33  ;;  %v2867_v31 = vld [vmem:[%s4078_s1 + $0x150] ss:$8 sps:$4 sm:$0xff]   ;;  %v2875_v33 = vld [vmem:[%s4078_s1 + $0x164] ss:$8 sps:$4 sm:$0xff]   ;;  %v2885_v49 = vld [vmem:[%s4078_s1 + $0x180] ss:$8 sps:$4 sm:$0xff]  }
  0x27   : > { %2070 = vmatprep.subr.bf16.mxu0 %v2791_v34  ;;  %v2870_v32 = vld [vmem:[%s4078_s1 + $0x550] ss:$8 sps:$4 sm:$0xff]   ;;  %v2878_v34 = vld [vmem:[%s4078_s1 + $0x564] ss:$8 sps:$4 sm:$0xff]   ;;  %v2888_v50 = vld [vmem:[%s4078_s1 + $0x580] ss:$8 sps:$4 sm:$0xff]  }
  0x28   : > { %v2891_v53 = vld [vmem:[%s4078_s1 + $0x190] ss:$8 sps:$4 sm:$0xff]   ;;  %v2899_v55 = vld [vmem:[%s4078_s1 + $0x1a4] ss:$8 sps:$4 sm:$0xff]  }
  0x29   : > { %1899 = vmatpush1.bf16.msra.mxu1 %v2793_v35  ;;  %v2873_v35 = vld [vmem:[%s4078_s1 + $0x160] ss:$8 sps:$4 sm:$0xff]   ;;  %v2894_v54 = vld [vmem:[%s4078_s1 + $0x590] ss:$8 sps:$4 sm:$0xff]   ;;  %v2902_v56 = vld [vmem:[%s4078_s1 + $0x5a4] ss:$8 sps:$4 sm:$0xff]  }
  0x2a   : > { %2071 = vmatpush1.bf16.msra.mxu0 %v2794_v36  ;;  %1900 = vmatprep.subr.bf16.mxu1 %v2795_v37  ;;  %v2876_v36 = vld [vmem:[%s4078_s1 + $0x560] ss:$8 sps:$4 sm:$0xff]  }
  0x2b   : > { %2072 = vmatprep.subr.bf16.mxu0 %v2797_v38  ;;  %v3477_v37 = vld [vmem:[%s3326_s22 + $0x8] sm:$0xff] }
  0x2c   : > { %v3480_v38 = vld [vmem:[%s3326_s22 + $0x48] sm:$0xff] }
  0x2d   : > { %1901 = vmatpush1.bf16.msra.mxu1 %v2799_v39  ;;  %v2881_v39 = vld [vmem:[%s4078_s1 + $0x174] ss:$8 sps:$4 sm:$0xff]  }
  0x2e   : > { %2073 = vmatpush1.bf16.msra.mxu0 %v2800_v40  ;;  %1902 = vmatprep.subr.bf16.mxu1 %v2801_v41  ;;  %v2884_v40 = vld [vmem:[%s4078_s1 + $0x574] ss:$8 sps:$4 sm:$0xff]   ;;  %v2432_v41 = vcombine.high %v3477_v37, %v3480_v38 }
  0x2f   : > { %2074 = vmatprep.subr.bf16.mxu0 %v2803_v42  ;;  %v3491_v42 = vld [vmem:[%s3326_s22 + $0x28] sm:$0xff] }
  0x31   : > { %1903 = vmatpush1.bf16.msra.mxu1 %v2805_v43  ;;  %v3494_v43 = vld [vmem:[%s3326_s22 + $0x68] sm:$0xff] }
  0x32   : > { %2075 = vmatpush1.bf16.msra.mxu0 %v2806_v44  ;;  %1904 = vmatprep.subr.bf16.mxu1 %v2807_v45  ;;  %v2440_v44 = vcombine.high %v3491_v42, %v3494_v43  ;;  %v2879_v45 = vld [vmem:[%s4078_s1 + $0x170] ss:$8 sps:$4 sm:$0xff]  }
  0x33   : > { %2076 = vmatprep.subr.bf16.mxu0 %v2809_v46  ;;  %v2882_v46 = vld [vmem:[%s4078_s1 + $0x570] ss:$8 sps:$4 sm:$0xff]  }
  0x35   : > { %1905 = vmatpush1.bf16.msra.mxu1 %v2811_v47  ;;  %v2887_v47 = vld [vmem:[%s4078_s1 + $0x184] ss:$8 sps:$4 sm:$0xff]  }
  0x36   : > { %2077 = vmatpush1.bf16.msra.mxu0 %v2812_v48  ;;  %1906 = vmatprep.subr.bf16.mxu1 %v2813_v51  ;;  %v2890_v48 = vld [vmem:[%s4078_s1 + $0x584] ss:$8 sps:$4 sm:$0xff]   ;;  %v2893_v51 = vld [vmem:[%s4078_s1 + $0x194] ss:$8 sps:$4 sm:$0xff]  }
  0x37   : > { %2078 = vmatprep.subr.bf16.mxu0 %v2815_v52  ;;  %v2896_v52 = vld [vmem:[%s4078_s1 + $0x594] ss:$8 sps:$4 sm:$0xff]  }
  0x39   : > { %1907 = vmatpush1.bf16.msra.mxu1 %v2817_v57  ;;  %v2897_v57 = vld [vmem:[%s4078_s1 + $0x1a0] ss:$8 sps:$4 sm:$0xff]  }
  0x3a   : > { %2079 = vmatpush1.bf16.msra.mxu0 %v2818_v58  ;;  %1908 = vmatprep.subr.bf16.mxu1 %v2819_v59  ;;  %v2900_v58 = vld [vmem:[%s4078_s1 + $0x5a0] ss:$8 sps:$4 sm:$0xff]   ;;  %v2905_v59 = vld [vmem:[%s4078_s1 + $0x1b4] ss:$8 sps:$4 sm:$0xff]  }
  0x3b   : > { %2080 = vmatprep.subr.bf16.mxu0 %v2821_v60  ;;  %v2908_v60 = vld [vmem:[%s4078_s1 + $0x5b4] ss:$8 sps:$4 sm:$0xff]  }
  0x3d   : > { %1909 = vmatpush1.bf16.msra.mxu1 %v2823_v61  ;;  %v2903_v61 = vld [vmem:[%s4078_s1 + $0x1b0] ss:$8 sps:$4 sm:$0xff]  }
  0x3e   : > { %2081 = vmatpush1.bf16.msra.mxu0 %v2824_v62  ;;  %1910 = vmatprep.subr.bf16.mxu1 %v2825_v63  ;;  %v2906_v62 = vld [vmem:[%s4078_s1 + $0x5b0] ss:$8 sps:$4 sm:$0xff]   ;;  %v2911_v63 = vld [vmem:[%s4078_s1 + $0x1c4] ss:$8 sps:$4 sm:$0xff]  }
  0x3f   : > { %2082 = vmatprep.subr.bf16.mxu0 %v2827_v0  ;;  %v2914_v0 = vld [vmem:[%s4078_s1 + $0x5c4] ss:$8 sps:$4 sm:$0xff]  }
  0x41   : > { %1911 = vmatpush1.bf16.msra.mxu1 %v2829_v1  ;;  %v2909_v1 = vld [vmem:[%s4078_s1 + $0x1c0] ss:$8 sps:$4 sm:$0xff]  }
  0x42   : > { %2083 = vmatpush1.bf16.msra.mxu0 %v2830_v2  ;;  %1912 = vmatprep.subr.bf16.mxu1 %v2831_v3  ;;  %v2912_v2 = vld [vmem:[%s4078_s1 + $0x5c0] ss:$8 sps:$4 sm:$0xff]   ;;  %v2917_v3 = vld [vmem:[%s4078_s1 + $0x1d4] ss:$8 sps:$4 sm:$0xff]  }
  0x43   : > { %2084 = vmatprep.subr.bf16.mxu0 %v2833_v4  ;;  %v2920_v4 = vld [vmem:[%s4078_s1 + $0x5d4] ss:$8 sps:$4 sm:$0xff]  }
  0x45   : > { %1913 = vmatpush1.bf16.msra.mxu1 %v2835_v5  ;;  %v2915_v5 = vld [vmem:[%s4078_s1 + $0x1d0] ss:$8 sps:$4 sm:$0xff]  }
  0x46   : > { %2085 = vmatpush1.bf16.msra.mxu0 %v2836_v6  ;;  %1925 = vmatprep.subr.bf16.mxu1 %v2839_v7  ;;  %v2918_v6 = vld [vmem:[%s4078_s1 + $0x5d0] ss:$8 sps:$4 sm:$0xff]   ;;  %v2923_v7 = vld [vmem:[%s4078_s1 + $0x1e4] ss:$8 sps:$4 sm:$0xff]  }
  0x47   : > { %2097 = vmatprep.subr.bf16.mxu0 %v2842_v8  ;;  %v2926_v8 = vld [vmem:[%s4078_s1 + $0x5e4] ss:$8 sps:$4 sm:$0xff]  }
  0x48   : > { %1915 = vmatmul.mubr.bf16.vlgmr.msra.gmra.mrb[0].mxu1 %v2429_v9  ;;  %v2921_v9 = vld [vmem:[%s4078_s1 + $0x1e0] ss:$8 sps:$4 sm:$0xff]  }
  0x49   : > { %2087 = vmatmul.mubr.bf16.vlgmr.msra.gmra.mrb[0].mxu0 %v2437_v11  ;;  %1926 = vmatpush1.bf16.msra.mxu1 %v2837_v10  ;;  %v2924_v10 = vld [vmem:[%s4078_s1 + $0x5e0] ss:$8 sps:$4 sm:$0xff]   ;;  %v2929_v11 = vld [vmem:[%s4078_s1 + $0x1f4] ss:$8 sps:$4 sm:$0xff]  }
  0x4a   : > { %2098 = vmatpush1.bf16.msra.mxu0 %v2840_v12  ;;  %1927 = vmatprep.subr.bf16.mxu1 %v2845_v13  ;;  %v2932_v12 = vld [vmem:[%s4078_s1 + $0x5f4] ss:$8 sps:$4 sm:$0xff]   ;;  %v2927_v13 = vld [vmem:[%s4078_s1 + $0x1f0] ss:$8 sps:$4 sm:$0xff]  }
  0x4b   : > { %2099 = vmatprep.subr.bf16.mxu0 %v2848_v14  ;;  %1957 = vmatprep.mubr.bf16.mxu1 %v2432_v41  ;;  %v2930_v14 = vld [vmem:[%s4078_s1 + $0x5f0] ss:$8 sps:$4 sm:$0xff]   ;;  %v2957_v41 = vld [vmem:[%s4078_s1 + $0x240] ss:$8 sps:$4 sm:$0xff]  }
  0x4c   : > { %2129 = vmatprep.mubr.bf16.mxu0 %v2440_v44  ;;  %v2968_v44 = vld [vmem:[%s4078_s1 + $0x654] ss:$8 sps:$4 sm:$0xff]  }
  0x4d   : > { %1928 = vmatpush1.bf16.msra.mxu1 %v2843_v15  ;;  %v2935_v15 = vld [vmem:[%s4078_s1 + $0x204] ss:$8 sps:$4 sm:$0xff]  }
  0x4e   : > { %2100 = vmatpush1.bf16.msra.mxu0 %v2846_v16  ;;  %1929 = vmatprep.subr.bf16.mxu1 %v2851_v17  ;;  %v2938_v16 = vld [vmem:[%s4078_s1 + $0x604] ss:$8 sps:$4 sm:$0xff]   ;;  %v2431_v17 = vcombine.low %v3477_v37, %v3480_v38  ;;  %v2951_v37 = vld [vmem:[%s4078_s1 + $0x230] ss:$8 sps:$4 sm:$0xff]  }
  0x4f   : > { %2101 = vmatprep.subr.bf16.mxu0 %v2854_v18  ;;  %v2933_v18 = vld [vmem:[%s4078_s1 + $0x200] ss:$8 sps:$4 sm:$0xff]   ;;  %v2954_v38 = vld [vmem:[%s4078_s1 + $0x630] ss:$8 sps:$4 sm:$0xff]  }
  0x51   : > { %1930 = vmatpush1.bf16.msra.mxu1 %v2849_v19  ;;  %v2439_v19 = vcombine.low %v3491_v42, %v3494_v43  ;;  %v2960_v42 = vld [vmem:[%s4078_s1 + $0x640] ss:$8 sps:$4 sm:$0xff]   ;;  %v2965_v43 = vld [vmem:[%s4078_s1 + $0x254] ss:$8 sps:$4 sm:$0xff]  }
  0x52   : > { %2102 = vmatpush1.bf16.msra.mxu0 %v2852_v20  ;;  %1931 = vmatprep.subr.bf16.mxu1 %v2857_v21  ;;  %v2936_v20 = vld [vmem:[%s4078_s1 + $0x600] ss:$8 sps:$4 sm:$0xff]   ;;  %v2941_v21 = vld [vmem:[%s4078_s1 + $0x214] ss:$8 sps:$4 sm:$0xff]  }
  0x53   : > { %2103 = vmatprep.subr.bf16.mxu0 %v2860_v22  ;;  %v2944_v22 = vld [vmem:[%s4078_s1 + $0x614] ss:$8 sps:$4 sm:$0xff]  }
  0x55   : > { %1932 = vmatpush1.bf16.msra.mxu1 %v2855_v23  ;;  %v2939_v23 = vld [vmem:[%s4078_s1 + $0x210] ss:$8 sps:$4 sm:$0xff]  }
  0x56   : > { %2104 = vmatpush1.bf16.msra.mxu0 %v2858_v24  ;;  %1933 = vmatprep.subr.bf16.mxu1 %v2863_v25  ;;  %v2942_v24 = vld [vmem:[%s4078_s1 + $0x610] ss:$8 sps:$4 sm:$0xff]  }
  0x57   : > { %2105 = vmatprep.subr.bf16.mxu0 %v2866_v26  ;;  %v3629_v25 = vld [vmem:[%s3326_s22 + $0x10] sm:$0xff] }
  0x58   : > { %v3632_v26 = vld [vmem:[%s3326_s22 + $0x50] sm:$0xff] }
  0x59   : > { %1934 = vmatpush1.bf16.msra.mxu1 %v2861_v27  ;;  %v2947_v27 = vld [vmem:[%s4078_s1 + $0x224] ss:$8 sps:$4 sm:$0xff]  }
  0x5a   : > { %2106 = vmatpush1.bf16.msra.mxu0 %v2864_v28  ;;  %1935 = vmatprep.subr.bf16.mxu1 %v2869_v29  ;;  %v2950_v28 = vld [vmem:[%s4078_s1 + $0x624] ss:$8 sps:$4 sm:$0xff]   ;;  %v2434_v29 = vcombine.high %v3629_v25, %v3632_v26 }
  0x5b   : > { %2107 = vmatprep.subr.bf16.mxu0 %v2872_v30  ;;  %v3643_v30 = vld [vmem:[%s3326_s22 + $0x30] sm:$0xff] }
  0x5d   : > { %1936 = vmatpush1.bf16.msra.mxu1 %v2867_v31  ;;  %v3646_v31 = vld [vmem:[%s3326_s22 + $0x70] sm:$0xff] }
  0x5e   : > { %2108 = vmatpush1.bf16.msra.mxu0 %v2870_v32  ;;  %1937 = vmatprep.subr.bf16.mxu1 %v2875_v33  ;;  %v2442_v32 = vcombine.high %v3643_v30, %v3646_v31  ;;  %v2945_v33 = vld [vmem:[%s4078_s1 + $0x220] ss:$8 sps:$4 sm:$0xff]  }
  0x5f   : > { %2109 = vmatprep.subr.bf16.mxu0 %v2878_v34  ;;  %v2948_v34 = vld [vmem:[%s4078_s1 + $0x620] ss:$8 sps:$4 sm:$0xff]  }
  0x61   : > { %1938 = vmatpush1.bf16.msra.mxu1 %v2873_v35  ;;  %v2953_v35 = vld [vmem:[%s4078_s1 + $0x234] ss:$8 sps:$4 sm:$0xff]  }
  0x62   : > { %2110 = vmatpush1.bf16.msra.mxu0 %v2876_v36  ;;  %1939 = vmatprep.subr.bf16.mxu1 %v2881_v39  ;;  %v2956_v36 = vld [vmem:[%s4078_s1 + $0x634] ss:$8 sps:$4 sm:$0xff]   ;;  %v2959_v39 = vld [vmem:[%s4078_s1 + $0x244] ss:$8 sps:$4 sm:$0xff]  }
  0x63   : > { %2111 = vmatprep.subr.bf16.mxu0 %v2884_v40  ;;  %v2962_v40 = vld [vmem:[%s4078_s1 + $0x644] ss:$8 sps:$4 sm:$0xff]  }
  0x65   : > { %1940 = vmatpush1.bf16.msra.mxu1 %v2879_v45  ;;  %v2963_v45 = vld [vmem:[%s4078_s1 + $0x250] ss:$8 sps:$4 sm:$0xff]  }
  0x66   : > { %2112 = vmatpush1.bf16.msra.mxu0 %v2882_v46  ;;  %1941 = vmatprep.subr.bf16.mxu1 %v2887_v47  ;;  %v2966_v46 = vld [vmem:[%s4078_s1 + $0x650] ss:$8 sps:$4 sm:$0xff]   ;;  %v2971_v47 = vld [vmem:[%s4078_s1 + $0x264] ss:$8 sps:$4 sm:$0xff]  }
  0x67   : > { %2113 = vmatprep.subr.bf16.mxu0 %v2890_v48  ;;  %v2974_v48 = vld [vmem:[%s4078_s1 + $0x664] ss:$8 sps:$4 sm:$0xff]  }
  0x69   : > { %1942 = vmatpush1.bf16.msra.mxu1 %v2885_v49  ;;  %v2969_v49 = vld [vmem:[%s4078_s1 + $0x260] ss:$8 sps:$4 sm:$0xff]  }
  0x6a   : > { %2114 = vmatpush1.bf16.msra.mxu0 %v2888_v50  ;;  %1943 = vmatprep.subr.bf16.mxu1 %v2893_v51  ;;  %v2972_v50 = vld [vmem:[%s4078_s1 + $0x660] ss:$8 sps:$4 sm:$0xff]   ;;  %v2977_v51 = vld [vmem:[%s4078_s1 + $0x274] ss:$8 sps:$4 sm:$0xff]  }
  0x6b   : > { %2115 = vmatprep.subr.bf16.mxu0 %v2896_v52  ;;  %v2980_v52 = vld [vmem:[%s4078_s1 + $0x674] ss:$8 sps:$4 sm:$0xff]  }
  0x6d   : > { %1944 = vmatpush1.bf16.msra.mxu1 %v2891_v53  ;;  %v2975_v53 = vld [vmem:[%s4078_s1 + $0x270] ss:$8 sps:$4 sm:$0xff]  }
  0x6e   : > { %2116 = vmatpush1.bf16.msra.mxu0 %v2894_v54  ;;  %1945 = vmatprep.subr.bf16.mxu1 %v2899_v55  ;;  %v2978_v54 = vld [vmem:[%s4078_s1 + $0x670] ss:$8 sps:$4 sm:$0xff]   ;;  %v2983_v55 = vld [vmem:[%s4078_s1 + $0x284] ss:$8 sps:$4 sm:$0xff]  }
  0x6f   : > { %2117 = vmatprep.subr.bf16.mxu0 %v2902_v56  ;;  %v2986_v56 = vld [vmem:[%s4078_s1 + $0x684] ss:$8 sps:$4 sm:$0xff]  }
  0x71   : > { %1946 = vmatpush1.bf16.msra.mxu1 %v2897_v57  ;;  %v2981_v57 = vld [vmem:[%s4078_s1 + $0x280] ss:$8 sps:$4 sm:$0xff]  }
  0x72   : > { %2118 = vmatpush1.bf16.msra.mxu0 %v2900_v58  ;;  %1947 = vmatprep.subr.bf16.mxu1 %v2905_v59  ;;  %v2984_v58 = vld [vmem:[%s4078_s1 + $0x680] ss:$8 sps:$4 sm:$0xff]   ;;  %v2989_v59 = vld [vmem:[%s4078_s1 + $0x294] ss:$8 sps:$4 sm:$0xff]  }
  0x73   : > { %2119 = vmatprep.subr.bf16.mxu0 %v2908_v60  ;;  %v2992_v60 = vld [vmem:[%s4078_s1 + $0x694] ss:$8 sps:$4 sm:$0xff]  }
  0x75   : > { %1948 = vmatpush1.bf16.msra.mxu1 %v2903_v61  ;;  %v2987_v61 = vld [vmem:[%s4078_s1 + $0x290] ss:$8 sps:$4 sm:$0xff]  }
  0x76   : > { %2120 = vmatpush1.bf16.msra.mxu0 %v2906_v62  ;;  %1949 = vmatprep.subr.bf16.mxu1 %v2911_v63  ;;  %v2990_v62 = vld [vmem:[%s4078_s1 + $0x690] ss:$8 sps:$4 sm:$0xff]   ;;  %v2995_v63 = vld [vmem:[%s4078_s1 + $0x2a4] ss:$8 sps:$4 sm:$0xff]  }
  0x77   : > { %2121 = vmatprep.subr.bf16.mxu0 %v2914_v0  ;;  %v2998_v0 = vld [vmem:[%s4078_s1 + $0x6a4] ss:$8 sps:$4 sm:$0xff]  }
  0x79   : > { %1950 = vmatpush1.bf16.msra.mxu1 %v2909_v1  ;;  %v2993_v1 = vld [vmem:[%s4078_s1 + $0x2a0] ss:$8 sps:$4 sm:$0xff]  }
  0x7a   : > { %2122 = vmatpush1.bf16.msra.mxu0 %v2912_v2  ;;  %1951 = vmatprep.subr.bf16.mxu1 %v2917_v3  ;;  %v2996_v2 = vld [vmem:[%s4078_s1 + $0x6a0] ss:$8 sps:$4 sm:$0xff]   ;;  %v3001_v3 = vld [vmem:[%s4078_s1 + $0x2b4] ss:$8 sps:$4 sm:$0xff]  }
  0x7b   : > { %2123 = vmatprep.subr.bf16.mxu0 %v2920_v4  ;;  %v3004_v4 = vld [vmem:[%s4078_s1 + $0x6b4] ss:$8 sps:$4 sm:$0xff]  }
  0x7d   : > { %1952 = vmatpush1.bf16.msra.mxu1 %v2915_v5  ;;  %v2999_v5 = vld [vmem:[%s4078_s1 + $0x2b0] ss:$8 sps:$4 sm:$0xff]  }
  0x7e   : > { %2124 = vmatpush1.bf16.msra.mxu0 %v2918_v6  ;;  %1953 = vmatprep.subr.bf16.mxu1 %v2923_v7  ;;  %v3002_v6 = vld [vmem:[%s4078_s1 + $0x6b0] ss:$8 sps:$4 sm:$0xff]   ;;  %v3007_v7 = vld [vmem:[%s4078_s1 + $0x2c4] ss:$8 sps:$4 sm:$0xff]  }
  0x7f   : > { %2125 = vmatprep.subr.bf16.mxu0 %v2926_v8  ;;  %v3010_v8 = vld [vmem:[%s4078_s1 + $0x6c4] ss:$8 sps:$4 sm:$0xff]  }
  0x81   : > { %1954 = vmatpush1.bf16.msra.mxu1 %v2921_v9  ;;  %v3005_v9 = vld [vmem:[%s4078_s1 + $0x2c0] ss:$8 sps:$4 sm:$0xff]  }
  0x82   : > { %2126 = vmatpush1.bf16.msra.mxu0 %v2924_v10  ;;  %1955 = vmatprep.subr.bf16.mxu1 %v2929_v11  ;;  %v3008_v10 = vld [vmem:[%s4078_s1 + $0x6c0] ss:$8 sps:$4 sm:$0xff]   ;;  %v3013_v11 = vld [vmem:[%s4078_s1 + $0x2d4] ss:$8 sps:$4 sm:$0xff]  }
  0x83   : > { %2127 = vmatprep.subr.bf16.mxu0 %v2932_v12  ;;  %v3016_v12 = vld [vmem:[%s4078_s1 + $0x6d4] ss:$8 sps:$4 sm:$0xff]  }
  0x85   : > { %1956 = vmatpush1.bf16.msra.mxu1 %v2927_v13  ;;  %v3011_v13 = vld [vmem:[%s4078_s1 + $0x2d0] ss:$8 sps:$4 sm:$0xff]  }
  0x86   : > { %2128 = vmatpush1.bf16.msra.mxu0 %v2930_v14  ;;  %1968 = vmatprep.subr.bf16.mxu1 %v2935_v15  ;;  %v3014_v14 = vld [vmem:[%s4078_s1 + $0x6d0] ss:$8 sps:$4 sm:$0xff]   ;;  %v3019_v15 = vld [vmem:[%s4078_s1 + $0x2e4] ss:$8 sps:$4 sm:$0xff]  }
  0x87   : > { %2140 = vmatprep.subr.bf16.mxu0 %v2938_v16  ;;  %v3022_v16 = vld [vmem:[%s4078_s1 + $0x6e4] ss:$8 sps:$4 sm:$0xff]  }
  0x88   : > { %1958 = vmatmul.mubr.bf16.vlgmr.msra.gmra.mrb[0].mxu1 %v2431_v17  ;;  %v3017_v17 = vld [vmem:[%s4078_s1 + $0x2e0] ss:$8 sps:$4 sm:$0xff]  }
  0x89   : > { %2130 = vmatmul.mubr.bf16.vlgmr.msra.gmra.mrb[0].mxu0 %v2439_v19  ;;  %1969 = vmatpush1.bf16.msra.mxu1 %v2933_v18  ;;  %v3020_v18 = vld [vmem:[%s4078_s1 + $0x6e0] ss:$8 sps:$4 sm:$0xff]   ;;  %v3025_v19 = vld [vmem:[%s4078_s1 + $0x2f4] ss:$8 sps:$4 sm:$0xff]  }
  0x8a   : > { %2141 = vmatpush1.bf16.msra.mxu0 %v2936_v20  ;;  %1970 = vmatprep.subr.bf16.mxu1 %v2941_v21  ;;  %v3028_v20 = vld [vmem:[%s4078_s1 + $0x6f4] ss:$8 sps:$4 sm:$0xff]   ;;  %v3023_v21 = vld [vmem:[%s4078_s1 + $0x2f0] ss:$8 sps:$4 sm:$0xff]  }
  0x8b   : > { %2142 = vmatprep.subr.bf16.mxu0 %v2944_v22  ;;  %2000 = vmatprep.mubr.bf16.mxu1 %v2434_v29  ;;  %v3026_v22 = vld [vmem:[%s4078_s1 + $0x6f0] ss:$8 sps:$4 sm:$0xff]   ;;  %v2441_v29 = vcombine.low %v3643_v30, %v3646_v31 }
  0x8c   : > { %2172 = vmatprep.mubr.bf16.mxu0 %v2442_v32  ;;  %v3826_v32 = vld [vmem:[%s3326_s22 + $0x58] sm:$0xff] }
  0x8d   : > { %1971 = vmatpush1.bf16.msra.mxu1 %v2939_v23  ;;  %v3031_v23 = vld [vmem:[%s4078_s1 + $0x304] ss:$8 sps:$4 sm:$0xff]  }
  0x8e   : > { %2143 = vmatpush1.bf16.msra.mxu0 %v2942_v24  ;;  %1972 = vmatprep.subr.bf16.mxu1 %v2947_v27  ;;  %v3034_v24 = vld [vmem:[%s4078_s1 + $0x704] ss:$8 sps:$4 sm:$0xff]   ;;  %v3819_v27 = vld [vmem:[%s3326_s22 + $0x18] sm:$0xff] }
  0x8f   : > { %2144 = vmatprep.subr.bf16.mxu0 %v2950_v28  ;;  %v2433_v28 = vcombine.low %v3629_v25, %v3632_v26  ;;  %v3037_v25 = vld [vmem:[%s4078_s1 + $0x314] ss:$8 sps:$4 sm:$0xff]   ;;  %v2436_v30 = vcombine.high %v3819_v27, %v3826_v32 }
  0x90   : > { %v3040_v26 = vld [vmem:[%s4078_s1 + $0x714] ss:$8 sps:$4 sm:$0xff]  }
  0x91   : > { %1973 = vmatpush1.bf16.msra.mxu1 %v2945_v33  ;;  %v3829_v33 = vld [vmem:[%s3326_s22 + $0x38] sm:$0xff] }
  0x92   : > { %2145 = vmatpush1.bf16.msra.mxu0 %v2948_v34  ;;  %1974 = vmatprep.subr.bf16.mxu1 %v2953_v35  ;;  %v3832_v34 = vld [vmem:[%s3326_s22 + $0x78] sm:$0xff]  ;;  %v3029_v35 = vld [vmem:[%s4078_s1 + $0x300] ss:$8 sps:$4 sm:$0xff]  }
  0x93   : > { %2146 = vmatprep.subr.bf16.mxu0 %v2956_v36  ;;  %v3032_v36 = vld [vmem:[%s4078_s1 + $0x700] ss:$8 sps:$4 sm:$0xff]   ;;  %v2444_v31 = vcombine.high %v3829_v33, %v3832_v34 }
  0x95   : > { %1975 = vmatpush1.bf16.msra.mxu1 %v2951_v37  ;;  %v3035_v37 = vld [vmem:[%s4078_s1 + $0x310] ss:$8 sps:$4 sm:$0xff]  }
  0x96   : > { %2147 = vmatpush1.bf16.msra.mxu0 %v2954_v38  ;;  %1976 = vmatprep.subr.bf16.mxu1 %v2959_v39  ;;  %v3038_v38 = vld [vmem:[%s4078_s1 + $0x710] ss:$8 sps:$4 sm:$0xff]   ;;  %v3043_v39 = vld [vmem:[%s4078_s1 + $0x324] ss:$8 sps:$4 sm:$0xff]  }
  0x97   : > { %2148 = vmatprep.subr.bf16.mxu0 %v2962_v40  ;;  %v3046_v40 = vld [vmem:[%s4078_s1 + $0x724] ss:$8 sps:$4 sm:$0xff]  }
  0x99   : > { %1977 = vmatpush1.bf16.msra.mxu1 %v2957_v41  ;;  %v3041_v41 = vld [vmem:[%s4078_s1 + $0x320] ss:$8 sps:$4 sm:$0xff]  }
  0x9a   : > { %2149 = vmatpush1.bf16.msra.mxu0 %v2960_v42  ;;  %1978 = vmatprep.subr.bf16.mxu1 %v2965_v43  ;;  %v3044_v42 = vld [vmem:[%s4078_s1 + $0x720] ss:$8 sps:$4 sm:$0xff]   ;;  %v3049_v43 = vld [vmem:[%s4078_s1 + $0x334] ss:$8 sps:$4 sm:$0xff]  }
  0x9b   : > { %2150 = vmatprep.subr.bf16.mxu0 %v2968_v44  ;;  %v3052_v44 = vld [vmem:[%s4078_s1 + $0x734] ss:$8 sps:$4 sm:$0xff]  }
  0x9d   : > { %1979 = vmatpush1.bf16.msra.mxu1 %v2963_v45  ;;  %v3047_v45 = vld [vmem:[%s4078_s1 + $0x330] ss:$8 sps:$4 sm:$0xff]  }
  0x9e   : > { %2151 = vmatpush1.bf16.msra.mxu0 %v2966_v46  ;;  %1980 = vmatprep.subr.bf16.mxu1 %v2971_v47  ;;  %v3050_v46 = vld [vmem:[%s4078_s1 + $0x730] ss:$8 sps:$4 sm:$0xff]   ;;  %v3055_v47 = vld [vmem:[%s4078_s1 + $0x344] ss:$8 sps:$4 sm:$0xff]  }
  0x9f   : > { %2152 = vmatprep.subr.bf16.mxu0 %v2974_v48  ;;  %v3058_v48 = vld [vmem:[%s4078_s1 + $0x744] ss:$8 sps:$4 sm:$0xff]  }
  0xa1   : > { %1981 = vmatpush1.bf16.msra.mxu1 %v2969_v49  ;;  %v3053_v49 = vld [vmem:[%s4078_s1 + $0x340] ss:$8 sps:$4 sm:$0xff]  }
  0xa2   : > { %2153 = vmatpush1.bf16.msra.mxu0 %v2972_v50  ;;  %1982 = vmatprep.subr.bf16.mxu1 %v2977_v51  ;;  %v3056_v50 = vld [vmem:[%s4078_s1 + $0x740] ss:$8 sps:$4 sm:$0xff]   ;;  %v3061_v51 = vld [vmem:[%s4078_s1 + $0x354] ss:$8 sps:$4 sm:$0xff]  }
  0xa3   : > { %2154 = vmatprep.subr.bf16.mxu0 %v2980_v52  ;;  %v3064_v52 = vld [vmem:[%s4078_s1 + $0x754] ss:$8 sps:$4 sm:$0xff]  }
  0xa5   : > { %1983 = vmatpush1.bf16.msra.mxu1 %v2975_v53  ;;  %v3059_v53 = vld [vmem:[%s4078_s1 + $0x350] ss:$8 sps:$4 sm:$0xff]  }
  0xa6   : > { %2155 = vmatpush1.bf16.msra.mxu0 %v2978_v54  ;;  %1984 = vmatprep.subr.bf16.mxu1 %v2983_v55  ;;  %v3062_v54 = vld [vmem:[%s4078_s1 + $0x750] ss:$8 sps:$4 sm:$0xff]   ;;  %v3067_v55 = vld [vmem:[%s4078_s1 + $0x364] ss:$8 sps:$4 sm:$0xff]  }
  0xa7   : > { %2156 = vmatprep.subr.bf16.mxu0 %v2986_v56  ;;  %v3070_v56 = vld [vmem:[%s4078_s1 + $0x764] ss:$8 sps:$4 sm:$0xff]  }
  0xa9   : > { %1985 = vmatpush1.bf16.msra.mxu1 %v2981_v57  ;;  %v3065_v57 = vld [vmem:[%s4078_s1 + $0x360] ss:$8 sps:$4 sm:$0xff]  }
  0xaa   : > { %2157 = vmatpush1.bf16.msra.mxu0 %v2984_v58  ;;  %1986 = vmatprep.subr.bf16.mxu1 %v2989_v59  ;;  %v3068_v58 = vld [vmem:[%s4078_s1 + $0x760] ss:$8 sps:$4 sm:$0xff]   ;;  %v3073_v59 = vld [vmem:[%s4078_s1 + $0x374] ss:$8 sps:$4 sm:$0xff]  }
  0xab   : > { %2158 = vmatprep.subr.bf16.mxu0 %v2992_v60  ;;  %v3076_v60 = vld [vmem:[%s4078_s1 + $0x774] ss:$8 sps:$4 sm:$0xff]  }
  0xad   : > { %1987 = vmatpush1.bf16.msra.mxu1 %v2987_v61  ;;  %v3071_v61 = vld [vmem:[%s4078_s1 + $0x370] ss:$8 sps:$4 sm:$0xff]  }
  0xae   : > { %2159 = vmatpush1.bf16.msra.mxu0 %v2990_v62  ;;  %1988 = vmatprep.subr.bf16.mxu1 %v2995_v63  ;;  %v3074_v62 = vld [vmem:[%s4078_s1 + $0x770] ss:$8 sps:$4 sm:$0xff]   ;;  %v3079_v63 = vld [vmem:[%s4078_s1 + $0x384] ss:$8 sps:$4 sm:$0xff]  }
  0xaf   : > { %2160 = vmatprep.subr.bf16.mxu0 %v2998_v0  ;;  %v3082_v0 = vld [vmem:[%s4078_s1 + $0x784] ss:$8 sps:$4 sm:$0xff]  }
  0xb1   : > { %1989 = vmatpush1.bf16.msra.mxu1 %v2993_v1  ;;  %v3077_v1 = vld [vmem:[%s4078_s1 + $0x380] ss:$8 sps:$4 sm:$0xff]  }
  0xb2   : > { %2161 = vmatpush1.bf16.msra.mxu0 %v2996_v2  ;;  %1990 = vmatprep.subr.bf16.mxu1 %v3001_v3  ;;  %v3080_v2 = vld [vmem:[%s4078_s1 + $0x780] ss:$8 sps:$4 sm:$0xff]   ;;  %v3085_v3 = vld [vmem:[%s4078_s1 + $0x394] ss:$8 sps:$4 sm:$0xff]  }
  0xb3   : > { %2162 = vmatprep.subr.bf16.mxu0 %v3004_v4  ;;  %v3088_v4 = vld [vmem:[%s4078_s1 + $0x794] ss:$8 sps:$4 sm:$0xff]  }
  0xb5   : > { %1991 = vmatpush1.bf16.msra.mxu1 %v2999_v5  ;;  %v3083_v5 = vld [vmem:[%s4078_s1 + $0x390] ss:$8 sps:$4 sm:$0xff]  }
  0xb6   : > { %2163 = vmatpush1.bf16.msra.mxu0 %v3002_v6  ;;  %1992 = vmatprep.subr.bf16.mxu1 %v3007_v7  ;;  %v3086_v6 = vld [vmem:[%s4078_s1 + $0x790] ss:$8 sps:$4 sm:$0xff]   ;;  %v3091_v7 = vld [vmem:[%s4078_s1 + $0x3a4] ss:$8 sps:$4 sm:$0xff]  }
  0xb7   : > { %2164 = vmatprep.subr.bf16.mxu0 %v3010_v8  ;;  %v3094_v8 = vld [vmem:[%s4078_s1 + $0x7a4] ss:$8 sps:$4 sm:$0xff]  }
  0xb9   : > { %1993 = vmatpush1.bf16.msra.mxu1 %v3005_v9  ;;  %v3089_v9 = vld [vmem:[%s4078_s1 + $0x3a0] ss:$8 sps:$4 sm:$0xff]  }
  0xba   : > { %2165 = vmatpush1.bf16.msra.mxu0 %v3008_v10  ;;  %1994 = vmatprep.subr.bf16.mxu1 %v3013_v11  ;;  %v3092_v10 = vld [vmem:[%s4078_s1 + $0x7a0] ss:$8 sps:$4 sm:$0xff]   ;;  %v3097_v11 = vld [vmem:[%s4078_s1 + $0x3b4] ss:$8 sps:$4 sm:$0xff]  }
  0xbb   : > { %2166 = vmatprep.subr.bf16.mxu0 %v3016_v12  ;;  %v3100_v12 = vld [vmem:[%s4078_s1 + $0x7b4] ss:$8 sps:$4 sm:$0xff]  }
  0xbd   : > { %1995 = vmatpush1.bf16.msra.mxu1 %v3011_v13  ;;  %v3095_v13 = vld [vmem:[%s4078_s1 + $0x3b0] ss:$8 sps:$4 sm:$0xff]  }
  0xbe   : > { %2167 = vmatpush1.bf16.msra.mxu0 %v3014_v14  ;;  %1996 = vmatprep.subr.bf16.mxu1 %v3019_v15  ;;  %v3098_v14 = vld [vmem:[%s4078_s1 + $0x7b0] ss:$8 sps:$4 sm:$0xff]   ;;  %v3103_v15 = vld [vmem:[%s4078_s1 + $0x3c4] ss:$8 sps:$4 sm:$0xff]  }
  0xbf   : > { %2168 = vmatprep.subr.bf16.mxu0 %v3022_v16  ;;  %v3106_v16 = vld [vmem:[%s4078_s1 + $0x7c4] ss:$8 sps:$4 sm:$0xff]  }
  0xc1   : > { %1997 = vmatpush1.bf16.msra.mxu1 %v3017_v17  ;;  %v3101_v17 = vld [vmem:[%s4078_s1 + $0x3c0] ss:$8 sps:$4 sm:$0xff]  }
  0xc2   : > { %2169 = vmatpush1.bf16.msra.mxu0 %v3020_v18  ;;  %1998 = vmatprep.subr.bf16.mxu1 %v3025_v19  ;;  %v3104_v18 = vld [vmem:[%s4078_s1 + $0x7c0] ss:$8 sps:$4 sm:$0xff]   ;;  %v3109_v19 = vld [vmem:[%s4078_s1 + $0x3d4] ss:$8 sps:$4 sm:$0xff]  }
  0xc3   : > { %2170 = vmatprep.subr.bf16.mxu0 %v3028_v20  ;;  %v3112_v20 = vld [vmem:[%s4078_s1 + $0x7d4] ss:$8 sps:$4 sm:$0xff]  }
  0xc5   : > { %1999 = vmatpush1.bf16.msra.mxu1 %v3023_v21  ;;  %v3107_v21 = vld [vmem:[%s4078_s1 + $0x3d0] ss:$8 sps:$4 sm:$0xff]  }
  0xc6   : > { %2171 = vmatpush1.bf16.msra.mxu0 %v3026_v22  ;;  %2011 = vmatprep.subr.bf16.mxu1 %v3031_v23  ;;  %v3110_v22 = vld [vmem:[%s4078_s1 + $0x7d0] ss:$8 sps:$4 sm:$0xff]   ;;  %v3115_v23 = vld [vmem:[%s4078_s1 + $0x3e4] ss:$8 sps:$4 sm:$0xff]  }
  0xc7   : > { %2183 = vmatprep.subr.bf16.mxu0 %v3034_v24  ;;  %v3118_v24 = vld [vmem:[%s4078_s1 + $0x7e4] ss:$8 sps:$4 sm:$0xff]  }
  0xc8   : > { %2001 = vmatmul.mubr.bf16.vlgmr.msra.gmra.mrb[0].mxu1 %v2433_v28  ;;  %v3113_v28 = vld [vmem:[%s4078_s1 + $0x3e0] ss:$8 sps:$4 sm:$0xff]  }
  0xc9   : > { %2173 = vmatmul.mubr.bf16.vlgmr.msra.gmra.mrb[0].mxu0 %v2441_v29  ;;  %2012 = vmatpush1.bf16.msra.mxu1 %v3029_v35  ;;  %v3116_v29 = vld [vmem:[%s4078_s1 + $0x7e0] ss:$8 sps:$4 sm:$0xff]   ;;  %v3121_v35 = vld [vmem:[%s4078_s1 + $0x3f4] ss:$8 sps:$4 sm:$0xff]  }
  0xca   : > { %2184 = vmatpush1.bf16.msra.mxu0 %v3032_v36  ;;  %2013 = vmatprep.subr.bf16.mxu1 %v3037_v25  ;;  %v3124_v36 = vld [vmem:[%s4078_s1 + $0x7f4] ss:$8 sps:$4 sm:$0xff]   ;;  %v3119_v25 = vld [vmem:[%s4078_s1 + $0x3f0] ss:$8 sps:$4 sm:$0xff]  }
  0xcb   : > { %2185 = vmatprep.subr.bf16.mxu0 %v3040_v26  ;;  %2043 = vmatprep.mubr.bf16.mxu1 %v2436_v30  ;;  %v3122_v26 = vld [vmem:[%s4078_s1 + $0x7f0] ss:$8 sps:$4 sm:$0xff]   ;;  %v2435_v30 = vcombine.low %v3819_v27, %v3826_v32 }
  0xcc   : > { %2215 = vmatprep.mubr.bf16.mxu0 %v2444_v31  ;;  %v2443_v31 = vcombine.low %v3829_v33, %v3832_v34 }
  0xcd   : > { %2014 = vmatpush1.bf16.msra.mxu1 %v3035_v37 }
  0xce   : > { %2186 = vmatpush1.bf16.msra.mxu0 %v3038_v38  ;;  %2015 = vmatprep.subr.bf16.mxu1 %v3043_v39 }
  0xcf   : > { %2187 = vmatprep.subr.bf16.mxu0 %v3046_v40 }
  0xd1   : > { %2016 = vmatpush1.bf16.msra.mxu1 %v3041_v41 }
  0xd2   : > { %2188 = vmatpush1.bf16.msra.mxu0 %v3044_v42  ;;  %2017 = vmatprep.subr.bf16.mxu1 %v3049_v43 }
  0xd3   : > { %2189 = vmatprep.subr.bf16.mxu0 %v3052_v44 }
  0xd5   : > { %2018 = vmatpush1.bf16.msra.mxu1 %v3047_v45 }
  0xd6   : > { %2190 = vmatpush1.bf16.msra.mxu0 %v3050_v46  ;;  %2019 = vmatprep.subr.bf16.mxu1 %v3055_v47 }
  0xd7   : > { %2191 = vmatprep.subr.bf16.mxu0 %v3058_v48 }
  0xd9   : > { %2020 = vmatpush1.bf16.msra.mxu1 %v3053_v49 }
  0xda   : > { %2192 = vmatpush1.bf16.msra.mxu0 %v3056_v50  ;;  %2021 = vmatprep.subr.bf16.mxu1 %v3061_v51 }
  0xdb   : > { %2193 = vmatprep.subr.bf16.mxu0 %v3064_v52 }
  0xdd   : > { %2022 = vmatpush1.bf16.msra.mxu1 %v3059_v53 }
  0xde   : > { %2194 = vmatpush1.bf16.msra.mxu0 %v3062_v54  ;;  %2023 = vmatprep.subr.bf16.mxu1 %v3067_v55 }
  0xdf   : > { %2195 = vmatprep.subr.bf16.mxu0 %v3070_v56 }
  0xe1   : > { %2024 = vmatpush1.bf16.msra.mxu1 %v3065_v57 }
  0xe2   : > { %2196 = vmatpush1.bf16.msra.mxu0 %v3068_v58  ;;  %2025 = vmatprep.subr.bf16.mxu1 %v3073_v59 }
  0xe3   : > { %2197 = vmatprep.subr.bf16.mxu0 %v3076_v60 }
  0xe5   : > { %2026 = vmatpush1.bf16.msra.mxu1 %v3071_v61 }
  0xe6   : > { %2198 = vmatpush1.bf16.msra.mxu0 %v3074_v62  ;;  %2027 = vmatprep.subr.bf16.mxu1 %v3079_v63 }
  0xe7   : > { %2199 = vmatprep.subr.bf16.mxu0 %v3082_v0 }
  0xe9   : > { %2028 = vmatpush1.bf16.msra.mxu1 %v3077_v1 }
  0xea   : > { %2200 = vmatpush1.bf16.msra.mxu0 %v3080_v2  ;;  %2029 = vmatprep.subr.bf16.mxu1 %v3085_v3 }
  0xeb   : > { %2201 = vmatprep.subr.bf16.mxu0 %v3088_v4 }
  0xed   : > { %2030 = vmatpush1.bf16.msra.mxu1 %v3083_v5 }
  0xee   : > { %2202 = vmatpush1.bf16.msra.mxu0 %v3086_v6  ;;  %2031 = vmatprep.subr.bf16.mxu1 %v3091_v7 }
  0xef   : > { %2203 = vmatprep.subr.bf16.mxu0 %v3094_v8 }
  0xf1   : > { %2032 = vmatpush1.bf16.msra.mxu1 %v3089_v9 }
  0xf2   : > { %2204 = vmatpush1.bf16.msra.mxu0 %v3092_v10  ;;  %2033 = vmatprep.subr.bf16.mxu1 %v3097_v11 }
  0xf3   : > { %2205 = vmatprep.subr.bf16.mxu0 %v3100_v12 }
  0xf5   : > { %2034 = vmatpush1.bf16.msra.mxu1 %v3095_v13 }
  0xf6   : > { %2206 = vmatpush1.bf16.msra.mxu0 %v3098_v14  ;;  %2035 = vmatprep.subr.bf16.mxu1 %v3103_v15 }
  0xf7   : > { %2207 = vmatprep.subr.bf16.mxu0 %v3106_v16 }
  0xf9   : > { %2036 = vmatpush1.bf16.msra.mxu1 %v3101_v17 }
  0xfa   : > { %2208 = vmatpush1.bf16.msra.mxu0 %v3104_v18  ;;  %2037 = vmatprep.subr.bf16.mxu1 %v3109_v19 }
  0xfb   : > { %2209 = vmatprep.subr.bf16.mxu0 %v3112_v20 }
  0xfd   : > { %2038 = vmatpush1.bf16.msra.mxu1 %v3107_v21 }
  0xfe   : > { %2210 = vmatpush1.bf16.msra.mxu0 %v3110_v22  ;;  %2039 = vmatprep.subr.bf16.mxu1 %v3115_v23 }
  0xff   : > { %2211 = vmatprep.subr.bf16.mxu0 %v3118_v24 }
 0x101   : > { %2040 = vmatpush1.bf16.msra.mxu1 %v3113_v28  ;;  %v3137_v28 = vmov 1966171168  }
 0x102   : > { %2212 = vmatpush1.bf16.msra.mxu0 %v3116_v29  ;;  %2041 = vmatprep.subr.bf16.mxu1 %v3121_v35  ;;  %v2278_v29 = vunpack.c.l.s4 %v3137_v28  ;;  %v2280_v35 = vlaneseq }
 0x103   : > { %2213 = vmatprep.subr.bf16.mxu0 %v3124_v36 }
 0x104   : > { %v2279_v36 = vunpack.c.0.s8 %v2278_v29 }
 0x105   : > { %2042 = vmatpush1.bf16.msra.mxu1 %v3119_v25  ;;  %v2281_v25 = vshrl.u32 %v2280_v35, 7 }
 0x106   : > { %2214 = vmatpush1.bf16.msra.mxu0 %v3122_v26 }
 0x108   : > { %2044 = vmatmul.mubr.bf16.vlgmr.msra.gmra.mrb[0].mxu1 %v2435_v30  ;;  %v2282_v30 = vsub.s32 %v2279_v36, %v2281_v25 }
 0x109   : > { %2216 = vmatmul.mubr.bf16.vlgmr.msra.gmra.mrb[0].mxu0 %v2443_v31 }
 0x1db   : > { %v2045_v37 = vpop.f32.mrb[0].mxu1 }
 0x1dc   : > { %v2217_v38 = vpop.f32.mrb[0].mxu0  ;;  %v2047_v40 = vpop.f32.mrb[1].mxu1 }
 0x1dd   : > { %v4028_v39 = vadd.f32 %v2217_v38, %v2045_v37  ;;  %v2219_v41 = vpop.f32.mrb[1].mxu0  ;;  %v2049_v43 = vpop.f32.mrb[2].mxu1 }
 0x1de   : > { %v4030_v42 = vadd.f32 %v2219_v41, %v2047_v40  ;;  %v2221_v44 = vpop.f32.mrb[2].mxu0  ;;  %v2051_v27 = vpop.f32.mrb[3].mxu1  ;;  %v2226_v40 = vld [vmem:[%s4079_s2] sm:$0x3] }
 0x1df   : > { %v4032_v45 = vadd.f32 %v2221_v44, %v2049_v43  ;;  %v2223_v32 = vpop.f32.mrb[3].mxu0  ;;  %v2242_v33 = vmul.f32 %v4028_v39, %v4028_v39  ;;  %v2300_v43 = vsub.s32 1, %v2281_v25  ;;  %v2296_v44 = vsub.s32 0, %v2281_v25 }
 0x1e0   : > { %v4034_v46 = vadd.f32 %v2223_v32, %v2051_v27  ;;  %v2243_v48 = vmul.f32 %v4030_v42, %v4030_v42 }
 0x1e1   : > { %v2228_v34 = vadd.f32 %v4032_v45, %v4028_v39  ;;  %v2244_v47 = vmul.f32 %v4032_v45, %v4032_v45 }
 0x1e2   : > { %v2235_v49 = vadd.f32 %v4034_v46, %v4030_v42  ;;  %v2245_v50 = vmul.f32 %v4034_v46, %v4034_v46 }
 0x1e3   : > { %v2229_v51 = vrot.slane %v2228_v34, 4  ;;  %v2246_v52 = vadd.f32 %v2244_v47, %v2242_v33 }
 0x1e4   : > { %v2236_v53 = vrot.slane %v2235_v49, 4  ;;  %v2253_v54 = vadd.f32 %v2245_v50, %v2243_v48 }
 0x1e5   : > { %v2230_v55 = vadd.f32 %v2229_v51, %v2228_v34  ;;  %v2247_v56 = vrot.slane %v2246_v52, 4 }
 0x1e6   : > { %v2237_v57 = vadd.f32 %v2236_v53, %v2235_v49  ;;  %v2254_v58 = vrot.slane %v2253_v54, 4 }
 0x1e7   : > { %v2231_v59 = vrot.slane %v2230_v55, 2  ;;  %v2248_v60 = vadd.f32 %v2247_v56, %v2246_v52 }
 0x1e8   : > { %v2238_v61 = vrot.slane %v2237_v57, 2  ;;  %v2255_v62 = vadd.f32 %v2254_v58, %v2253_v54  ;;  %v2227_v54 = vld [vmem:[%s4080_s3] sm:$0x3] }
 0x1e9   : > { %v2232_v63 = vadd.f32 %v2231_v59, %v2230_v55  ;;  %v2249_v0 = vrot.slane %v2248_v60, 2 }
 0x1ea   : > { %v2239_v1 = vadd.f32 %v2238_v61, %v2237_v57  ;;  %v2256_v2 = vrot.slane %v2255_v62, 2 }
 0x1eb   : > { %v2233_v3 = vrot.slane %v2232_v63, 1  ;;  %v2250_v4 = vadd.f32 %v2249_v0, %v2248_v60  ;;  %v2353_v0 = vld [vmem:[%s4081_s4 + $0x8] sm:$0xff] }
 0x1ec   : > { %v2240_v5 = vrot.slane %v2239_v1, 1  ;;  %v2257_v6 = vadd.f32 %v2256_v2, %v2255_v62 }
 0x1ed   : > { %v2234_v7 = vadd.f32 %v2233_v3, %v2232_v63  ;;  %v2251_v8 = vrot.slane %v2250_v4, 1 }
 0x1ee   : > { %v2241_v9 = vadd.f32 %v2240_v5, %v2239_v1  ;;  %v2258_v10 = vrot.slane %v2257_v6, 1 }
 0x1ef   : > { %v2252_v11 = vadd.f32 %v2251_v8, %v2250_v4  ;;  %v2260_v12 = vmul.f32 0.0625, %v2234_v7  ;;  %v2354_v4 = vld [vmem:[%s4081_s4 + $0x10] sm:$0xff]  ;;  %v2355_v8 = vld [vmem:[%s4081_s4 + $0x18] sm:$0xff] }
 0x1f0   : > { %v2259_v13 = vadd.f32 %v2258_v10, %v2257_v6  ;;  %v2261_v14 = vmul.f32 0.0625, %v2241_v9 }
 0x1f1   : > { %v2262_v15 = vmul.f32 0.0625, %v2252_v11  ;;  %v2264_v16 = vmul.f32 %v2260_v12, %v2260_v12 }
 0x1f2   : > { %v2263_v17 = vmul.f32 0.0625, %v2259_v13  ;;  %v2265_v18 = vmul.f32 %v2261_v14, %v2261_v14 }
 0x1f3   : > { %v2266_v19 = vsub.f32 %v2262_v15, %v2264_v16 }
 0x1f4   : > { %v2267_v20 = vsub.f32 %v2263_v17, %v2265_v18 }
 0x1f5   : > { %v2268_v21 = vmax.f32 %v2266_v19, 0.0 }
 0x1f6   : > { %v2269_v22 = vmax.f32 %v2267_v20, 0.0  ;;  %v2371_v20 = vld [vmem:[#allocation2] sm:$0x1] }
 0x1f7   : > { %v2270_v23 = vadd.f32 1e-05, %v2268_v21 }
 0x1f8   : > { %v2271_v24 = vadd.f32 1e-05, %v2269_v22 }
 0x1f9   : > { %3125 = vrsqrt.f32 %v2270_v23 }
 0x1fa   : > { %3127 = vrsqrt.f32 %v2271_v24 }
 0x203   : > { %v3126_v26 = vpop.eup %3125 }
 0x204   : > { %v3128_v31 = vpop.eup %3127 }
 0x205   : > { %v2276_v37 = vcombine.low %v3126_v26, %v3128_v31 }
 0x207   : > { %v2283_v38 = vrot.slane %v2276_v37, %v2282_v30 }
 0x209   : > { %v2290_v41 = vrot.slane %v2283_v38, %v2282_v30 }
 0x20b   : > { %v2292_v27 = vmul.f32 %v2290_v41, %v2226_v40 }
 0x20d   : > { %v2301_v32 = vrot.slane %v2292_v27, %v2300_v43  ;;  %v2297_v33 = vrot.slane %v2292_v27, %v2296_v44 }
 0x20f   : > { %v2305_v34 = vmul.f32 %v2301_v32, %v2261_v14  ;;  %v2328_v47 = vmul.f32 %v4034_v46, %v2301_v32  ;;  %v2304_v48 = vmul.f32 %v2297_v33, %v2260_v12  ;;  %v2325_v49 = vmul.f32 %v4028_v39, %v2297_v33 }
 0x210   : > { %v2326_v50 = vmul.f32 %v4030_v42, %v2301_v32  ;;  %v2327_v51 = vmul.f32 %v4032_v45, %v2297_v33  ;;  %v2352_v45 = vld [vmem:[%s4081_s4] sm:$0xff] }
 0x211   : > { %v2308_v52 = vcombine.low %v2304_v48, %v2305_v34 }
 0x213   : > { %v2315_v53 = vrot.slane %v2308_v52, %v2282_v30 }
 0x215   : > { %v2322_v55 = vrot.slane %v2315_v53, %v2282_v30 }
 0x217   : > { %v2324_v56 = vsub.f32 %v2227_v54, %v2322_v55 }
 0x219   : > { %v2333_v57 = vrot.slane %v2324_v56, %v2296_v44  ;;  %v2337_v58 = vrot.slane %v2324_v56, %v2300_v43 }
 0x21b   : > { %v2340_v59 = vadd.f32 %v2333_v57, %v2325_v49  ;;  %v2341_v60 = vadd.f32 %v2337_v58, %v2326_v50  ;;  %v2342_v46 = vadd.f32 %v2333_v57, %v2327_v51  ;;  %v2343_v61 = vadd.f32 %v2337_v58, %v2328_v47 }
 0x21d   : > { %v2344_v62 = vmul.f32 0.2, %v2340_v59  ;;  %v2345_v39 = vmul.f32 0.2, %v2341_v60  ;;  %v2346_v63 = vmul.f32 0.2, %v2342_v46 }
 0x21e   : > { %v2347_v42 = vmul.f32 0.2, %v2343_v61 }
 0x21f   : > { %v2348_v1 = vmax.f32 %v2340_v59, %v2344_v62  ;;  %v2349_v2 = vmax.f32 %v2341_v60, %v2345_v39  ;;  %v2350_v3 = vmax.f32 %v2342_v46, %v2346_v63 }
 0x220   : > { %v2351_v5 = vmax.f32 %v2343_v61, %v2347_v42 }
 0x221   : > { %v2356_v6 = vmul.f32 %v2352_v45, %v2348_v1  ;;  %v2357_v7 = vmul.f32 %v2353_v0, %v2349_v2  ;;  %v2358_v9 = vmul.f32 %v2354_v4, %v2350_v3 }
 0x222   : > { %v2359_v11 = vmul.f32 %v2355_v8, %v2351_v5 }
 0x223   : > { %v2360_v10 = vadd.f32 %v2357_v7, %v2356_v6 }
 0x225   : > { %v2361_v12 = vadd.f32 %v2360_v10, %v2358_v9 }
 0x227   : > { %v2362_v13 = vadd.f32 %v2361_v12, %v2359_v11 }
 0x229   : > { %2363 = vadd.xlane.f32.xlu0 %v2362_v13 }
 0x2b6   : > { %v2364_v14 = vpop.xlane.xlu0 %2363 }
 0x2b7   : > { %v2365_v15 = vrot.slane %v2364_v14, 4 }
 0x2b9   : > { %v2366_v16 = vadd.f32 %v2365_v15, %v2364_v14 }
 0x2bb   : > { %v2367_v17 = vrot.slane %v2366_v16, 2 }
 0x2bd   : > { %v2368_v18 = vadd.f32 %v2367_v17, %v2366_v16 }
 0x2bf   : > { %v2369_v19 = vrot.slane %v2368_v18, 1 }
 0x2c1   : > { %v2370_v21 = vadd.f32 %v2369_v19, %v2368_v18 }
 0x2c3   : > { %v2372_v22 = vadd.f32 %v2371_v20, %v2370_v21 }
 0x2c5   : > { %2374 = vst.msk [vmem:[%s249_s14] sm:$0x1] %vm2373_vm0, %v2372_v22 }
 0x2c6 PF: > { %s18_s23 = sadd.s32 1, %s3135_s23  }
 0x2c7   : > { %p15_p4 = scmp.ge.s32.totalorder %s18_s23, 4  }
 0x2c9   :  { %17 = sbr.rel (!%p15_p4) target bundleno = 3 (0x3), region = 74 }

</bundles_post_ra>
